<compile_context>
chip_gen: v7x
topology: tpu7x:2x2x1
jax: 0.10.0
libtpu: 0.0.40
codegen_flags: <defaults>
</compile_context>

<pallas_src>
import jax
import jax.numpy as jnp
from jax.experimental import pallas as pl
from jax.experimental.pallas import tpu as pltpu

# ---- configuration consistent with the module ----
NUM_CLASSES = 4
CHANS = 4
SAMPLES = 129            # samples - 24 >= 75 so the avg-pool produces >= 1 step
CONV_NUMS = 40           # self.conv_nums
K_TIME = 25              # temporal conv kernel width
POOL_K = 75
POOL_S = 15
BN_EPS = 1e-5

T_CONV = SAMPLES - K_TIME + 1                 # 105 conv output times
N_POOL = (T_CONV - POOL_K) // POOL_S + 1      # 3 pooled times
FLAT = CONV_NUMS * N_POOL                     # 120 classifier input features


def _round_up(x, m):
    return ((x + m - 1) // m) * m


# ---- kernel tiling constants ----
TB = 40                                  # conv output times per block
W_WIN = TB + K_TIME - 1                  # 64 input samples per block window
NB = -(-T_CONV // TB)                    # 3 blocks, cover t in [0, NB*TB)
S_XPAD = (NB - 1) * TB + W_WIN           # 144 padded samples
K_BLK = CHANS * W_WIN                    # 256 = lane-aligned contraction dim
N_BLK = TB * CONV_NUMS                   # 1600 columns per block (tl-major, g-minor)
J_PAD = 128                              # lane-dense pooled / classifier width
MAX_B_TILE = 256                         # batch rows per grid step (f32/bf16 safe)


def shallowconvnet_kernel(x_ref, wblk_ref, bias_ref, p_ref, wl_ref, bl_ref, out_ref):
    b_tile = x_ref.shape[1]
    pooled_sum = jnp.zeros((b_tile, J_PAD), jnp.float32)
    for j in range(NB):                       # static unroll, NB == 3
        # temporal(1x25) + spatial(chans x 1) conv + BatchNorm(eval): one MXU matmul
        bn = jnp.dot(x_ref[j], wblk_ref[...],
                     preferred_element_type=jnp.float32) + bias_ref[...]
        sq = bn * bn                          # square activation (f32, VPU)
        # AvgPool(1,75)/15 numerator as an MXU contraction with a binary matrix
        pooled_sum = pooled_sum + jnp.dot(sq.astype(p_ref.dtype), p_ref[j],
                                          preferred_element_type=jnp.float32)
    pooled = pooled_sum * (1.0 / POOL_K)      # mean (f32)
    logp = jnp.clip(jnp.log(pooled), 1e-7, 1e7)       # safe_log
    # Dropout: identity in inference.  Single lane-dense classifier matmul.
    out_ref[...] = jnp.dot(logp, wl_ref[...],
                           preferred_element_type=jnp.float32) + bl_ref[...]


def prepare_params(params, conv_dtype=jnp.bfloat16):
    """One-time folding of conv1 + conv2 + BatchNorm(eval), pooling and classifier."""
    hi = jax.lax.Precision.HIGHEST
    W1, b1, W2 = params["W1"], params["b1"], params["W2"]
    gamma, beta, rmean, rvar = (params["gamma"], params["beta"],
                                params["rmean"], params["rvar"])
    Wl, bl = params["Wl"], params["bl"]

    W1m = W1[:, 0, 0, :]                               # (F, K_TIME)
    W2m = W2[:, :, :, 0]                               # (G, F, C)
    scale = gamma / jnp.sqrt(rvar + BN_EPS)            # (G,)
    # Fused space-time conv weight with BN scale folded in: Wc[c, k, g]
    Wc = jnp.einsum("fk,gfc->ckg", W1m, W2m, precision=hi) * scale[None, None, :]
    bias_g = (jnp.einsum("gfc,f->g", W2m, b1, precision=hi) - rmean) * scale + beta

    # Banded per-block weight: Wblk[c*W_WIN + w, tl*G + g] = Wc[c, w - tl, g]
    k = jnp.arange(W_WIN)[:, None] - jnp.arange(TB)[None, :]        # (W_WIN, TB)
    valid = ((k >= 0) & (k < K_TIME)).astype(jnp.float32)
    kc = jnp.clip(k, 0, K_TIME - 1)
    Wblk = (Wc[:, kc, :] * valid[None, :, :, None]).reshape(K_BLK, N_BLK)

    bias_row = jnp.broadcast_to(bias_g[None, :], (TB, CONV_NUMS)).reshape(1, N_BLK)

    # Binary pooling matrix (exact in bf16); the 1/75 mean is applied in-kernel in f32.
    t_glob = jnp.arange(NB)[:, None] * TB + jnp.arange(TB)[None, :]  # (NB, TB)
    p = jnp.arange(N_POOL)
    win = ((t_glob[None] >= (p[:, None, None] * POOL_S)) &
           (t_glob[None] < (p[:, None, None] * POOL_S + POOL_K)) &
           (t_glob[None] < T_CONV)).astype(jnp.float32)              # (P, NB, TB)
    eye = jnp.eye(CONV_NUMS, dtype=jnp.float32)
    Pm = (win.transpose(1, 2, 0)[:, :, None, :, None] *
          eye[None, None, :, None, :]).reshape(NB, N_BLK, N_POOL * CONV_NUMS)
    Pm = jnp.pad(Pm, ((0, 0), (0, 0), (0, J_PAD - N_POOL * CONV_NUMS)))

    # Classifier: PyTorch flatten order is (filter-major, pool-minor); our pooled
    # columns are (pool-major, filter-minor).
    Wl_k = jnp.transpose(Wl.reshape(NUM_CLASSES, CONV_NUMS, N_POOL), (2, 1, 0))
    Wl_k = Wl_k.reshape(N_POOL * CONV_NUMS, NUM_CLASSES)
    Wl_k = jnp.pad(Wl_k, ((0, J_PAD - N_POOL * CONV_NUMS), (0, J_PAD - NUM_CLASSES)))
    bl_row = jnp.pad(bl, (0, J_PAD - NUM_CLASSES)).reshape(1, J_PAD)

    return {
        "Wblk": Wblk.astype(conv_dtype),
        "bias": bias_row.astype(jnp.float32),
        "P": Pm.astype(conv_dtype),
        "Wl": Wl_k.astype(jnp.float32),
        "bl": bl_row.astype(jnp.float32),
        "conv_dtype": conv_dtype,
    }


def _pick_b_tile(batch):
    if batch <= 16:
        return 16
    # Keep >= 2 grid steps so the "parallel" batch axis can feed both v7x cores.
    return min(MAX_B_TILE, _round_up((batch + 1) // 2, 16))


def shallow_conv_net_forward(x, kparams):
    """x: (B, 1, CHANS, SAMPLES) float32 (NCHW). Returns (B, NUM_CLASSES) float32."""
    B = x.shape[0]
    b_tile = _pick_b_tile(B)
    b_pad = _round_up(B, b_tile)
    conv_dtype = kparams["conv_dtype"]

    # Activation prep: three overlapping 64-sample windows per channel (~1.5x raw x,
    # vs ~25x for full im2col); everything else is precomputed constants.
    x3 = jnp.pad(x[:, 0, :, :], ((0, b_pad - B), (0, 0), (0, S_XPAD - SAMPLES)))
    xb = jnp.stack([x3[:, :, j * TB:j * TB + W_WIN] for j in range(NB)], axis=1)
    xb = xb.reshape(b_pad, NB, K_BLK).transpose(1, 0, 2).astype(conv_dtype)  # (NB, b_pad, 256)

    const2 = lambda b: (0, 0)
    const3 = lambda b: (0, 0, 0)
    out = pl.pallas_call(
        shallowconvnet_kernel,
        out_shape=jax.ShapeDtypeStruct((b_pad, J_PAD), jnp.float32),
        grid=(b_pad // b_tile,),
        in_specs=[
            pl.BlockSpec((NB, b_tile, K_BLK), lambda b: (0, b, 0)),
            pl.BlockSpec((K_BLK, N_BLK), const2),
            pl.BlockSpec((1, N_BLK), const2),
            pl.BlockSpec((NB, N_BLK, J_PAD), const3),
            pl.BlockSpec((J_PAD, J_PAD), const2),
            pl.BlockSpec((1, J_PAD), const2),
        ],
        out_specs=pl.BlockSpec((b_tile, J_PAD), lambda b: (b, 0)),
        compiler_params=pltpu.CompilerParams(
            dimension_semantics=("parallel",),
            vmem_limit_bytes=48 * 1024 * 1024),
    )(xb, kparams["Wblk"], kparams["bias"], kparams["P"], kparams["Wl"], kparams["bl"])
    return out[:B, :NUM_CLASSES]


def reference_forward(x, params):
    """Pure-JAX reference mirroring the PyTorch module (eval mode), f32-accurate."""
    hi = jax.lax.Precision.HIGHEST
    W1, b1, W2 = params["W1"], params["b1"], params["W2"]
    gamma, beta, rmean, rvar = (params["gamma"], params["beta"],
                                params["rmean"], params["rvar"])
    Wl, bl = params["Wl"], params["bl"]
    B = x.shape[0]
    xw = jnp.stack([x[:, 0, :, k:k + T_CONV] for k in range(K_TIME)], axis=-1)  # (B,C,T,K)
    c1 = (jnp.einsum("bctk,fk->bfct", xw, W1[:, 0, 0, :], precision=hi)
          + b1[None, :, None, None])
    c2 = jnp.einsum("bfct,gfc->bgt", c1, W2[:, :, :, 0], precision=hi)
    bn = ((c2 - rmean[None, :, None]) * (gamma / jnp.sqrt(rvar + BN_EPS))[None, :, None]
          + beta[None, :, None])
    sq = bn * bn
    pooled = jnp.stack([sq[:, :, p * POOL_S:p * POOL_S + POOL_K].mean(-1)
                        for p in range(N_POOL)], axis=-1)              # (B, G, N_POOL)
    logp = jnp.clip(jnp.log(pooled), 1e-7, 1e7)
    flat = logp.reshape(B, FLAT)
    return jnp.dot(flat, Wl.T, precision=hi) + bl[None, :]


if __name__ == "__main__":
    key = jax.random.PRNGKey(0)
    ks = jax.random.split(key, 10)
    params = {
        "W1": 0.2 * jax.random.normal(ks[0], (CONV_NUMS, 1, 1, K_TIME), jnp.float32),
        "b1": 0.1 * jax.random.normal(ks[1], (CONV_NUMS,), jnp.float32),
        "W2": 0.2 * jax.random.normal(ks[2], (CONV_NUMS, CONV_NUMS, CHANS, 1), jnp.float32),
        "gamma": 1.0 + 0.1 * jax.random.normal(ks[3], (CONV_NUMS,), jnp.float32),
        "beta": 0.1 * jax.random.normal(ks[4], (CONV_NUMS,), jnp.float32),
        "rmean": 0.1 * jax.random.normal(ks[5], (CONV_NUMS,), jnp.float32),
        "rvar": jax.random.uniform(ks[6], (CONV_NUMS,), jnp.float32, 0.5, 1.5),
        "Wl": 0.1 * jax.random.normal(ks[7], (NUM_CLASSES, FLAT), jnp.float32),
        "bl": 0.1 * jax.random.normal(ks[8], (NUM_CLASSES,), jnp.float32),
    }
    x = jax.random.normal(ks[9], (2, 1, CHANS, SAMPLES), jnp.float32)

    ref = jax.block_until_ready(reference_forward(x, params))

    # f32 path: checks the folded conv/BN/pool/classifier algebra (matches to ~1e-5
    # in practice; tolerance kept loose enough to be robust to MXU pass selection).
    kp32 = prepare_params(params, conv_dtype=jnp.float32)
    out32 = jax.block_until_ready(shallow_conv_net_forward(x, kp32))
    assert out32.shape == (2, NUM_CLASSES)
    assert jnp.allclose(out32, ref, atol=1e-2, rtol=1e-2), (out32, ref)

    # bf16 path (the performance default): bf16 MXU matmuls, f32 accumulation/VPU math.
    kp16 = prepare_params(params, conv_dtype=jnp.bfloat16)
    out16 = jax.block_until_ready(shallow_conv_net_forward(x, kp16))
    assert out16.shape == (2, NUM_CLASSES)
    assert jnp.allclose(out16, ref, atol=3e-2, rtol=3e-2), (out16, ref)

    print("KERNEL_OK")
</pallas_src>

<mosaic_0001>
module attributes {stable_mosaic.version = 11 : i64} {
  func.func @shallowconvnet_kernel(%arg0: i32, %arg1: memref<3x16x256xf32, #tpu.memory_space<vmem>>, %arg2: memref<256x1600xf32, #tpu.memory_space<vmem>>, %arg3: memref<1x1600xf32, #tpu.memory_space<vmem>>, %arg4: memref<3x1600x128xf32, #tpu.memory_space<vmem>>, %arg5: memref<128x128xf32, #tpu.memory_space<vmem>>, %arg6: memref<1x128xf32, #tpu.memory_space<vmem>>, %arg7: memref<16x128xf32, #tpu.memory_space<vmem>>) attributes {dimension_semantics = [#tpu.dimension_semantics<parallel>], iteration_bounds = array<i64: 1>, scalar_prefetch = 0 : i64, scratch_operands = 0 : i64, tpu.core_type = #tpu.core_type<tc>, window_params = [{transform_indices = @transform_0, window_bounds = array<i64: 3, 16, 256>}, {pipeline_mode = #tpu.pipeline_mode<synchronous>, transform_indices = @transform_1, window_bounds = array<i64: 256, 1600>}, {pipeline_mode = #tpu.pipeline_mode<synchronous>, transform_indices = @transform_2, window_bounds = array<i64: 1, 1600>}, {pipeline_mode = #tpu.pipeline_mode<synchronous>, transform_indices = @transform_3, window_bounds = array<i64: 3, 1600, 128>}, {pipeline_mode = #tpu.pipeline_mode<synchronous>, transform_indices = @transform_4, window_bounds = array<i64: 128, 128>}, {pipeline_mode = #tpu.pipeline_mode<synchronous>, transform_indices = @transform_5, window_bounds = array<i64: 1, 128>}, {transform_indices = @transform_6, window_bounds = array<i64: 16, 128>}]} {
    %cst = arith.constant 0.000000e+00 : f32
    %0 = vector.broadcast %cst : f32 to vector<16x128xf32>
    %c0 = arith.constant 0 : index
    %c0_0 = arith.constant 0 : index
    %c0_1 = arith.constant 0 : index
    %1 = vector.load %arg1[%c0, %c0_0, %c0_1] : memref<3x16x256xf32, #tpu.memory_space<vmem>>, vector<1x16x256xf32>
    %2 = vector.shape_cast %1 : vector<1x16x256xf32> to vector<16x256xf32>
    %c0_2 = arith.constant 0 : index
    %c0_3 = arith.constant 0 : index
    %3 = vector.load %arg2[%c0_2, %c0_3] : memref<256x1600xf32, #tpu.memory_space<vmem>>, vector<256x1600xf32>
    %cst_4 = arith.constant dense<0.000000e+00> : vector<16x1600xf32>
    %4 = tpu.matmul %2, %3, %cst_4 {dimension_numbers = #tpu.dot_dimension_numbers<[1], [0], [0], [1], [0, 0, 1, 1], [], []>} : vector<16x256xf32>, vector<256x1600xf32>, vector<16x1600xf32> -> vector<16x1600xf32>
    %c0_5 = arith.constant 0 : index
    %c0_6 = arith.constant 0 : index
    %5 = vector.load %arg3[%c0_5, %c0_6] : memref<1x1600xf32, #tpu.memory_space<vmem>>, vector<1x1600xf32>
    %6 = vector.broadcast %5 : vector<1x1600xf32> to vector<16x1600xf32>
    %7 = arith.addf %4, %6 : vector<16x1600xf32>
    %8 = arith.mulf %7, %7 : vector<16x1600xf32>
    %c0_7 = arith.constant 0 : index
    %c0_8 = arith.constant 0 : index
    %c0_9 = arith.constant 0 : index
    %9 = vector.load %arg4[%c0_7, %c0_8, %c0_9] : memref<3x1600x128xf32, #tpu.memory_space<vmem>>, vector<1x1600x128xf32>
    %10 = vector.shape_cast %9 : vector<1x1600x128xf32> to vector<1600x128xf32>
    %cst_10 = arith.constant dense<0.000000e+00> : vector<16x128xf32>
    %11 = tpu.matmul %8, %10, %cst_10 {dimension_numbers = #tpu.dot_dimension_numbers<[1], [0], [0], [1], [0, 0, 1, 1], [], []>} : vector<16x1600xf32>, vector<1600x128xf32>, vector<16x128xf32> -> vector<16x128xf32>
    %12 = arith.addf %0, %11 : vector<16x128xf32>
    %c1 = arith.constant 1 : index
    %c0_11 = arith.constant 0 : index
    %c0_12 = arith.constant 0 : index
    %13 = vector.load %arg1[%c1, %c0_11, %c0_12] : memref<3x16x256xf32, #tpu.memory_space<vmem>>, vector<1x16x256xf32>
    %14 = vector.shape_cast %13 : vector<1x16x256xf32> to vector<16x256xf32>
    %c0_13 = arith.constant 0 : index
    %c0_14 = arith.constant 0 : index
    %15 = vector.load %arg2[%c0_13, %c0_14] : memref<256x1600xf32, #tpu.memory_space<vmem>>, vector<256x1600xf32>
    %cst_15 = arith.constant dense<0.000000e+00> : vector<16x1600xf32>
    %16 = tpu.matmul %14, %15, %cst_15 {dimension_numbers = #tpu.dot_dimension_numbers<[1], [0], [0], [1], [0, 0, 1, 1], [], []>} : vector<16x256xf32>, vector<256x1600xf32>, vector<16x1600xf32> -> vector<16x1600xf32>
    %c0_16 = arith.constant 0 : index
    %c0_17 = arith.constant 0 : index
    %17 = vector.load %arg3[%c0_16, %c0_17] : memref<1x1600xf32, #tpu.memory_space<vmem>>, vector<1x1600xf32>
    %18 = vector.broadcast %17 : vector<1x1600xf32> to vector<16x1600xf32>
    %19 = arith.addf %16, %18 : vector<16x1600xf32>
    %20 = arith.mulf %19, %19 : vector<16x1600xf32>
    %c1_18 = arith.constant 1 : index
    %c0_19 = arith.constant 0 : index
    %c0_20 = arith.constant 0 : index
    %21 = vector.load %arg4[%c1_18, %c0_19, %c0_20] : memref<3x1600x128xf32, #tpu.memory_space<vmem>>, vector<1x1600x128xf32>
    %22 = vector.shape_cast %21 : vector<1x1600x128xf32> to vector<1600x128xf32>
    %cst_21 = arith.constant dense<0.000000e+00> : vector<16x128xf32>
    %23 = tpu.matmul %20, %22, %cst_21 {dimension_numbers = #tpu.dot_dimension_numbers<[1], [0], [0], [1], [0, 0, 1, 1], [], []>} : vector<16x1600xf32>, vector<1600x128xf32>, vector<16x128xf32> -> vector<16x128xf32>
    %24 = arith.addf %12, %23 : vector<16x128xf32>
    %c2 = arith.constant 2 : index
    %c0_22 = arith.constant 0 : index
    %c0_23 = arith.constant 0 : index
    %25 = vector.load %arg1[%c2, %c0_22, %c0_23] : memref<3x16x256xf32, #tpu.memory_space<vmem>>, vector<1x16x256xf32>
    %26 = vector.shape_cast %25 : vector<1x16x256xf32> to vector<16x256xf32>
    %c0_24 = arith.constant 0 : index
    %c0_25 = arith.constant 0 : index
    %27 = vector.load %arg2[%c0_24, %c0_25] : memref<256x1600xf32, #tpu.memory_space<vmem>>, vector<256x1600xf32>
    %cst_26 = arith.constant dense<0.000000e+00> : vector<16x1600xf32>
    %28 = tpu.matmul %26, %27, %cst_26 {dimension_numbers = #tpu.dot_dimension_numbers<[1], [0], [0], [1], [0, 0, 1, 1], [], []>} : vector<16x256xf32>, vector<256x1600xf32>, vector<16x1600xf32> -> vector<16x1600xf32>
    %c0_27 = arith.constant 0 : index
    %c0_28 = arith.constant 0 : index
    %29 = vector.load %arg3[%c0_27, %c0_28] : memref<1x1600xf32, #tpu.memory_space<vmem>>, vector<1x1600xf32>
    %30 = vector.broadcast %29 : vector<1x1600xf32> to vector<16x1600xf32>
    %31 = arith.addf %28, %30 : vector<16x1600xf32>
    %32 = arith.mulf %31, %31 : vector<16x1600xf32>
    %c2_29 = arith.constant 2 : index
    %c0_30 = arith.constant 0 : index
    %c0_31 = arith.constant 0 : index
    %33 = vector.load %arg4[%c2_29, %c0_30, %c0_31] : memref<3x1600x128xf32, #tpu.memory_space<vmem>>, vector<1x1600x128xf32>
    %34 = vector.shape_cast %33 : vector<1x1600x128xf32> to vector<1600x128xf32>
    %cst_32 = arith.constant dense<0.000000e+00> : vector<16x128xf32>
    %35 = tpu.matmul %32, %34, %cst_32 {dimension_numbers = #tpu.dot_dimension_numbers<[1], [0], [0], [1], [0, 0, 1, 1], [], []>} : vector<16x1600xf32>, vector<1600x128xf32>, vector<16x128xf32> -> vector<16x128xf32>
    %36 = arith.addf %24, %35 : vector<16x128xf32>
    %cst_33 = arith.constant 0.0133333337 : f32
    %37 = vector.broadcast %cst_33 : f32 to vector<16x128xf32>
    %38 = arith.mulf %36, %37 : vector<16x128xf32>
    %39 = math.log %38 : vector<16x128xf32>
    %cst_34 = arith.constant 1.000000e-07 : f32
    %cst_35 = arith.constant 1.000000e+07 : f32
    %40 = vector.broadcast %cst_34 : f32 to vector<16x128xf32>
    %41 = arith.maximumf %40, %39 : vector<16x128xf32>
    %42 = vector.broadcast %cst_35 : f32 to vector<16x128xf32>
    %43 = arith.minimumf %42, %41 : vector<16x128xf32>
    %c0_36 = arith.constant 0 : index
    %c0_37 = arith.constant 0 : index
    %44 = vector.load %arg5[%c0_36, %c0_37] : memref<128x128xf32, #tpu.memory_space<vmem>>, vector<128x128xf32>
    %cst_38 = arith.constant dense<0.000000e+00> : vector<16x128xf32>
    %45 = tpu.matmul %43, %44, %cst_38 {dimension_numbers = #tpu.dot_dimension_numbers<[1], [0], [0], [1], [0, 0, 1, 1], [], []>} : vector<16x128xf32>, vector<128x128xf32>, vector<16x128xf32> -> vector<16x128xf32>
    %c0_39 = arith.constant 0 : index
    %c0_40 = arith.constant 0 : index
    %46 = vector.load %arg6[%c0_39, %c0_40] : memref<1x128xf32, #tpu.memory_space<vmem>>, vector<1x128xf32>
    %47 = vector.broadcast %46 : vector<1x128xf32> to vector<16x128xf32>
    %48 = arith.addf %45, %47 : vector<16x128xf32>
    %c0_41 = arith.constant 0 : index
    %c0_42 = arith.constant 0 : index
    %49 = vector.load %arg7[%c0_41, %c0_42] : memref<16x128xf32, #tpu.memory_space<vmem>>, vector<16x128xf32>
    tpu.vector_store %arg7[%c0_41, %c0_42], %48 {strides = array<i32>} : memref<16x128xf32, #tpu.memory_space<vmem>>, vector<16x128xf32>,
    return
  }
  func.func @transform_0(%arg0: i32) -> (i32, i32, i32) {
    %c0_i32 = arith.constant 0 : i32
    %c0_i32_0 = arith.constant 0 : i32
    %c0_i32_1 = arith.constant 0 : i32
    return %c0_i32, %arg0, %c0_i32_0 : i32, i32, i32
  }
  func.func @transform_1(%arg0: i32) -> (i32, i32) {
    %c0_i32 = arith.constant 0 : i32
    %c0_i32_0 = arith.constant 0 : i32
    %c0_i32_1 = arith.constant 0 : i32
    return %c0_i32, %c0_i32_0 : i32, i32
  }
  func.func @transform_2(%arg0: i32) -> (i32, i32) {
    %c0_i32 = arith.constant 0 : i32
    %c0_i32_0 = arith.constant 0 : i32
    %c0_i32_1 = arith.constant 0 : i32
    return %c0_i32, %c0_i32_0 : i32, i32
  }
  func.func @transform_3(%arg0: i32) -> (i32, i32, i32) {
    %c0_i32 = arith.constant 0 : i32
    %c0_i32_0 = arith.constant 0 : i32
    %c0_i32_1 = arith.constant 0 : i32
    %c0_i32_2 = arith.constant 0 : i32
    return %c0_i32, %c0_i32_0, %c0_i32_1 : i32, i32, i32
  }
  func.func @transform_4(%arg0: i32) -> (i32, i32) {
    %c0_i32 = arith.constant 0 : i32
    %c0_i32_0 = arith.constant 0 : i32
    %c0_i32_1 = arith.constant 0 : i32
    return %c0_i32, %c0_i32_0 : i32, i32
  }
  func.func @transform_5(%arg0: i32) -> (i32, i32) {
    %c0_i32 = arith.constant 0 : i32
    %c0_i32_0 = arith.constant 0 : i32
    %c0_i32_1 = arith.constant 0 : i32
    return %c0_i32, %c0_i32_0 : i32, i32
  }
  func.func @transform_6(%arg0: i32) -> (i32, i32) {
    %c0_i32 = arith.constant 0 : i32
    %c0_i32_0 = arith.constant 0 : i32
    return %arg0, %c0_i32 : i32, i32
  }
}

</mosaic_0001>

<bundles_post_ra>
// kernel: tpu_custom_call.1
= control target key start
LH: loop header
LB: loop body
LE: loop exit
PB: predicated region body
PF: predicated region fallthrough
CT: control target
= control target key end

     0   :  { %s12462_s0 = inlined_call_operand.vmem [shape: f32[3,16,256], index: 0, kind: input, shape index: {}]   ;;  %s12463_s1 = inlined_call_operand.vmem [shape: f32[256,1600], index: 1, kind: input, shape index: {}]   ;;  %s12464_s2 = inlined_call_operand.vmem [shape: f32[1,1600], index: 2, kind: input, shape index: {}]   ;;  %s12465_s3 = inlined_call_operand.vmem [shape: f32[3,1600,128], index: 3, kind: input, shape index: {}]   ;;  %s12466_s4 = inlined_call_operand.vmem [shape: f32[128,128], index: 4, kind: input, shape index: {}]   ;;  %s12467_s5 = inlined_call_operand.vmem [shape: f32[1,128], index: 5, kind: input, shape index: {}]   ;;  %s12468_s6 = inlined_call_operand.hbm [shape: f32[16,128], index: 6, kind: output, shape index: {}]  }
   0x1   :  { %v29_v0 = vld [vmem:[%s12463_s1 + $0x8] sm:$0xff]  ;;  %v42_v1 = vld [vmem:[%s12463_s1 + $0x70] sm:$0xff]  ;;  %v31_v2 = vld [vmem:[%s12463_s1 + $0x18] sm:$0xff] }
   0x2   :  { %v7895_v3 = vpack.c.bf16 %v42_v1, %v29_v0  ;;  %v44_v4 = vld [vmem:[%s12463_s1 + $0x80] sm:$0xff]  ;;  %v41_v6 = vld [vmem:[%s12463_s1 + $0x68] sm:$0xff]  ;;  %v30_v9 = vld [vmem:[%s12463_s1 + $0x10] sm:$0xff] }
   0x3   :  { %v28_v5 = vld [vmem:[%s12463_s1] sm:$0xff]  ;;  %v7906_v7 = vpack.c.bf16 %v44_v4, %v31_v2  ;;  %v43_v10 = vld [vmem:[%s12463_s1 + $0x78] sm:$0xff]  ;;  %v57_v14 = vld [vmem:[%s12463_s1 + $0xe8] sm:$0xff] }
   0x4   :  { %12820 = vst [vmem:[#allocation5_spill] sm:$0xff] %v7895_v3  ;;  %v7908_v8 = vpack.c.bf16 %v41_v6, %v28_v5  ;;  %v55_v11 = vld [vmem:[%s12463_s1 + $0xd8] sm:$0xff]  ;;  %5890 = vmatprep.subr.bf16.mxu0 %v7895_v3  ;;  %v7920_v12 = vpack.c.bf16 %v43_v10, %v30_v9  ;;  %v68_v13 = vld [vmem:[%s12463_s1 + $0x140] sm:$0xff]  ;;  %v70_v15 = vld [vmem:[%s12463_s1 + $0x150] sm:$0xff] }
   0x5   :  { %5954 = vmatprep.subr.bf16.mxu1 %v7906_v7  ;;  %v7933_v16 = vpack.c.bf16 %v68_v13, %v55_v11  ;;  %v7935_v17 = vpack.c.bf16 %v70_v15, %v57_v14  ;;  %v54_v18 = vld [vmem:[%s12463_s1 + $0xd0] sm:$0xff]  ;;  %v67_v19 = vld [vmem:[%s12463_s1 + $0x138] sm:$0xff]  ;;  %v56_v20 = vld [vmem:[%s12463_s1 + $0xe0] sm:$0xff] }
   0x6   :  { %12821 = vst [vmem:[#allocation6_spill] sm:$0xff] %v7908_v8  ;;  %12822 = vst [vmem:[#allocation7_spill] sm:$0xff] %v7920_v12  ;;  %5892 = vmatpush1.bf16.msra.mxu0 %v7908_v8  ;;  %5956 = vmatpush1.bf16.msra.mxu1 %v7920_v12  ;;  %v7947_v21 = vpack.c.bf16 %v67_v19, %v54_v18  ;;  %v69_v22 = vld [vmem:[%s12463_s1 + $0x148] sm:$0xff]  ;;  %v94_v24 = vld [vmem:[%s12463_s1 + $0x210] sm:$0xff] }
   0x7   :  { %12823 = vst [vmem:[#allocation8_spill] sm:$0xff] %v7933_v16  ;;  %12824 = vst [vmem:[#allocation9_spill] sm:$0xff] %v7935_v17  ;;  %v81_v23 = vld [vmem:[%s12463_s1 + $0x1a8] sm:$0xff]  ;;  %5894 = vmatprep.subr.bf16.mxu0 %v7933_v16  ;;  %5958 = vmatprep.subr.bf16.mxu1 %v7935_v17  ;;  %v7960_v25 = vpack.c.bf16 %v69_v22, %v56_v20  ;;  %v83_v27 = vld [vmem:[%s12463_s1 + $0x1b8] sm:$0xff] }
   0x8   :  { %v7962_v26 = vpack.c.bf16 %v94_v24, %v81_v23  ;;  %v96_v28 = vld [vmem:[%s12463_s1 + $0x220] sm:$0xff]  ;;  %v93_v31 = vld [vmem:[%s12463_s1 + $0x208] sm:$0xff]  ;;  %v82_v32 = vld [vmem:[%s12463_s1 + $0x1b0] sm:$0xff] }
   0x9   :  { %12825 = vst [vmem:[#allocation10_spill] sm:$0xff] %v7960_v25  ;;  %v80_v29 = vld [vmem:[%s12463_s1 + $0x1a0] sm:$0xff]  ;;  %v7973_v30 = vpack.c.bf16 %v96_v28, %v83_v27  ;;  %v95_v33 = vld [vmem:[%s12463_s1 + $0x218] sm:$0xff]  ;;  %v109_v37 = vld [vmem:[%s12463_s1 + $0x288] sm:$0xff] }
   0xa   :  { %12826 = vst [vmem:[#allocation11_spill] sm:$0xff] %v7962_v26  ;;  %5896 = vmatpush1.bf16.msra.mxu0 %v7947_v21  ;;  %v7985_v34 = vpack.c.bf16 %v93_v31, %v80_v29  ;;  %v107_v35 = vld [vmem:[%s12463_s1 + $0x278] sm:$0xff]  ;;  %v120_v36 = vld [vmem:[%s12463_s1 + $0x2e0] sm:$0xff]  ;;  %5960 = vmatpush1.bf16.msra.mxu1 %v7960_v25  ;;  %v7998_v38 = vpack.c.bf16 %v95_v33, %v82_v32  ;;  %v122_v40 = vld [vmem:[%s12463_s1 + $0x2f0] sm:$0xff] }
   0xb   :  { %12827 = vst [vmem:[#allocation12_spill] sm:$0xff] %v7973_v30  ;;  %5898 = vmatprep.subr.bf16.mxu0 %v7962_v26  ;;  %v8000_v39 = vpack.c.bf16 %v120_v36, %v107_v35  ;;  %v106_v41 = vld [vmem:[%s12463_s1 + $0x270] sm:$0xff]  ;;  %v119_v42 = vld [vmem:[%s12463_s1 + $0x2d8] sm:$0xff]  ;;  %5962 = vmatprep.subr.bf16.mxu1 %v7973_v30  ;;  %v8012_v43 = vpack.c.bf16 %v122_v40, %v109_v37  ;;  %v108_v44 = vld [vmem:[%s12463_s1 + $0x280] sm:$0xff] }
   0xc   :  { %12828 = vst [vmem:[#allocation13_spill] sm:$0xff] %v7985_v34  ;;  %12829 = vst [vmem:[#allocation14_spill] sm:$0xff] %v7998_v38  ;;  %v121_v45 = vld [vmem:[%s12463_s1 + $0x2e8] sm:$0xff]  ;;  %v146_v47 = vld [vmem:[%s12463_s1 + $0x3b0] sm:$0xff]  ;;  %v8033_v50 = vpack.c.bf16 %v119_v42, %v106_v41 }
   0xd   :  { %12830 = vst [vmem:[#allocation15_spill] sm:$0xff] %v8000_v39  ;;  %12831 = vst [vmem:[#allocation16_spill] sm:$0xff] %v8012_v43  ;;  %v133_v46 = vld [vmem:[%s12463_s1 + $0x348] sm:$0xff]  ;;  %v135_v48 = vld [vmem:[%s12463_s1 + $0x358] sm:$0xff]  ;;  %v8037_v51 = vpack.c.bf16 %v121_v45, %v108_v44 }
   0xe   :  { %v148_v49 = vld [vmem:[%s12463_s1 + $0x3c0] sm:$0xff]  ;;  %5900 = vmatpush1.bf16.msra.mxu0 %v7985_v34  ;;  %12832 = vst [vmem:[#allocation17_spill] sm:$0xff] %v8033_v50  ;;  %5964 = vmatpush1.bf16.msra.mxu1 %v7998_v38  ;;  %v8039_v52 = vpack.c.bf16 %v146_v47, %v133_v46  ;;  %v145_v54 = vld [vmem:[%s12463_s1 + $0x3a8] sm:$0xff]  ;;  %v134_v55 = vld [vmem:[%s12463_s1 + $0x350] sm:$0xff] }
   0xf   :  { %5902 = vmatprep.subr.bf16.mxu0 %v8000_v39  ;;  %12833 = vst [vmem:[#allocation18_spill] sm:$0xff] %v8037_v51  ;;  %v132_v53 = vld [vmem:[%s12463_s1 + $0x340] sm:$0xff]  ;;  %5966 = vmatprep.subr.bf16.mxu1 %v8012_v43  ;;  %v8051_v56 = vpack.c.bf16 %v148_v49, %v135_v48  ;;  %v147_v57 = vld [vmem:[%s12463_s1 + $0x3b8] sm:$0xff]  ;;  %v161_v60 = vld [vmem:[%s12463_s1 + $0x428] sm:$0xff] }
  0x10   :  { %12834 = vst [vmem:[#allocation19_spill] sm:$0xff] %v8039_v52  ;;  %v159_v58 = vld [vmem:[%s12463_s1 + $0x418] sm:$0xff]  ;;  %v172_v59 = vld [vmem:[%s12463_s1 + $0x480] sm:$0xff]  ;;  %v174_v61 = vld [vmem:[%s12463_s1 + $0x490] sm:$0xff]  ;;  %v8069_v62 = vpack.c.bf16 %v145_v54, %v132_v53  ;;  %v8073_v63 = vpack.c.bf16 %v147_v57, %v134_v55 }
  0x11   :  { %12835 = vst [vmem:[#allocation20_spill] sm:$0xff] %v8051_v56  ;;  %v8075_v0 = vpack.c.bf16 %v172_v59, %v159_v58  ;;  %v158_v1 = vld [vmem:[%s12463_s1 + $0x410] sm:$0xff]  ;;  %v171_v2 = vld [vmem:[%s12463_s1 + $0x478] sm:$0xff]  ;;  %v160_v4 = vld [vmem:[%s12463_s1 + $0x420] sm:$0xff]  ;;  %v8087_v5 = vpack.c.bf16 %v174_v61, %v161_v60 }
  0x12   :  { %5904 = vmatpush1.bf16.msra.mxu0 %v8033_v50  ;;  %12836 = vst [vmem:[#allocation21_spill] sm:$0xff] %v8069_v62  ;;  %5968 = vmatpush1.bf16.msra.mxu1 %v8037_v51  ;;  %12837 = vst [vmem:[#allocation22_spill] sm:$0xff] %v8073_v63  ;;  %v173_v6 = vld [vmem:[%s12463_s1 + $0x488] sm:$0xff]  ;;  %v198_v10 = vld [vmem:[%s12463_s1 + $0x550] sm:$0xff]  ;;  %v8105_v14 = vpack.c.bf16 %v171_v2, %v158_v1 }
  0x13   :  { %5906 = vmatprep.subr.bf16.mxu0 %v8039_v52  ;;  %12838 = vst [vmem:[#allocation23_spill] sm:$0xff] %v8075_v0  ;;  %5970 = vmatprep.subr.bf16.mxu1 %v8051_v56  ;;  %12839 = vst [vmem:[#allocation24_spill] sm:$0xff] %v8087_v5  ;;  %v185_v9 = vld [vmem:[%s12463_s1 + $0x4e8] sm:$0xff]  ;;  %v187_v11 = vld [vmem:[%s12463_s1 + $0x4f8] sm:$0xff]  ;;  %v8109_v15 = vpack.c.bf16 %v173_v6, %v160_v4 }
  0x14   :  { %v200_v13 = vld [vmem:[%s12463_s1 + $0x560] sm:$0xff]  ;;  %v8111_v18 = vpack.c.bf16 %v198_v10, %v185_v9  ;;  %v197_v20 = vld [vmem:[%s12463_s1 + $0x548] sm:$0xff]  ;;  %v186_v22 = vld [vmem:[%s12463_s1 + $0x4f0] sm:$0xff] }
  0x15   :  { %12840 = vst [vmem:[#allocation25_spill] sm:$0xff] %v8109_v15  ;;  %v184_v19 = vld [vmem:[%s12463_s1 + $0x4e0] sm:$0xff]  ;;  %v8123_v23 = vpack.c.bf16 %v200_v13, %v187_v11  ;;  %v199_v24 = vld [vmem:[%s12463_s1 + $0x558] sm:$0xff]  ;;  %v213_v29 = vld [vmem:[%s12463_s1 + $0x5c8] sm:$0xff] }
  0x16   :  { %5908 = vmatpush1.bf16.msra.mxu0 %v8069_v62  ;;  %5972 = vmatpush1.bf16.msra.mxu1 %v8073_v63  ;;  %12841 = vst [vmem:[#allocation26_spill] sm:$0xff] %v8111_v18  ;;  %v211_v27 = vld [vmem:[%s12463_s1 + $0x5b8] sm:$0xff]  ;;  %v224_v28 = vld [vmem:[%s12463_s1 + $0x620] sm:$0xff]  ;;  %v226_v31 = vld [vmem:[%s12463_s1 + $0x630] sm:$0xff]  ;;  %v8141_v32 = vpack.c.bf16 %v197_v20, %v184_v19  ;;  %v8145_v33 = vpack.c.bf16 %v199_v24, %v186_v22 }
  0x17   :  { %5910 = vmatprep.subr.bf16.mxu0 %v8075_v0  ;;  %5974 = vmatprep.subr.bf16.mxu1 %v8087_v5  ;;  %12842 = vst [vmem:[#allocation27_spill] sm:$0xff] %v8123_v23  ;;  %v8147_v35 = vpack.c.bf16 %v224_v28, %v211_v27  ;;  %v210_v36 = vld [vmem:[%s12463_s1 + $0x5b0] sm:$0xff]  ;;  %v223_v37 = vld [vmem:[%s12463_s1 + $0x618] sm:$0xff]  ;;  %v212_v40 = vld [vmem:[%s12463_s1 + $0x5c0] sm:$0xff]  ;;  %v8159_v41 = vpack.c.bf16 %v226_v31, %v213_v29 }
  0x18   :  { %12843 = vst [vmem:[#allocation28_spill] sm:$0xff] %v8141_v32  ;;  %12844 = vst [vmem:[#allocation29_spill] sm:$0xff] %v8145_v33  ;;  %v225_v42 = vld [vmem:[%s12463_s1 + $0x628] sm:$0xff]  ;;  %v250_v45 = vld [vmem:[%s12463_s1 + $0x6f0] sm:$0xff]  ;;  %v8177_v48 = vpack.c.bf16 %v223_v37, %v210_v36 }
  0x19   :  { %12845 = vst [vmem:[#allocation30_spill] sm:$0xff] %v8147_v35  ;;  %12846 = vst [vmem:[#allocation31_spill] sm:$0xff] %v8159_v41  ;;  %v237_v44 = vld [vmem:[%s12463_s1 + $0x688] sm:$0xff]  ;;  %v239_v46 = vld [vmem:[%s12463_s1 + $0x698] sm:$0xff]  ;;  %v8181_v49 = vpack.c.bf16 %v225_v42, %v212_v40 }
  0x1a   :  { %5912 = vmatpush1.bf16.msra.mxu0 %v8105_v14  ;;  %5976 = vmatpush1.bf16.msra.mxu1 %v8109_v15  ;;  %v252_v47 = vld [vmem:[%s12463_s1 + $0x700] sm:$0xff]  ;;  %12847 = vst [vmem:[#allocation32_spill] sm:$0xff] %v8177_v48  ;;  %v8183_v53 = vpack.c.bf16 %v250_v45, %v237_v44  ;;  %v249_v55 = vld [vmem:[%s12463_s1 + $0x6e8] sm:$0xff]  ;;  %v238_v57 = vld [vmem:[%s12463_s1 + $0x690] sm:$0xff] }
  0x1b   :  { %5914 = vmatprep.subr.bf16.mxu0 %v8111_v18  ;;  %5978 = vmatprep.subr.bf16.mxu1 %v8123_v23  ;;  %12848 = vst [vmem:[#allocation33_spill] sm:$0xff] %v8181_v49  ;;  %v236_v54 = vld [vmem:[%s12463_s1 + $0x680] sm:$0xff]  ;;  %v8195_v58 = vpack.c.bf16 %v252_v47, %v239_v46  ;;  %v251_v59 = vld [vmem:[%s12463_s1 + $0x6f8] sm:$0xff]  ;;  %v265_v1 = vld [vmem:[%s12463_s1 + $0x768] sm:$0xff] }
  0x1c   :  { %12849 = vst [vmem:[#allocation34_spill] sm:$0xff] %v8183_v53  ;;  %v263_v60 = vld [vmem:[%s12463_s1 + $0x758] sm:$0xff]  ;;  %v276_v61 = vld [vmem:[%s12463_s1 + $0x7c0] sm:$0xff]  ;;  %v278_v2 = vld [vmem:[%s12463_s1 + $0x7d0] sm:$0xff]  ;;  %v8213_v4 = vpack.c.bf16 %v249_v55, %v236_v54  ;;  %v8217_v6 = vpack.c.bf16 %v251_v59, %v238_v57 }
  0x1d   :  { %12850 = vst [vmem:[#allocation35_spill] sm:$0xff] %v8195_v58  ;;  %v8219_v9 = vpack.c.bf16 %v276_v61, %v263_v60  ;;  %v262_v10 = vld [vmem:[%s12463_s1 + $0x750] sm:$0xff]  ;;  %v275_v11 = vld [vmem:[%s12463_s1 + $0x7b8] sm:$0xff]  ;;  %v264_v13 = vld [vmem:[%s12463_s1 + $0x760] sm:$0xff]  ;;  %v8231_v19 = vpack.c.bf16 %v278_v2, %v265_v1 }
  0x1e   :  { %5916 = vmatpush1.bf16.msra.mxu0 %v8141_v32  ;;  %5980 = vmatpush1.bf16.msra.mxu1 %v8145_v33  ;;  %12851 = vst [vmem:[#allocation36_spill] sm:$0xff] %v8213_v4  ;;  %12852 = vst [vmem:[#allocation37_spill] sm:$0xff] %v8217_v6  ;;  %v277_v20 = vld [vmem:[%s12463_s1 + $0x7c8] sm:$0xff]  ;;  %v302_v24 = vld [vmem:[%s12463_s1 + $0x890] sm:$0xff]  ;;  %v8249_v29 = vpack.c.bf16 %v275_v11, %v262_v10 }
  0x1f   :  { %5918 = vmatprep.subr.bf16.mxu0 %v8147_v35  ;;  %5982 = vmatprep.subr.bf16.mxu1 %v8159_v41  ;;  %12853 = vst [vmem:[#allocation38_spill] sm:$0xff] %v8219_v9  ;;  %12854 = vst [vmem:[#allocation39_spill] sm:$0xff] %v8231_v19  ;;  %v289_v22 = vld [vmem:[%s12463_s1 + $0x828] sm:$0xff]  ;;  %v291_v27 = vld [vmem:[%s12463_s1 + $0x838] sm:$0xff]  ;;  %v8253_v31 = vpack.c.bf16 %v277_v20, %v264_v13 }
  0x20   :  { %v304_v28 = vld [vmem:[%s12463_s1 + $0x8a0] sm:$0xff]  ;;  %12855 = vst [vmem:[#allocation40_spill] sm:$0xff] %v8249_v29  ;;  %v8255_v36 = vpack.c.bf16 %v302_v24, %v289_v22  ;;  %v301_v40 = vld [vmem:[%s12463_s1 + $0x888] sm:$0xff]  ;;  %v290_v42 = vld [vmem:[%s12463_s1 + $0x830] sm:$0xff] }
  0x21   :  { %12856 = vst [vmem:[#allocation41_spill] sm:$0xff] %v8253_v31  ;;  %v288_v37 = vld [vmem:[%s12463_s1 + $0x820] sm:$0xff]  ;;  %v8267_v44 = vpack.c.bf16 %v304_v28, %v291_v27  ;;  %v303_v45 = vld [vmem:[%s12463_s1 + $0x898] sm:$0xff]  ;;  %v317_v54 = vld [vmem:[%s12463_s1 + $0x908] sm:$0xff] }
  0x22   :  { %5920 = vmatpush1.bf16.msra.mxu0 %v8177_v48  ;;  %5984 = vmatpush1.bf16.msra.mxu1 %v8181_v49  ;;  %12857 = vst [vmem:[#allocation42_spill] sm:$0xff] %v8255_v36  ;;  %v315_v46 = vld [vmem:[%s12463_s1 + $0x8f8] sm:$0xff]  ;;  %v328_v47 = vld [vmem:[%s12463_s1 + $0x960] sm:$0xff]  ;;  %v330_v55 = vld [vmem:[%s12463_s1 + $0x970] sm:$0xff]  ;;  %v8285_v57 = vpack.c.bf16 %v301_v40, %v288_v37  ;;  %v8292_v60 = vpack.c.bf16 %v303_v45, %v290_v42 }
  0x23   :  { %5922 = vmatprep.subr.bf16.mxu0 %v8183_v53  ;;  %5986 = vmatprep.subr.bf16.mxu1 %v8195_v58  ;;  %12858 = vst [vmem:[#allocation43_spill] sm:$0xff] %v8267_v44  ;;  %v314_v59 = vld [vmem:[%s12463_s1 + $0x8f0] sm:$0xff]  ;;  %v8294_v61 = vpack.c.bf16 %v328_v47, %v315_v46  ;;  %v327_v1 = vld [vmem:[%s12463_s1 + $0x958] sm:$0xff]  ;;  %v316_v2 = vld [vmem:[%s12463_s1 + $0x900] sm:$0xff]  ;;  %v8306_v11 = vpack.c.bf16 %v330_v55, %v317_v54 }
  0x24   :  { %12859 = vst [vmem:[#allocation44_spill] sm:$0xff] %v8285_v57  ;;  %12860 = vst [vmem:[#allocation45_spill] sm:$0xff] %v8292_v60  ;;  %v329_v10 = vld [vmem:[%s12463_s1 + $0x968] sm:$0xff]  ;;  %v354_v20 = vld [vmem:[%s12463_s1 + $0xa30] sm:$0xff]  ;;  %v8328_v28 = vpack.c.bf16 %v327_v1, %v314_v59 }
  0x25   :  { %12861 = vst [vmem:[#allocation46_spill] sm:$0xff] %v8294_v61  ;;  %12862 = vst [vmem:[#allocation47_spill] sm:$0xff] %v8306_v11  ;;  %v341_v13 = vld [vmem:[%s12463_s1 + $0x9c8] sm:$0xff]  ;;  %v343_v24 = vld [vmem:[%s12463_s1 + $0x9d8] sm:$0xff]  ;;  %v8332_v37 = vpack.c.bf16 %v329_v10, %v316_v2 }
  0x26   :  { %5924 = vmatpush1.bf16.msra.mxu0 %v8213_v4  ;;  %5988 = vmatpush1.bf16.msra.mxu1 %v8217_v6  ;;  %v8317_v22 = vld [vmem:[%s12462_s0 + $0x8] sm:$0xff]  ;;  %v356_v27 = vld [vmem:[%s12463_s1 + $0xa40] sm:$0xff]  ;;  %12863 = vst [vmem:[#allocation48_spill] sm:$0xff] %v8328_v28  ;;  %v8334_v40 = vpack.c.bf16 %v354_v20, %v341_v13  ;;  %v342_v46 = vld [vmem:[%s12463_s1 + $0x9d0] sm:$0xff] }
  0x27   :  { %5926 = vmatprep.subr.bf16.mxu0 %v8219_v9  ;;  %5990 = vmatprep.subr.bf16.mxu1 %v8231_v19  ;;  %12864 = vst [vmem:[#allocation49_spill] sm:$0xff] %v8332_v37  ;;  %v340_v42 = vld [vmem:[%s12463_s1 + $0x9c0] sm:$0xff]  ;;  %v353_v45 = vld [vmem:[%s12463_s1 + $0xa28] sm:$0xff]  ;;  %v8346_v47 = vpack.c.bf16 %v356_v27, %v343_v24  ;;  %v355_v54 = vld [vmem:[%s12463_s1 + $0xa38] sm:$0xff] }
  0x28   :  { %577 = vmatprep.mubr.f32.mxu0 %v8317_v22  ;;  %654 = vmatprep.mubr.f32.mxu1 %v8317_v22  ;;  %12865 = vst [vmem:[#allocation50_spill] sm:$0xff] %v8334_v40  ;;  %v367_v55 = vld [vmem:[%s12463_s1 + $0xa98] sm:$0xff]  ;;  %v380_v59 = vld [vmem:[%s12463_s1 + $0xb00] sm:$0xff]  ;;  %v369_v1 = vld [vmem:[%s12463_s1 + $0xaa8] sm:$0xff]  ;;  %v8364_v10 = vpack.c.bf16 %v353_v45, %v340_v42  ;;  %v8368_v13 = vpack.c.bf16 %v355_v54, %v342_v46 }
  0x29   :  { %12866 = vst [vmem:[#allocation51_spill] sm:$0xff] %v8346_v47  ;;  %v382_v2 = vld [vmem:[%s12463_s1 + $0xb10] sm:$0xff]  ;;  %v8370_v20 = vpack.c.bf16 %v380_v59, %v367_v55  ;;  %v379_v27 = vld [vmem:[%s12463_s1 + $0xaf8] sm:$0xff]  ;;  %v368_v42 = vld [vmem:[%s12463_s1 + $0xaa0] sm:$0xff] }
  0x2a   :  { %5928 = vmatpush1.bf16.msra.mxu0 %v8249_v29  ;;  %5992 = vmatpush1.bf16.msra.mxu1 %v8253_v31  ;;  %12867 = vst [vmem:[#allocation52_spill] sm:$0xff] %v8364_v10  ;;  %12868 = vst [vmem:[#allocation53_spill] sm:$0xff] %v8368_v13  ;;  %v366_v24 = vld [vmem:[%s12463_s1 + $0xa90] sm:$0xff]  ;;  %v8382_v45 = vpack.c.bf16 %v382_v2, %v369_v1  ;;  %v381_v46 = vld [vmem:[%s12463_s1 + $0xb08] sm:$0xff] }
  0x2b   :  { %5930 = vmatprep.subr.bf16.mxu0 %v8255_v36  ;;  %5994 = vmatprep.subr.bf16.mxu1 %v8267_v44  ;;  %12869 = vst [vmem:[#allocation54_spill] sm:$0xff] %v8370_v20  ;;  %v393_v54 = vld [vmem:[%s12463_s1 + $0xb68] sm:$0xff]  ;;  %v406_v55 = vld [vmem:[%s12463_s1 + $0xbd0] sm:$0xff]  ;;  %v395_v59 = vld [vmem:[%s12463_s1 + $0xb78] sm:$0xff]  ;;  %v8400_v2 = vpack.c.bf16 %v379_v27, %v366_v24 }
  0x2c   :  { %12870 = vst [vmem:[#allocation55_spill] sm:$0xff] %v8382_v45  ;;  %v408_v1 = vld [vmem:[%s12463_s1 + $0xbe0] sm:$0xff]  ;;  %v394_v24 = vld [vmem:[%s12463_s1 + $0xb70] sm:$0xff]  ;;  %v431_v31 = vld [vmem:[%s12463_s1 + $0xc98] sm:$0xff] }
  0x2d   :  { %12871 = vst [vmem:[#allocation56_spill] sm:$0xff] %v8400_v2  ;;  %v8418_v27 = vpack.c.bf16 %v408_v1, %v395_v59  ;;  %v434_v59 = vld [vmem:[%s12463_s1 + $0xcb0] sm:$0xff]  ;;  %v32_v19 = vld [vmem:[%s12463_s1 + $0x20] sm:$0xff]  ;;  %v45_v6 = vld [vmem:[%s12463_s1 + $0x88] sm:$0xff] }
  0x2e   :  { %5932 = vmatpush1.bf16.msra.mxu0 %v8285_v57  ;;  %5996 = vmatpush1.bf16.msra.mxu1 %v8292_v60  ;;  %v405_v60 = vld [vmem:[%s12463_s1 + $0xbc8] sm:$0xff]  ;;  %v418_v44 = vld [vmem:[%s12463_s1 + $0xc30] sm:$0xff]  ;;  %v188_v41 = vld [vmem:[%s12463_s1 + $0x500] sm:$0xff] }
  0x2f   :  { %5934 = vmatprep.subr.bf16.mxu0 %v8294_v61  ;;  %5998 = vmatprep.subr.bf16.mxu1 %v8306_v11  ;;  %v392_v11 = vld [vmem:[%s12463_s1 + $0xb60] sm:$0xff]  ;;  %12874 = vst [vmem:[#allocation59_spill] sm:$0xff] %v8418_v27  ;;  %v58_v49 = vld [vmem:[%s12463_s1 + $0xf0] sm:$0xff] }
  0x30   :  { %v8436_v1 = vpack.c.bf16 %v405_v60, %v392_v11  ;;  %v420_v60 = vld [vmem:[%s12463_s1 + $0xc40] sm:$0xff] }
  0x32   :  { %5936 = vmatpush1.bf16.msra.mxu0 %v8328_v28  ;;  %6000 = vmatpush1.bf16.msra.mxu1 %v8332_v37  ;;  %v8406_v37 = vpack.c.bf16 %v406_v55, %v393_v54  ;;  %v432_v54 = vld [vmem:[%s12463_s1 + $0xca0] sm:$0xff]  ;;  %v421_v55 = vld [vmem:[%s12463_s1 + $0xc48] sm:$0xff]  ;;  %12875 = vst [vmem:[#allocation60_spill] sm:$0xff] %v8436_v1 }
  0x33   :  { %5938 = vmatprep.subr.bf16.mxu0 %v8334_v40  ;;  %6002 = vmatprep.subr.bf16.mxu1 %v8346_v47  ;;  %v8404_v47 = vpack.c.bf16 %v381_v46, %v368_v42  ;;  %v407_v42 = vld [vmem:[%s12463_s1 + $0xbd8] sm:$0xff]  ;;  %v8454_v11 = vpack.c.bf16 %v434_v59, %v421_v55  ;;  %v48_v55 = vld [vmem:[%s12463_s1 + $0xa0] sm:$0xff]  ;;  %v8472_v59 = vpack.c.bf16 %v431_v31, %v418_v44  ;;  %v34_v31 = vld [vmem:[%s12463_s1 + $0x30] sm:$0xff] }
  0x34   :  { %12873 = vst [vmem:[#allocation58_spill] sm:$0xff] %v8406_v37  ;;  %v419_v46 = vld [vmem:[%s12463_s1 + $0xc38] sm:$0xff] }
  0x35   :  { %12872 = vst [vmem:[#allocation57_spill] sm:$0xff] %v8404_v47  ;;  %12878 = vst [vmem:[#allocation63_spill] sm:$0xff] %v8454_v11 }
  0x36   :  { %5940 = vmatpush1.bf16.msra.mxu0 %v8364_v10  ;;  %6004 = vmatpush1.bf16.msra.mxu1 %v8368_v13  ;;  %v8442_v13 = vpack.c.bf16 %v432_v54, %v419_v46  ;;  %v46_v46 = vld [vmem:[%s12463_s1 + $0x90] sm:$0xff]  ;;  %v35_v54 = vld [vmem:[%s12463_s1 + $0x38] sm:$0xff]  ;;  %12879 = vst [vmem:[#allocation64_spill] sm:$0xff] %v8472_v59 }
  0x37   :  { %5942 = vmatprep.subr.bf16.mxu0 %v8370_v20  ;;  %6006 = vmatprep.subr.bf16.mxu1 %v8382_v45  ;;  %v8440_v45 = vpack.c.bf16 %v407_v42, %v394_v24  ;;  %v433_v24 = vld [vmem:[%s12463_s1 + $0xca8] sm:$0xff]  ;;  %v8490_v44 = vpack.c.bf16 %v48_v55, %v35_v54  ;;  %v74_v54 = vld [vmem:[%s12463_s1 + $0x170] sm:$0xff]  ;;  %v8511_v55 = vld [vmem:[%s12462_s0] sm:$0xff] }
  0x38   :  { %12877 = vst [vmem:[#allocation62_spill] sm:$0xff] %v8442_v13  ;;  %v33_v42 = vld [vmem:[%s12463_s1 + $0x28] sm:$0xff] }
  0x39   :  { %12876 = vst [vmem:[#allocation61_spill] sm:$0xff] %v8440_v45  ;;  %12882 = vst [vmem:[#allocation67_spill] sm:$0xff] %v8490_v44 }
  0x3a   :  { %5944 = vmatpush1.bf16.msra.mxu0 %v8400_v2  ;;  %6008 = vmatpush1.bf16.msra.mxu1 %v8404_v47  ;;  %v8478_v47 = vpack.c.bf16 %v46_v46, %v33_v42  ;;  %v72_v42 = vld [vmem:[%s12463_s1 + $0x160] sm:$0xff]  ;;  %v61_v46 = vld [vmem:[%s12463_s1 + $0x108] sm:$0xff] }
  0x3b   :  { %5946 = vmatprep.subr.bf16.mxu0 %v8406_v37  ;;  %6010 = vmatprep.subr.bf16.mxu1 %v8418_v27  ;;  %v8476_v27 = vpack.c.bf16 %v433_v24, %v420_v60  ;;  %v47_v60 = vld [vmem:[%s12463_s1 + $0x98] sm:$0xff] }
  0x3c   :  { %12881 = vst [vmem:[#allocation66_spill] sm:$0xff] %v8478_v47  ;;  %v59_v24 = vld [vmem:[%s12463_s1 + $0xf8] sm:$0xff] }
  0x3d   :  { %12880 = vst [vmem:[#allocation65_spill] sm:$0xff] %v8476_v27  ;;  %v8519_v58 = vpack.c.bf16 %v72_v42, %v59_v24  ;;  %v98_v24 = vld [vmem:[%s12463_s1 + $0x230] sm:$0xff]  ;;  %v87_v42 = vld [vmem:[%s12463_s1 + $0x1d8] sm:$0xff] }
  0x3e   :  { %5948 = vmatpush1.bf16.msra.mxu0 %v8436_v1  ;;  %6012 = vmatpush1.bf16.msra.mxu1 %v8440_v45  ;;  %v8517_v45 = vpack.c.bf16 %v47_v60, %v34_v31  ;;  %v73_v31 = vld [vmem:[%s12463_s1 + $0x168] sm:$0xff] }
  0x3f   :  { %5950 = vmatprep.subr.bf16.mxu0 %v8442_v13  ;;  %6014 = vmatprep.subr.bf16.mxu1 %v8454_v11  ;;  %v8513_v11 = vpack.c.bf16 %v45_v6, %v32_v19  ;;  %12885 = vst [vmem:[#allocation70_spill] sm:$0xff] %v8519_v58  ;;  %v60_v6 = vld [vmem:[%s12463_s1 + $0x100] sm:$0xff]  ;;  %v8531_v19 = vpack.c.bf16 %v74_v54, %v61_v46  ;;  %v85_v60 = vld [vmem:[%s12463_s1 + $0x1c8] sm:$0xff] }
  0x40   :  { %12884 = vst [vmem:[#allocation69_spill] sm:$0xff] %v8517_v45  ;;  %v100_v46 = vld [vmem:[%s12463_s1 + $0x240] sm:$0xff]  ;;  %v97_v13 = vld [vmem:[%s12463_s1 + $0x228] sm:$0xff] }
  0x41   :  { %12883 = vst [vmem:[#allocation68_spill] sm:$0xff] %v8513_v11  ;;  %12886 = vst [vmem:[#allocation71_spill] sm:$0xff] %v8531_v19  ;;  %v253_v1 = vld [vmem:[%s12463_s1 + $0x708] sm:$0xff] }
  0x42   :  { %5952 = vmatpush1.bf16.msra.mxu0 %v8472_v59  ;;  %6016 = vmatpush1.bf16.msra.mxu1 %v8476_v27  ;;  %v71_v59 = vld [vmem:[%s12463_s1 + $0x158] sm:$0xff]  ;;  %v8557_v27 = vpack.c.bf16 %v98_v24, %v85_v60  ;;  %v124_v60 = vld [vmem:[%s12463_s1 + $0x300] sm:$0xff]  ;;  %v113_v24 = vld [vmem:[%s12463_s1 + $0x2a8] sm:$0xff] }
  0x43   :  { %6018 = vmatprep.subr.bf16.mxu0 %v8478_v47  ;;  %6082 = vmatprep.subr.bf16.mxu1 %v8490_v44  ;;  %v8551_v54 = vpack.c.bf16 %v71_v59, %v58_v49  ;;  %v8555_v44 = vpack.c.bf16 %v73_v31, %v60_v6  ;;  %v84_v47 = vld [vmem:[%s12463_s1 + $0x1c0] sm:$0xff]  ;;  %v86_v49 = vld [vmem:[%s12463_s1 + $0x1d0] sm:$0xff]  ;;  %v8569_v59 = vpack.c.bf16 %v100_v46, %v87_v42  ;;  %v99_v6 = vld [vmem:[%s12463_s1 + $0x238] sm:$0xff] }
  0x44   :  { %12889 = vst [vmem:[#allocation74_spill] sm:$0xff] %v8557_v27  ;;  %v111_v31 = vld [vmem:[%s12463_s1 + $0x298] sm:$0xff]  ;;  %v126_v42 = vld [vmem:[%s12463_s1 + $0x310] sm:$0xff]  ;;  %v8587_v46 = vpack.c.bf16 %v97_v13, %v84_v47  ;;  %v112_v47 = vld [vmem:[%s12463_s1 + $0x2a0] sm:$0xff] }
  0x45   :  { %578 = vmatmul.mubr.f32.vlgmr.msra.gmra.mrb[0].mxu0 %v8511_v55  ;;  %655 = vmatmul.mubr.f32.vlgmr.msra.gmra.mrb[0].mxu1 %v8511_v55  ;;  %12887 = vst [vmem:[#allocation72_spill] sm:$0xff] %v8551_v54  ;;  %12888 = vst [vmem:[#allocation73_spill] sm:$0xff] %v8555_v44  ;;  %v8605_v13 = vpack.c.bf16 %v126_v42, %v113_v24  ;;  %v152_v24 = vld [vmem:[%s12463_s1 + $0x3e0] sm:$0xff] }
  0x46   :  { %6020 = vmatpush1.bf16.msra.mxu0 %v8513_v11  ;;  %6084 = vmatpush1.bf16.msra.mxu1 %v8517_v45  ;;  %12890 = vst [vmem:[#allocation75_spill] sm:$0xff] %v8569_v59  ;;  %12891 = vst [vmem:[#allocation76_spill] sm:$0xff] %v8587_v46  ;;  %v8593_v45 = vpack.c.bf16 %v124_v60, %v111_v31  ;;  %v123_v11 = vld [vmem:[%s12463_s1 + $0x2f8] sm:$0xff]  ;;  %v150_v31 = vld [vmem:[%s12463_s1 + $0x3d0] sm:$0xff] }
  0x47   :  { %6022 = vmatprep.subr.bf16.mxu0 %v8519_v58  ;;  %6086 = vmatprep.subr.bf16.mxu1 %v8531_v19  ;;  %v8591_v19 = vpack.c.bf16 %v99_v6, %v86_v49  ;;  %v110_v58 = vld [vmem:[%s12463_s1 + $0x290] sm:$0xff]  ;;  %12894 = vst [vmem:[#allocation79_spill] sm:$0xff] %v8605_v13  ;;  %v125_v49 = vld [vmem:[%s12463_s1 + $0x308] sm:$0xff]  ;;  %v139_v60 = vld [vmem:[%s12463_s1 + $0x378] sm:$0xff] }
  0x48   :  { %12893 = vst [vmem:[#allocation78_spill] sm:$0xff] %v8593_v45  ;;  %v137_v6 = vld [vmem:[%s12463_s1 + $0x368] sm:$0xff]  ;;  %v8623_v42 = vpack.c.bf16 %v123_v11, %v110_v58  ;;  %v138_v58 = vld [vmem:[%s12463_s1 + $0x370] sm:$0xff]  ;;  %v8641_v11 = vpack.c.bf16 %v152_v24, %v139_v60 }
  0x49   :  { %12892 = vst [vmem:[#allocation77_spill] sm:$0xff] %v8591_v19  ;;  %v178_v60 = vld [vmem:[%s12463_s1 + $0x4b0] sm:$0xff] }
  0x4a   :  { %6024 = vmatpush1.bf16.msra.mxu0 %v8551_v54  ;;  %6088 = vmatpush1.bf16.msra.mxu1 %v8555_v44  ;;  %12895 = vst [vmem:[#allocation80_spill] sm:$0xff] %v8623_v42  ;;  %v8629_v44 = vpack.c.bf16 %v150_v31, %v137_v6  ;;  %v149_v54 = vld [vmem:[%s12463_s1 + $0x3c8] sm:$0xff]  ;;  %12898 = vst [vmem:[#allocation83_spill] sm:$0xff] %v8641_v11  ;;  %v176_v6 = vld [vmem:[%s12463_s1 + $0x4a0] sm:$0xff] }
  0x4b   :  { %6026 = vmatprep.subr.bf16.mxu0 %v8557_v27  ;;  %6090 = vmatprep.subr.bf16.mxu1 %v8569_v59  ;;  %v8627_v59 = vpack.c.bf16 %v125_v49, %v112_v47  ;;  %v136_v27 = vld [vmem:[%s12463_s1 + $0x360] sm:$0xff]  ;;  %v151_v47 = vld [vmem:[%s12463_s1 + $0x3d8] sm:$0xff]  ;;  %v165_v31 = vld [vmem:[%s12463_s1 + $0x448] sm:$0xff] }
  0x4c   :  { %12897 = vst [vmem:[#allocation82_spill] sm:$0xff] %v8629_v44  ;;  %v163_v49 = vld [vmem:[%s12463_s1 + $0x438] sm:$0xff]  ;;  %v8659_v24 = vpack.c.bf16 %v149_v54, %v136_v27  ;;  %v164_v27 = vld [vmem:[%s12463_s1 + $0x440] sm:$0xff]  ;;  %v177_v54 = vld [vmem:[%s12463_s1 + $0x4a8] sm:$0xff] }
  0x4d   :  { %12896 = vst [vmem:[#allocation81_spill] sm:$0xff] %v8627_v59 }
  0x4e   :  { %6028 = vmatpush1.bf16.msra.mxu0 %v8587_v46  ;;  %6092 = vmatpush1.bf16.msra.mxu1 %v8591_v19  ;;  %12899 = vst [vmem:[#allocation84_spill] sm:$0xff] %v8659_v24  ;;  %v8666_v19 = vpack.c.bf16 %v151_v47, %v138_v58  ;;  %v175_v46 = vld [vmem:[%s12463_s1 + $0x498] sm:$0xff]  ;;  %v189_v58 = vld [vmem:[%s12463_s1 + $0x508] sm:$0xff]  ;;  %v202_v47 = vld [vmem:[%s12463_s1 + $0x570] sm:$0xff] }
  0x4f   :  { %6030 = vmatprep.subr.bf16.mxu0 %v8593_v45  ;;  %6094 = vmatprep.subr.bf16.mxu1 %v8605_v13  ;;  %v162_v13 = vld [vmem:[%s12463_s1 + $0x430] sm:$0xff]  ;;  %v8668_v45 = vpack.c.bf16 %v176_v6, %v163_v49  ;;  %v191_v49 = vld [vmem:[%s12463_s1 + $0x518] sm:$0xff]  ;;  %v204_v6 = vld [vmem:[%s12463_s1 + $0x580] sm:$0xff] }
  0x50   :  { %12900 = vst [vmem:[#allocation85_spill] sm:$0xff] %v8666_v19 }
  0x51   :  { %12901 = vst [vmem:[#allocation86_spill] sm:$0xff] %v8668_v45 }
  0x52   :  { %6032 = vmatpush1.bf16.msra.mxu0 %v8623_v42  ;;  %6096 = vmatpush1.bf16.msra.mxu1 %v8627_v59  ;;  %v8680_v59 = vpack.c.bf16 %v178_v60, %v165_v31  ;;  %v8697_v31 = vld [vmem:[%s12462_s0 + $0x18] sm:$0xff]  ;;  %v8702_v60 = vld [vmem:[%s12462_s0 + $0x10] sm:$0xff]  ;;  %v8712_v42 = vpack.c.bf16 %v202_v47, %v189_v58  ;;  %v228_v58 = vld [vmem:[%s12463_s1 + $0x640] sm:$0xff] }
  0x53   :  { %6034 = vmatprep.subr.bf16.mxu0 %v8629_v44  ;;  %6098 = vmatprep.subr.bf16.mxu1 %v8641_v11  ;;  %v8705_v11 = vpack.c.bf16 %v175_v46, %v162_v13  ;;  %v8710_v44 = vpack.c.bf16 %v177_v54, %v164_v27  ;;  %v190_v46 = vld [vmem:[%s12463_s1 + $0x510] sm:$0xff]  ;;  %v8724_v13 = vpack.c.bf16 %v204_v6, %v191_v49  ;;  %v203_v27 = vld [vmem:[%s12463_s1 + $0x578] sm:$0xff]  ;;  %v217_v47 = vld [vmem:[%s12463_s1 + $0x5e8] sm:$0xff] }
  0x54   :  { %12902 = vst [vmem:[#allocation87_spill] sm:$0xff] %v8680_v59  ;;  %583 = vmatprep.mubr.f32.mxu0 %v8697_v31  ;;  %12905 = vst [vmem:[#allocation90_spill] sm:$0xff] %v8712_v42  ;;  %v215_v54 = vld [vmem:[%s12463_s1 + $0x5d8] sm:$0xff]  ;;  %v230_v49 = vld [vmem:[%s12463_s1 + $0x650] sm:$0xff]  ;;  %660 = vmatprep.mubr.f32.mxu1 %v8697_v31 }
  0x55   :  { %12903 = vst [vmem:[#allocation88_spill] sm:$0xff] %v8705_v11  ;;  %12904 = vst [vmem:[#allocation89_spill] sm:$0xff] %v8710_v44  ;;  %584 = vmatmul.mubr.f32.gmra.mrb[2].mxu0 %v8702_v60  ;;  %661 = vmatmul.mubr.f32.gmra.mrb[2].mxu1 %v8702_v60 }
  0x56   :  { %6036 = vmatpush1.bf16.msra.mxu0 %v8659_v24  ;;  %6100 = vmatpush1.bf16.msra.mxu1 %v8666_v19  ;;  %v201_v24 = vld [vmem:[%s12463_s1 + $0x568] sm:$0xff]  ;;  %12906 = vst [vmem:[#allocation91_spill] sm:$0xff] %v8724_v13  ;;  %v8752_v19 = vpack.c.bf16 %v228_v58, %v215_v54  ;;  %v254_v54 = vld [vmem:[%s12463_s1 + $0x710] sm:$0xff]  ;;  %v243_v58 = vld [vmem:[%s12463_s1 + $0x6b8] sm:$0xff] }
  0x57   :  { %6038 = vmatprep.subr.bf16.mxu0 %v8668_v45  ;;  %6102 = vmatprep.subr.bf16.mxu1 %v8680_v59  ;;  %v8745_v6 = vpack.c.bf16 %v201_v24, %v188_v41  ;;  %v8750_v59 = vpack.c.bf16 %v203_v27, %v190_v46  ;;  %v214_v45 = vld [vmem:[%s12463_s1 + $0x5d0] sm:$0xff]  ;;  %v216_v41 = vld [vmem:[%s12463_s1 + $0x5e0] sm:$0xff]  ;;  %v8764_v24 = vpack.c.bf16 %v230_v49, %v217_v47  ;;  %v229_v46 = vld [vmem:[%s12463_s1 + $0x648] sm:$0xff] }
  0x58   :  { %731 = vmatprep.mubr.f32.mxu0 %v8317_v22  ;;  %12909 = vst [vmem:[#allocation94_spill] sm:$0xff] %v8752_v19  ;;  %v241_v27 = vld [vmem:[%s12463_s1 + $0x6a8] sm:$0xff]  ;;  %808 = vmatprep.mubr.f32.mxu1 %v8317_v22  ;;  %v256_v47 = vld [vmem:[%s12463_s1 + $0x720] sm:$0xff] }
  0x59   :  { %12907 = vst [vmem:[#allocation92_spill] sm:$0xff] %v8745_v6  ;;  %12908 = vst [vmem:[#allocation93_spill] sm:$0xff] %v8750_v59 }
  0x5a   :  { %6040 = vmatpush1.bf16.msra.mxu0 %v8705_v11  ;;  %6104 = vmatpush1.bf16.msra.mxu1 %v8710_v44  ;;  %v227_v11 = vld [vmem:[%s12463_s1 + $0x638] sm:$0xff]  ;;  %12910 = vst [vmem:[#allocation95_spill] sm:$0xff] %v8764_v24  ;;  %v8789_v44 = vpack.c.bf16 %v254_v54, %v241_v27  ;;  %v280_v27 = vld [vmem:[%s12463_s1 + $0x7e0] sm:$0xff]  ;;  %v269_v54 = vld [vmem:[%s12463_s1 + $0x788] sm:$0xff] }
  0x5b   :  { %6042 = vmatprep.subr.bf16.mxu0 %v8712_v42  ;;  %6106 = vmatprep.subr.bf16.mxu1 %v8724_v13  ;;  %v8783_v49 = vpack.c.bf16 %v227_v11, %v214_v45  ;;  %v8787_v13 = vpack.c.bf16 %v229_v46, %v216_v41  ;;  %v240_v42 = vld [vmem:[%s12463_s1 + $0x6a0] sm:$0xff]  ;;  %v242_v45 = vld [vmem:[%s12463_s1 + $0x6b0] sm:$0xff]  ;;  %v8801_v11 = vpack.c.bf16 %v256_v47, %v243_v58  ;;  %v255_v41 = vld [vmem:[%s12463_s1 + $0x718] sm:$0xff] }
  0x5c   :  { %12913 = vst [vmem:[#allocation98_spill] sm:$0xff] %v8789_v44  ;;  %v267_v46 = vld [vmem:[%s12463_s1 + $0x778] sm:$0xff]  ;;  %v282_v58 = vld [vmem:[%s12463_s1 + $0x7f0] sm:$0xff]  ;;  %v8819_v47 = vpack.c.bf16 %v253_v1, %v240_v42  ;;  %v268_v1 = vld [vmem:[%s12463_s1 + $0x780] sm:$0xff] }
  0x5d   :  { %12911 = vst [vmem:[#allocation96_spill] sm:$0xff] %v8783_v49  ;;  %12912 = vst [vmem:[#allocation97_spill] sm:$0xff] %v8787_v13  ;;  %v8837_v42 = vpack.c.bf16 %v282_v58, %v269_v54  ;;  %v308_v54 = vld [vmem:[%s12463_s1 + $0x8c0] sm:$0xff] }
  0x5e   :  { %6044 = vmatpush1.bf16.msra.mxu0 %v8745_v6  ;;  %6108 = vmatpush1.bf16.msra.mxu1 %v8750_v59  ;;  %12914 = vst [vmem:[#allocation99_spill] sm:$0xff] %v8801_v11  ;;  %12915 = vst [vmem:[#allocation100_spill] sm:$0xff] %v8819_v47  ;;  %v8825_v59 = vpack.c.bf16 %v280_v27, %v267_v46  ;;  %v279_v6 = vld [vmem:[%s12463_s1 + $0x7d8] sm:$0xff]  ;;  %v306_v46 = vld [vmem:[%s12463_s1 + $0x8b0] sm:$0xff] }
  0x5f   :  { %6046 = vmatprep.subr.bf16.mxu0 %v8752_v19  ;;  %6110 = vmatprep.subr.bf16.mxu1 %v8764_v24  ;;  %v8823_v24 = vpack.c.bf16 %v255_v41, %v242_v45  ;;  %v266_v19 = vld [vmem:[%s12463_s1 + $0x770] sm:$0xff]  ;;  %12918 = vst [vmem:[#allocation103_spill] sm:$0xff] %v8837_v42  ;;  %v281_v45 = vld [vmem:[%s12463_s1 + $0x7e8] sm:$0xff]  ;;  %v295_v27 = vld [vmem:[%s12463_s1 + $0x858] sm:$0xff] }
  0x60   :  { %12917 = vst [vmem:[#allocation102_spill] sm:$0xff] %v8825_v59  ;;  %v293_v41 = vld [vmem:[%s12463_s1 + $0x848] sm:$0xff]  ;;  %v8855_v58 = vpack.c.bf16 %v279_v6, %v266_v19  ;;  %v294_v19 = vld [vmem:[%s12463_s1 + $0x850] sm:$0xff]  ;;  %v8873_v6 = vpack.c.bf16 %v308_v54, %v295_v27 }
  0x61   :  { %12916 = vst [vmem:[#allocation101_spill] sm:$0xff] %v8823_v24  ;;  %v334_v27 = vld [vmem:[%s12463_s1 + $0x990] sm:$0xff] }
  0x62   :  { %6048 = vmatpush1.bf16.msra.mxu0 %v8783_v49  ;;  %6112 = vmatpush1.bf16.msra.mxu1 %v8787_v13  ;;  %12919 = vst [vmem:[#allocation104_spill] sm:$0xff] %v8855_v58  ;;  %v8861_v13 = vpack.c.bf16 %v306_v46, %v293_v41  ;;  %v305_v49 = vld [vmem:[%s12463_s1 + $0x8a8] sm:$0xff]  ;;  %12922 = vst [vmem:[#allocation107_spill] sm:$0xff] %v8873_v6  ;;  %v332_v41 = vld [vmem:[%s12463_s1 + $0x980] sm:$0xff] }
  0x63   :  { %6050 = vmatprep.subr.bf16.mxu0 %v8789_v44  ;;  %6114 = vmatprep.subr.bf16.mxu1 %v8801_v11  ;;  %v8859_v11 = vpack.c.bf16 %v281_v45, %v268_v1  ;;  %v292_v44 = vld [vmem:[%s12463_s1 + $0x840] sm:$0xff]  ;;  %v307_v1 = vld [vmem:[%s12463_s1 + $0x8b8] sm:$0xff]  ;;  %v321_v46 = vld [vmem:[%s12463_s1 + $0x928] sm:$0xff] }
  0x64   :  { %12921 = vst [vmem:[#allocation106_spill] sm:$0xff] %v8861_v13  ;;  %v319_v45 = vld [vmem:[%s12463_s1 + $0x918] sm:$0xff]  ;;  %v8891_v54 = vpack.c.bf16 %v305_v49, %v292_v44  ;;  %v320_v44 = vld [vmem:[%s12463_s1 + $0x920] sm:$0xff]  ;;  %v8909_v49 = vpack.c.bf16 %v334_v27, %v321_v46 }
  0x65   :  { %12920 = vst [vmem:[#allocation105_spill] sm:$0xff] %v8859_v11  ;;  %v360_v46 = vld [vmem:[%s12463_s1 + $0xa60] sm:$0xff] }
  0x66   :  { %6052 = vmatpush1.bf16.msra.mxu0 %v8819_v47  ;;  %6116 = vmatpush1.bf16.msra.mxu1 %v8823_v24  ;;  %12923 = vst [vmem:[#allocation108_spill] sm:$0xff] %v8891_v54  ;;  %v8897_v24 = vpack.c.bf16 %v332_v41, %v319_v45  ;;  %v331_v47 = vld [vmem:[%s12463_s1 + $0x978] sm:$0xff]  ;;  %12926 = vst [vmem:[#allocation111_spill] sm:$0xff] %v8909_v49  ;;  %v358_v45 = vld [vmem:[%s12463_s1 + $0xa50] sm:$0xff] }
  0x67   :  { %6054 = vmatprep.subr.bf16.mxu0 %v8825_v59  ;;  %6118 = vmatprep.subr.bf16.mxu1 %v8837_v42  ;;  %v8895_v42 = vpack.c.bf16 %v307_v1, %v294_v19  ;;  %v318_v59 = vld [vmem:[%s12463_s1 + $0x910] sm:$0xff]  ;;  %v333_v19 = vld [vmem:[%s12463_s1 + $0x988] sm:$0xff]  ;;  %v347_v41 = vld [vmem:[%s12463_s1 + $0x9f8] sm:$0xff] }
  0x68   :  { %12925 = vst [vmem:[#allocation110_spill] sm:$0xff] %v8897_v24  ;;  %v345_v1 = vld [vmem:[%s12463_s1 + $0x9e8] sm:$0xff]  ;;  %v8927_v27 = vpack.c.bf16 %v331_v47, %v318_v59  ;;  %v346_v59 = vld [vmem:[%s12463_s1 + $0x9f0] sm:$0xff]  ;;  %v8945_v47 = vpack.c.bf16 %v360_v46, %v347_v41 }
  0x69   :  { %12924 = vst [vmem:[#allocation109_spill] sm:$0xff] %v8895_v42  ;;  %v386_v41 = vld [vmem:[%s12463_s1 + $0xb30] sm:$0xff] }
  0x6a   :  { %6056 = vmatpush1.bf16.msra.mxu0 %v8855_v58  ;;  %6120 = vmatpush1.bf16.msra.mxu1 %v8859_v11  ;;  %12927 = vst [vmem:[#allocation112_spill] sm:$0xff] %v8927_v27  ;;  %v8933_v11 = vpack.c.bf16 %v358_v45, %v345_v1  ;;  %v357_v58 = vld [vmem:[%s12463_s1 + $0xa48] sm:$0xff]  ;;  %12930 = vst [vmem:[#allocation115_spill] sm:$0xff] %v8945_v47  ;;  %v384_v1 = vld [vmem:[%s12463_s1 + $0xb20] sm:$0xff] }
  0x6b   :  { %6058 = vmatprep.subr.bf16.mxu0 %v8861_v13  ;;  %6122 = vmatprep.subr.bf16.mxu1 %v8873_v6  ;;  %v8931_v6 = vpack.c.bf16 %v333_v19, %v320_v44  ;;  %v344_v13 = vld [vmem:[%s12463_s1 + $0x9e0] sm:$0xff]  ;;  %v359_v44 = vld [vmem:[%s12463_s1 + $0xa58] sm:$0xff]  ;;  %v373_v45 = vld [vmem:[%s12463_s1 + $0xac8] sm:$0xff] }
  0x6c   :  { %12929 = vst [vmem:[#allocation114_spill] sm:$0xff] %v8933_v11  ;;  %v371_v19 = vld [vmem:[%s12463_s1 + $0xab8] sm:$0xff]  ;;  %v8963_v46 = vpack.c.bf16 %v357_v58, %v344_v13  ;;  %v372_v13 = vld [vmem:[%s12463_s1 + $0xac0] sm:$0xff]  ;;  %v8981_v58 = vpack.c.bf16 %v386_v41, %v373_v45 }
  0x6d   :  { %12928 = vst [vmem:[#allocation113_spill] sm:$0xff] %v8931_v6  ;;  %v412_v45 = vld [vmem:[%s12463_s1 + $0xc00] sm:$0xff] }
  0x6e   :  { %6060 = vmatpush1.bf16.msra.mxu0 %v8891_v54  ;;  %6124 = vmatpush1.bf16.msra.mxu1 %v8895_v42  ;;  %12931 = vst [vmem:[#allocation116_spill] sm:$0xff] %v8963_v46  ;;  %v8969_v42 = vpack.c.bf16 %v384_v1, %v371_v19  ;;  %v383_v54 = vld [vmem:[%s12463_s1 + $0xb18] sm:$0xff]  ;;  %12934 = vst [vmem:[#allocation119_spill] sm:$0xff] %v8981_v58  ;;  %v410_v19 = vld [vmem:[%s12463_s1 + $0xbf0] sm:$0xff] }
  0x6f   :  { %6062 = vmatprep.subr.bf16.mxu0 %v8897_v24  ;;  %6126 = vmatprep.subr.bf16.mxu1 %v8909_v49  ;;  %v8967_v49 = vpack.c.bf16 %v359_v44, %v346_v59  ;;  %v370_v24 = vld [vmem:[%s12463_s1 + $0xab0] sm:$0xff]  ;;  %v385_v59 = vld [vmem:[%s12463_s1 + $0xb28] sm:$0xff]  ;;  %v399_v1 = vld [vmem:[%s12463_s1 + $0xb98] sm:$0xff] }
  0x70   :  { %12933 = vst [vmem:[#allocation118_spill] sm:$0xff] %v8969_v42  ;;  %v397_v44 = vld [vmem:[%s12463_s1 + $0xb88] sm:$0xff]  ;;  %v8999_v41 = vpack.c.bf16 %v383_v54, %v370_v24  ;;  %v398_v24 = vld [vmem:[%s12463_s1 + $0xb90] sm:$0xff]  ;;  %v9017_v54 = vpack.c.bf16 %v412_v45, %v399_v1 }
  0x71   :  { %12932 = vst [vmem:[#allocation117_spill] sm:$0xff] %v8967_v49  ;;  %v438_v1 = vld [vmem:[%s12463_s1 + $0xcd0] sm:$0xff] }
  0x72   :  { %6064 = vmatpush1.bf16.msra.mxu0 %v8927_v27  ;;  %6128 = vmatpush1.bf16.msra.mxu1 %v8931_v6  ;;  %12935 = vst [vmem:[#allocation120_spill] sm:$0xff] %v8999_v41  ;;  %v9005_v6 = vpack.c.bf16 %v410_v19, %v397_v44  ;;  %v409_v27 = vld [vmem:[%s12463_s1 + $0xbe8] sm:$0xff]  ;;  %12938 = vst [vmem:[#allocation123_spill] sm:$0xff] %v9017_v54  ;;  %v436_v44 = vld [vmem:[%s12463_s1 + $0xcc0] sm:$0xff] }
  0x73   :  { %6066 = vmatprep.subr.bf16.mxu0 %v8933_v11  ;;  %6130 = vmatprep.subr.bf16.mxu1 %v8945_v47  ;;  %v9003_v47 = vpack.c.bf16 %v385_v59, %v372_v13  ;;  %v396_v11 = vld [vmem:[%s12463_s1 + $0xb80] sm:$0xff]  ;;  %v411_v13 = vld [vmem:[%s12463_s1 + $0xbf8] sm:$0xff]  ;;  %v425_v19 = vld [vmem:[%s12463_s1 + $0xc68] sm:$0xff] }
  0x74   :  { %12937 = vst [vmem:[#allocation122_spill] sm:$0xff] %v9005_v6  ;;  %v423_v59 = vld [vmem:[%s12463_s1 + $0xc58] sm:$0xff]  ;;  %v9035_v45 = vpack.c.bf16 %v409_v27, %v396_v11  ;;  %v424_v11 = vld [vmem:[%s12463_s1 + $0xc60] sm:$0xff]  ;;  %v9053_v27 = vpack.c.bf16 %v438_v1, %v425_v19 }
  0x75   :  { %12936 = vst [vmem:[#allocation121_spill] sm:$0xff] %v9003_v47  ;;  %v52_v19 = vld [vmem:[%s12463_s1 + $0xc0] sm:$0xff] }
  0x76   :  { %6068 = vmatpush1.bf16.msra.mxu0 %v8963_v46  ;;  %6132 = vmatpush1.bf16.msra.mxu1 %v8967_v49  ;;  %12939 = vst [vmem:[#allocation124_spill] sm:$0xff] %v9035_v45  ;;  %v9041_v49 = vpack.c.bf16 %v436_v44, %v423_v59  ;;  %v435_v46 = vld [vmem:[%s12463_s1 + $0xcb8] sm:$0xff]  ;;  %12942 = vst [vmem:[#allocation127_spill] sm:$0xff] %v9053_v27  ;;  %v50_v59 = vld [vmem:[%s12463_s1 + $0xb0] sm:$0xff] }
  0x77   :  { %6070 = vmatprep.subr.bf16.mxu0 %v8969_v42  ;;  %6134 = vmatprep.subr.bf16.mxu1 %v8981_v58  ;;  %v9039_v58 = vpack.c.bf16 %v411_v13, %v398_v24  ;;  %v422_v42 = vld [vmem:[%s12463_s1 + $0xc50] sm:$0xff]  ;;  %v437_v24 = vld [vmem:[%s12463_s1 + $0xcc8] sm:$0xff]  ;;  %v39_v44 = vld [vmem:[%s12463_s1 + $0x58] sm:$0xff] }
  0x78   :  { %12941 = vst [vmem:[#allocation126_spill] sm:$0xff] %v9041_v49  ;;  %v37_v13 = vld [vmem:[%s12463_s1 + $0x48] sm:$0xff]  ;;  %v9071_v1 = vpack.c.bf16 %v435_v46, %v422_v42  ;;  %v38_v42 = vld [vmem:[%s12463_s1 + $0x50] sm:$0xff]  ;;  %v9089_v46 = vpack.c.bf16 %v52_v19, %v39_v44 }
  0x79   :  { %12940 = vst [vmem:[#allocation125_spill] sm:$0xff] %v9039_v58  ;;  %v78_v44 = vld [vmem:[%s12463_s1 + $0x190] sm:$0xff] }
  0x7a   :  { %6072 = vmatpush1.bf16.msra.mxu0 %v8999_v41  ;;  %6136 = vmatpush1.bf16.msra.mxu1 %v9003_v47  ;;  %12943 = vst [vmem:[#allocation128_spill] sm:$0xff] %v9071_v1  ;;  %v9077_v47 = vpack.c.bf16 %v50_v59, %v37_v13  ;;  %v49_v41 = vld [vmem:[%s12463_s1 + $0xa8] sm:$0xff]  ;;  %12946 = vst [vmem:[#allocation131_spill] sm:$0xff] %v9089_v46  ;;  %v76_v13 = vld [vmem:[%s12463_s1 + $0x180] sm:$0xff] }
  0x7b   :  { %6074 = vmatprep.subr.bf16.mxu0 %v9005_v6  ;;  %6138 = vmatprep.subr.bf16.mxu1 %v9017_v54  ;;  %v9075_v54 = vpack.c.bf16 %v437_v24, %v424_v11  ;;  %v36_v6 = vld [vmem:[%s12463_s1 + $0x40] sm:$0xff]  ;;  %v51_v11 = vld [vmem:[%s12463_s1 + $0xb8] sm:$0xff]  ;;  %v65_v59 = vld [vmem:[%s12463_s1 + $0x128] sm:$0xff] }
  0x7c   :  { %12945 = vst [vmem:[#allocation130_spill] sm:$0xff] %v9077_v47  ;;  %v63_v24 = vld [vmem:[%s12463_s1 + $0x118] sm:$0xff]  ;;  %v9107_v19 = vpack.c.bf16 %v49_v41, %v36_v6  ;;  %v64_v6 = vld [vmem:[%s12463_s1 + $0x120] sm:$0xff]  ;;  %v9125_v41 = vpack.c.bf16 %v78_v44, %v65_v59 }
  0x7d   :  { %12944 = vst [vmem:[#allocation129_spill] sm:$0xff] %v9075_v54  ;;  %v104_v59 = vld [vmem:[%s12463_s1 + $0x260] sm:$0xff] }
  0x7e   :  { %6076 = vmatpush1.bf16.msra.mxu0 %v9035_v45  ;;  %6140 = vmatpush1.bf16.msra.mxu1 %v9039_v58  ;;  %12947 = vst [vmem:[#allocation132_spill] sm:$0xff] %v9107_v19  ;;  %v9113_v58 = vpack.c.bf16 %v76_v13, %v63_v24  ;;  %v75_v45 = vld [vmem:[%s12463_s1 + $0x178] sm:$0xff]  ;;  %12950 = vst [vmem:[#allocation135_spill] sm:$0xff] %v9125_v41  ;;  %v102_v24 = vld [vmem:[%s12463_s1 + $0x250] sm:$0xff] }
  0x7f   :  { %6078 = vmatprep.subr.bf16.mxu0 %v9041_v49  ;;  %6142 = vmatprep.subr.bf16.mxu1 %v9053_v27  ;;  %v9111_v27 = vpack.c.bf16 %v51_v11, %v38_v42  ;;  %v62_v49 = vld [vmem:[%s12463_s1 + $0x110] sm:$0xff]  ;;  %v77_v42 = vld [vmem:[%s12463_s1 + $0x188] sm:$0xff]  ;;  %v91_v13 = vld [vmem:[%s12463_s1 + $0x1f8] sm:$0xff] }
  0x80   :  { %12949 = vst [vmem:[#allocation134_spill] sm:$0xff] %v9113_v58  ;;  %v89_v11 = vld [vmem:[%s12463_s1 + $0x1e8] sm:$0xff]  ;;  %v9145_v44 = vpack.c.bf16 %v75_v45, %v62_v49  ;;  %v90_v49 = vld [vmem:[%s12463_s1 + $0x1f0] sm:$0xff]  ;;  %v9163_v45 = vpack.c.bf16 %v104_v59, %v91_v13 }
  0x81   :  { %12948 = vst [vmem:[#allocation133_spill] sm:$0xff] %v9111_v27  ;;  %v130_v13 = vld [vmem:[%s12463_s1 + $0x330] sm:$0xff] }
  0x82   :  { %6080 = vmatpush1.bf16.msra.mxu0 %v9071_v1  ;;  %6144 = vmatpush1.bf16.msra.mxu1 %v9075_v54  ;;  %12951 = vst [vmem:[#allocation136_spill] sm:$0xff] %v9145_v44  ;;  %v9151_v54 = vpack.c.bf16 %v102_v24, %v89_v11  ;;  %12954 = vst [vmem:[#allocation139_spill] sm:$0xff] %v9163_v45  ;;  %v128_v11 = vld [vmem:[%s12463_s1 + $0x320] sm:$0xff]  ;;  %v117_v24 = vld [vmem:[%s12463_s1 + $0x2c8] sm:$0xff] }
  0x83   :  { %6146 = vmatprep.subr.bf16.mxu0 %v9077_v47  ;;  %6210 = vmatprep.subr.bf16.mxu1 %v9089_v46  ;;  %v9149_v46 = vpack.c.bf16 %v77_v42, %v64_v6  ;;  %v88_v47 = vld [vmem:[%s12463_s1 + $0x1e0] sm:$0xff]  ;;  %v103_v6 = vld [vmem:[%s12463_s1 + $0x258] sm:$0xff] }
  0x84   :  { %12953 = vst [vmem:[#allocation138_spill] sm:$0xff] %v9151_v54  ;;  %v115_v42 = vld [vmem:[%s12463_s1 + $0x2b8] sm:$0xff] }
  0x85   :  { %732 = vmatmul.mubr.f32.vlgmr.msra.gmra.mrb[4].mxu0 %v8511_v55  ;;  %809 = vmatmul.mubr.f32.vlgmr.msra.gmra.mrb[4].mxu1 %v8511_v55  ;;  %12952 = vst [vmem:[#allocation137_spill] sm:$0xff] %v9149_v46  ;;  %v101_v55 = vld [vmem:[%s12463_s1 + $0x248] sm:$0xff] }
  0x86   :  { %6148 = vmatpush1.bf16.msra.mxu0 %v9107_v19  ;;  %6212 = vmatpush1.bf16.msra.mxu1 %v9111_v27  ;;  %v9184_v59 = vpack.c.bf16 %v101_v55, %v88_v47  ;;  %v9191_v27 = vpack.c.bf16 %v128_v11, %v115_v42  ;;  %v116_v47 = vld [vmem:[%s12463_s1 + $0x2c0] sm:$0xff]  ;;  %v9203_v55 = vpack.c.bf16 %v130_v13, %v117_v24  ;;  %v154_v42 = vld [vmem:[%s12463_s1 + $0x3f0] sm:$0xff]  ;;  %v143_v11 = vld [vmem:[%s12463_s1 + $0x398] sm:$0xff] }
  0x87   :  { %6150 = vmatprep.subr.bf16.mxu0 %v9113_v58  ;;  %6214 = vmatprep.subr.bf16.mxu1 %v9125_v41  ;;  %v9189_v41 = vpack.c.bf16 %v103_v6, %v90_v49  ;;  %v114_v58 = vld [vmem:[%s12463_s1 + $0x2b0] sm:$0xff]  ;;  %v129_v49 = vld [vmem:[%s12463_s1 + $0x328] sm:$0xff]  ;;  %v156_v24 = vld [vmem:[%s12463_s1 + $0x400] sm:$0xff] }
  0x88   :  { %737 = vmatprep.mubr.f32.mxu0 %v8697_v31  ;;  %814 = vmatprep.mubr.f32.mxu1 %v8697_v31  ;;  %12955 = vst [vmem:[#allocation140_spill] sm:$0xff] %v9184_v59  ;;  %12957 = vst [vmem:[#allocation142_spill] sm:$0xff] %v9191_v27  ;;  %v141_v6 = vld [vmem:[%s12463_s1 + $0x388] sm:$0xff] }
  0x89   :  { %738 = vmatmul.mubr.f32.gmra.mrb[6].mxu0 %v8702_v60  ;;  %815 = vmatmul.mubr.f32.gmra.mrb[6].mxu1 %v8702_v60  ;;  %12956 = vst [vmem:[#allocation141_spill] sm:$0xff] %v9189_v41  ;;  %12958 = vst [vmem:[#allocation143_spill] sm:$0xff] %v9203_v55 }
  0x8a   :  { %6152 = vmatpush1.bf16.msra.mxu0 %v9145_v44  ;;  %6216 = vmatpush1.bf16.msra.mxu1 %v9149_v46  ;;  %v127_v44 = vld [vmem:[%s12463_s1 + $0x318] sm:$0xff] }
  0x8b   :  { %6154 = vmatprep.subr.bf16.mxu0 %v9151_v54  ;;  %6218 = vmatprep.subr.bf16.mxu1 %v9163_v45  ;;  %v9223_v13 = vpack.c.bf16 %v127_v44, %v114_v58 }
  0x8c   :  { %885 = vmatprep.mubr.f32.mxu0 %v8317_v22  ;;  %962 = vmatprep.mubr.f32.mxu1 %v8317_v22 }
  0x8d   :  { %12959 = vst [vmem:[#allocation144_spill] sm:$0xff] %v9223_v13 }
  0x8e   :  { %6156 = vmatpush1.bf16.msra.mxu0 %v9184_v59 }
  0x8f   :  { %11 = vsyncpa [#allocation3], 0  ;;  %6220 = vmatpush1.bf16.msra.mxu1 %v9189_v41  ;;  %6158 = vmatprep.subr.bf16.mxu0 %v9191_v27  ;;  %v9227_v45 = vpack.c.bf16 %v129_v49, %v116_v47  ;;  %v9229_v46 = vpack.c.bf16 %v154_v42, %v141_v6  ;;  %v140_v54 = vld [vmem:[%s12463_s1 + $0x380] sm:$0xff]  ;;  %v153_v22 = vld [vmem:[%s12463_s1 + $0x3e8] sm:$0xff]  ;;  %v9241_v44 = vpack.c.bf16 %v156_v24, %v143_v11  ;;  %vm2045_vm0 = vcmask 523264   ;;  %s7848_s7 = smov [#allocation2]  }
  0x90   :  { %v142_v58 = vld [vmem:[%s12463_s1 + $0x390] sm:$0xff]  ;;  %6222 = vmatprep.subr.bf16.mxu1 %v9203_v55  ;;  %v155_v47 = vld [vmem:[%s12463_s1 + $0x3f8] sm:$0xff]  ;;  %v180_v6 = vld [vmem:[%s12463_s1 + $0x4c0] sm:$0xff]  ;;  %v9259_v24 = vpack.c.bf16 %v153_v22, %v140_v54 }
  0x91   :  { %12960 = vst [vmem:[#allocation145_spill] sm:$0xff] %v9227_v45  ;;  %12961 = vst [vmem:[#allocation146_spill] sm:$0xff] %v9229_v46  ;;  %v167_v49 = vld [vmem:[%s12463_s1 + $0x458] sm:$0xff]  ;;  %v169_v42 = vld [vmem:[%s12463_s1 + $0x468] sm:$0xff]  ;;  %v9263_v55 = vpack.c.bf16 %v155_v47, %v142_v58 }
  0x92   :  { %12962 = vst [vmem:[#allocation147_spill] sm:$0xff] %v9241_v44  ;;  %v182_v11 = vld [vmem:[%s12463_s1 + $0x4d0] sm:$0xff]  ;;  %6160 = vmatpush1.bf16.msra.mxu0 %v9223_v13  ;;  %12963 = vst [vmem:[#allocation148_spill] sm:$0xff] %v9259_v24  ;;  %v9265_v41 = vpack.c.bf16 %v180_v6, %v167_v49  ;;  %v179_v59 = vld [vmem:[%s12463_s1 + $0x4b8] sm:$0xff] }
  0x93   :  { %6224 = vmatpush1.bf16.msra.mxu1 %v9227_v45  ;;  %6162 = vmatprep.subr.bf16.mxu0 %v9229_v46  ;;  %12964 = vst [vmem:[#allocation149_spill] sm:$0xff] %v9263_v55  ;;  %v166_v27 = vld [vmem:[%s12463_s1 + $0x450] sm:$0xff]  ;;  %v168_v54 = vld [vmem:[%s12463_s1 + $0x460] sm:$0xff]  ;;  %v9277_v22 = vpack.c.bf16 %v182_v11, %v169_v42  ;;  %v181_v58 = vld [vmem:[%s12463_s1 + $0x4c8] sm:$0xff] }
  0x94   :  { %12965 = vst [vmem:[#allocation150_spill] sm:$0xff] %v9265_v41  ;;  %6226 = vmatprep.subr.bf16.mxu1 %v9241_v44  ;;  %v193_v47 = vld [vmem:[%s12463_s1 + $0x528] sm:$0xff]  ;;  %v206_v49 = vld [vmem:[%s12463_s1 + $0x590] sm:$0xff]  ;;  %v195_v6 = vld [vmem:[%s12463_s1 + $0x538] sm:$0xff]  ;;  %v9295_v11 = vpack.c.bf16 %v179_v59, %v166_v27  ;;  %v9299_v44 = vpack.c.bf16 %v181_v58, %v168_v54 }
  0x95   :  { %12966 = vst [vmem:[#allocation151_spill] sm:$0xff] %v9277_v22  ;;  %v208_v42 = vld [vmem:[%s12463_s1 + $0x5a0] sm:$0xff]  ;;  %v9301_v45 = vpack.c.bf16 %v206_v49, %v193_v47  ;;  %v205_v13 = vld [vmem:[%s12463_s1 + $0x588] sm:$0xff]  ;;  %v194_v27 = vld [vmem:[%s12463_s1 + $0x530] sm:$0xff] }
  0x96   :  { %6164 = vmatpush1.bf16.msra.mxu0 %v9259_v24  ;;  %12967 = vst [vmem:[#allocation152_spill] sm:$0xff] %v9295_v11  ;;  %12968 = vst [vmem:[#allocation153_spill] sm:$0xff] %v9299_v44  ;;  %v192_v46 = vld [vmem:[%s12463_s1 + $0x520] sm:$0xff]  ;;  %v9313_v59 = vpack.c.bf16 %v208_v42, %v195_v6  ;;  %v207_v54 = vld [vmem:[%s12463_s1 + $0x598] sm:$0xff] }
  0x97   :  { %6228 = vmatpush1.bf16.msra.mxu1 %v9263_v55  ;;  %6166 = vmatprep.subr.bf16.mxu0 %v9265_v41  ;;  %12969 = vst [vmem:[#allocation154_spill] sm:$0xff] %v9301_v45  ;;  %v219_v58 = vld [vmem:[%s12463_s1 + $0x5f8] sm:$0xff]  ;;  %v232_v47 = vld [vmem:[%s12463_s1 + $0x660] sm:$0xff]  ;;  %v221_v49 = vld [vmem:[%s12463_s1 + $0x608] sm:$0xff]  ;;  %v9331_v42 = vpack.c.bf16 %v205_v13, %v192_v46 }
  0x98   :  { %6230 = vmatprep.subr.bf16.mxu1 %v9277_v22  ;;  %12970 = vst [vmem:[#allocation155_spill] sm:$0xff] %v9313_v59  ;;  %v234_v6 = vld [vmem:[%s12463_s1 + $0x670] sm:$0xff]  ;;  %v9335_v22 = vpack.c.bf16 %v207_v54, %v194_v27  ;;  %v9337_v55 = vpack.c.bf16 %v232_v47, %v219_v58  ;;  %v231_v24 = vld [vmem:[%s12463_s1 + $0x658] sm:$0xff]  ;;  %v220_v46 = vld [vmem:[%s12463_s1 + $0x600] sm:$0xff] }
  0x99   :  { %12971 = vst [vmem:[#allocation156_spill] sm:$0xff] %v9331_v42  ;;  %v218_v41 = vld [vmem:[%s12463_s1 + $0x5f0] sm:$0xff]  ;;  %v9349_v13 = vpack.c.bf16 %v234_v6, %v221_v49  ;;  %v233_v27 = vld [vmem:[%s12463_s1 + $0x668] sm:$0xff]  ;;  %v247_v47 = vld [vmem:[%s12463_s1 + $0x6d8] sm:$0xff] }
  0x9a   :  { %6168 = vmatpush1.bf16.msra.mxu0 %v9295_v11  ;;  %12972 = vst [vmem:[#allocation157_spill] sm:$0xff] %v9335_v22  ;;  %12973 = vst [vmem:[#allocation158_spill] sm:$0xff] %v9337_v55  ;;  %v245_v54 = vld [vmem:[%s12463_s1 + $0x6c8] sm:$0xff]  ;;  %v258_v58 = vld [vmem:[%s12463_s1 + $0x730] sm:$0xff]  ;;  %v9367_v6 = vpack.c.bf16 %v231_v24, %v218_v41 }
  0x9b   :  { %6232 = vmatpush1.bf16.msra.mxu1 %v9299_v44  ;;  %6170 = vmatprep.subr.bf16.mxu0 %v9301_v45  ;;  %12974 = vst [vmem:[#allocation159_spill] sm:$0xff] %v9349_v13  ;;  %v260_v49 = vld [vmem:[%s12463_s1 + $0x740] sm:$0xff]  ;;  %v9373_v44 = vpack.c.bf16 %v258_v58, %v245_v54  ;;  %v257_v11 = vld [vmem:[%s12463_s1 + $0x728] sm:$0xff]  ;;  %v246_v41 = vld [vmem:[%s12463_s1 + $0x6d0] sm:$0xff] }
  0x9c   :  { %6234 = vmatprep.subr.bf16.mxu1 %v9313_v59  ;;  %12975 = vst [vmem:[#allocation160_spill] sm:$0xff] %v9367_v6  ;;  %v9371_v59 = vpack.c.bf16 %v233_v27, %v220_v46  ;;  %v244_v45 = vld [vmem:[%s12463_s1 + $0x6c0] sm:$0xff]  ;;  %v9385_v24 = vpack.c.bf16 %v260_v49, %v247_v47  ;;  %v259_v46 = vld [vmem:[%s12463_s1 + $0x738] sm:$0xff]  ;;  %v273_v58 = vld [vmem:[%s12463_s1 + $0x7a8] sm:$0xff] }
  0x9d   :  { %12977 = vst [vmem:[#allocation162_spill] sm:$0xff] %v9373_v44  ;;  %v271_v27 = vld [vmem:[%s12463_s1 + $0x798] sm:$0xff]  ;;  %v284_v54 = vld [vmem:[%s12463_s1 + $0x800] sm:$0xff]  ;;  %v286_v47 = vld [vmem:[%s12463_s1 + $0x810] sm:$0xff]  ;;  %v9403_v49 = vpack.c.bf16 %v257_v11, %v244_v45 }
  0x9e   :  { %6172 = vmatpush1.bf16.msra.mxu0 %v9331_v42  ;;  %12976 = vst [vmem:[#allocation161_spill] sm:$0xff] %v9371_v59  ;;  %12978 = vst [vmem:[#allocation163_spill] sm:$0xff] %v9385_v24  ;;  %v283_v42 = vld [vmem:[%s12463_s1 + $0x7f8] sm:$0xff]  ;;  %v272_v45 = vld [vmem:[%s12463_s1 + $0x7a0] sm:$0xff]  ;;  %v9421_v11 = vpack.c.bf16 %v286_v47, %v273_v58 }
  0x9f   :  { %6236 = vmatpush1.bf16.msra.mxu1 %v9335_v22  ;;  %6174 = vmatprep.subr.bf16.mxu0 %v9337_v55  ;;  %12979 = vst [vmem:[#allocation164_spill] sm:$0xff] %v9403_v49  ;;  %v9409_v22 = vpack.c.bf16 %v284_v54, %v271_v27  ;;  %v270_v55 = vld [vmem:[%s12463_s1 + $0x790] sm:$0xff]  ;;  %v299_v54 = vld [vmem:[%s12463_s1 + $0x878] sm:$0xff]  ;;  %v312_v58 = vld [vmem:[%s12463_s1 + $0x8e0] sm:$0xff] }
  0xa0   :  { %6238 = vmatprep.subr.bf16.mxu1 %v9349_v13  ;;  %v9407_v13 = vpack.c.bf16 %v259_v46, %v246_v41  ;;  %12982 = vst [vmem:[#allocation167_spill] sm:$0xff] %v9421_v11  ;;  %v285_v41 = vld [vmem:[%s12463_s1 + $0x808] sm:$0xff]  ;;  %v310_v27 = vld [vmem:[%s12463_s1 + $0x8d0] sm:$0xff]  ;;  %v9439_v47 = vpack.c.bf16 %v283_v42, %v270_v55  ;;  %v9457_v42 = vpack.c.bf16 %v312_v58, %v299_v54 }
  0xa1   :  { %12981 = vst [vmem:[#allocation166_spill] sm:$0xff] %v9409_v22  ;;  %v297_v46 = vld [vmem:[%s12463_s1 + $0x868] sm:$0xff]  ;;  %v298_v55 = vld [vmem:[%s12463_s1 + $0x870] sm:$0xff] }
  0xa2   :  { %6176 = vmatpush1.bf16.msra.mxu0 %v9367_v6  ;;  %12980 = vst [vmem:[#allocation165_spill] sm:$0xff] %v9407_v13  ;;  %12983 = vst [vmem:[#allocation168_spill] sm:$0xff] %v9439_v47  ;;  %v309_v6 = vld [vmem:[%s12463_s1 + $0x8c8] sm:$0xff]  ;;  %v338_v54 = vld [vmem:[%s12463_s1 + $0x9b0] sm:$0xff] }
  0xa3   :  { %6240 = vmatpush1.bf16.msra.mxu1 %v9371_v59  ;;  %6178 = vmatprep.subr.bf16.mxu0 %v9373_v44  ;;  %v9445_v59 = vpack.c.bf16 %v310_v27, %v297_v46  ;;  %v296_v44 = vld [vmem:[%s12463_s1 + $0x860] sm:$0xff]  ;;  %12986 = vst [vmem:[#allocation171_spill] sm:$0xff] %v9457_v42  ;;  %v325_v27 = vld [vmem:[%s12463_s1 + $0x948] sm:$0xff] }
  0xa4   :  { %6242 = vmatprep.subr.bf16.mxu1 %v9385_v24  ;;  %v9443_v24 = vpack.c.bf16 %v285_v41, %v272_v45  ;;  %v311_v45 = vld [vmem:[%s12463_s1 + $0x8d8] sm:$0xff]  ;;  %v336_v46 = vld [vmem:[%s12463_s1 + $0x9a0] sm:$0xff]  ;;  %v9475_v58 = vpack.c.bf16 %v309_v6, %v296_v44  ;;  %v9493_v6 = vpack.c.bf16 %v338_v54, %v325_v27 }
  0xa5   :  { %12985 = vst [vmem:[#allocation170_spill] sm:$0xff] %v9445_v59  ;;  %v323_v41 = vld [vmem:[%s12463_s1 + $0x938] sm:$0xff]  ;;  %v324_v44 = vld [vmem:[%s12463_s1 + $0x940] sm:$0xff] }
  0xa6   :  { %6180 = vmatpush1.bf16.msra.mxu0 %v9403_v49  ;;  %12984 = vst [vmem:[#allocation169_spill] sm:$0xff] %v9443_v24  ;;  %12987 = vst [vmem:[#allocation172_spill] sm:$0xff] %v9475_v58  ;;  %v335_v49 = vld [vmem:[%s12463_s1 + $0x998] sm:$0xff]  ;;  %v364_v27 = vld [vmem:[%s12463_s1 + $0xa80] sm:$0xff] }
  0xa7   :  { %6244 = vmatpush1.bf16.msra.mxu1 %v9407_v13  ;;  %6182 = vmatprep.subr.bf16.mxu0 %v9409_v22  ;;  %v9481_v13 = vpack.c.bf16 %v336_v46, %v323_v41  ;;  %v322_v22 = vld [vmem:[%s12463_s1 + $0x930] sm:$0xff]  ;;  %12990 = vst [vmem:[#allocation175_spill] sm:$0xff] %v9493_v6  ;;  %v351_v46 = vld [vmem:[%s12463_s1 + $0xa18] sm:$0xff] }
  0xa8   :  { %6246 = vmatprep.subr.bf16.mxu1 %v9421_v11  ;;  %v9479_v11 = vpack.c.bf16 %v311_v45, %v298_v55  ;;  %v337_v55 = vld [vmem:[%s12463_s1 + $0x9a8] sm:$0xff]  ;;  %v362_v41 = vld [vmem:[%s12463_s1 + $0xa70] sm:$0xff]  ;;  %v9511_v54 = vpack.c.bf16 %v335_v49, %v322_v22  ;;  %v9529_v49 = vpack.c.bf16 %v364_v27, %v351_v46 }
  0xa9   :  { %12989 = vst [vmem:[#allocation174_spill] sm:$0xff] %v9481_v13  ;;  %v349_v45 = vld [vmem:[%s12463_s1 + $0xa08] sm:$0xff]  ;;  %v350_v22 = vld [vmem:[%s12463_s1 + $0xa10] sm:$0xff] }
  0xaa   :  { %6184 = vmatpush1.bf16.msra.mxu0 %v9439_v47  ;;  %12988 = vst [vmem:[#allocation173_spill] sm:$0xff] %v9479_v11  ;;  %12991 = vst [vmem:[#allocation176_spill] sm:$0xff] %v9511_v54  ;;  %v361_v47 = vld [vmem:[%s12463_s1 + $0xa68] sm:$0xff]  ;;  %v390_v46 = vld [vmem:[%s12463_s1 + $0xb50] sm:$0xff] }
  0xab   :  { %6248 = vmatpush1.bf16.msra.mxu1 %v9443_v24  ;;  %6186 = vmatprep.subr.bf16.mxu0 %v9445_v59  ;;  %v9517_v24 = vpack.c.bf16 %v362_v41, %v349_v45  ;;  %v348_v59 = vld [vmem:[%s12463_s1 + $0xa00] sm:$0xff]  ;;  %12994 = vst [vmem:[#allocation179_spill] sm:$0xff] %v9529_v49  ;;  %v377_v41 = vld [vmem:[%s12463_s1 + $0xae8] sm:$0xff] }
  0xac   :  { %6250 = vmatprep.subr.bf16.mxu1 %v9457_v42  ;;  %v9515_v42 = vpack.c.bf16 %v337_v55, %v324_v44  ;;  %v363_v44 = vld [vmem:[%s12463_s1 + $0xa78] sm:$0xff]  ;;  %v388_v45 = vld [vmem:[%s12463_s1 + $0xb40] sm:$0xff]  ;;  %v9547_v27 = vpack.c.bf16 %v361_v47, %v348_v59  ;;  %v9565_v47 = vpack.c.bf16 %v390_v46, %v377_v41 }
  0xad   :  { %12993 = vst [vmem:[#allocation178_spill] sm:$0xff] %v9517_v24  ;;  %v375_v55 = vld [vmem:[%s12463_s1 + $0xad8] sm:$0xff]  ;;  %v376_v59 = vld [vmem:[%s12463_s1 + $0xae0] sm:$0xff] }
  0xae   :  { %6188 = vmatpush1.bf16.msra.mxu0 %v9475_v58  ;;  %12992 = vst [vmem:[#allocation177_spill] sm:$0xff] %v9515_v42  ;;  %12995 = vst [vmem:[#allocation180_spill] sm:$0xff] %v9547_v27  ;;  %v387_v58 = vld [vmem:[%s12463_s1 + $0xb38] sm:$0xff]  ;;  %v416_v41 = vld [vmem:[%s12463_s1 + $0xc20] sm:$0xff] }
  0xaf   :  { %6252 = vmatpush1.bf16.msra.mxu1 %v9479_v11  ;;  %6190 = vmatprep.subr.bf16.mxu0 %v9481_v13  ;;  %v9553_v11 = vpack.c.bf16 %v388_v45, %v375_v55  ;;  %v374_v13 = vld [vmem:[%s12463_s1 + $0xad0] sm:$0xff]  ;;  %12998 = vst [vmem:[#allocation183_spill] sm:$0xff] %v9565_v47  ;;  %v403_v45 = vld [vmem:[%s12463_s1 + $0xbb8] sm:$0xff] }
  0xb0   :  { %6254 = vmatprep.subr.bf16.mxu1 %v9493_v6  ;;  %v9551_v6 = vpack.c.bf16 %v363_v44, %v350_v22  ;;  %v389_v22 = vld [vmem:[%s12463_s1 + $0xb48] sm:$0xff]  ;;  %v414_v55 = vld [vmem:[%s12463_s1 + $0xc10] sm:$0xff]  ;;  %v9583_v46 = vpack.c.bf16 %v387_v58, %v374_v13  ;;  %v9601_v58 = vpack.c.bf16 %v416_v41, %v403_v45 }
  0xb1   :  { %12997 = vst [vmem:[#allocation182_spill] sm:$0xff] %v9553_v11  ;;  %v401_v44 = vld [vmem:[%s12463_s1 + $0xba8] sm:$0xff]  ;;  %v402_v13 = vld [vmem:[%s12463_s1 + $0xbb0] sm:$0xff] }
  0xb2   :  { %6192 = vmatpush1.bf16.msra.mxu0 %v9511_v54  ;;  %12996 = vst [vmem:[#allocation181_spill] sm:$0xff] %v9551_v6  ;;  %12999 = vst [vmem:[#allocation184_spill] sm:$0xff] %v9583_v46  ;;  %v413_v54 = vld [vmem:[%s12463_s1 + $0xc08] sm:$0xff]  ;;  %v442_v45 = vld [vmem:[%s12463_s1 + $0xcf0] sm:$0xff] }
  0xb3   :  { %6256 = vmatpush1.bf16.msra.mxu1 %v9515_v42  ;;  %6194 = vmatprep.subr.bf16.mxu0 %v9517_v24  ;;  %v9589_v42 = vpack.c.bf16 %v414_v55, %v401_v44  ;;  %v400_v24 = vld [vmem:[%s12463_s1 + $0xba0] sm:$0xff]  ;;  %13002 = vst [vmem:[#allocation187_spill] sm:$0xff] %v9601_v58  ;;  %v429_v55 = vld [vmem:[%s12463_s1 + $0xc88] sm:$0xff] }
  0xb4   :  { %6258 = vmatprep.subr.bf16.mxu1 %v9529_v49  ;;  %v9587_v49 = vpack.c.bf16 %v389_v22, %v376_v59  ;;  %v415_v59 = vld [vmem:[%s12463_s1 + $0xc18] sm:$0xff]  ;;  %v440_v44 = vld [vmem:[%s12463_s1 + $0xce0] sm:$0xff]  ;;  %v9619_v41 = vpack.c.bf16 %v413_v54, %v400_v24  ;;  %v9637_v54 = vpack.c.bf16 %v442_v45, %v429_v55 }
  0xb5   :  { %13001 = vst [vmem:[#allocation186_spill] sm:$0xff] %v9589_v42  ;;  %v427_v22 = vld [vmem:[%s12463_s1 + $0xc78] sm:$0xff]  ;;  %v428_v24 = vld [vmem:[%s12463_s1 + $0xc80] sm:$0xff] }
  0xb6   :  { %6196 = vmatpush1.bf16.msra.mxu0 %v9547_v27  ;;  %13000 = vst [vmem:[#allocation185_spill] sm:$0xff] %v9587_v49  ;;  %13003 = vst [vmem:[#allocation188_spill] sm:$0xff] %v9619_v41  ;;  %v439_v27 = vld [vmem:[%s12463_s1 + $0xcd8] sm:$0xff] }
  0xb7   :  { %6260 = vmatpush1.bf16.msra.mxu1 %v9551_v6  ;;  %6198 = vmatprep.subr.bf16.mxu0 %v9553_v11  ;;  %v9625_v6 = vpack.c.bf16 %v440_v44, %v427_v22  ;;  %v426_v11 = vld [vmem:[%s12463_s1 + $0xc70] sm:$0xff]  ;;  %13006 = vst [vmem:[#allocation191_spill] sm:$0xff] %v9637_v54  ;;  %v261_v22 = vld [vmem:[%s12463_s1 + $0x748] sm:$0xff] }
  0xb8   :  { %6262 = vmatprep.subr.bf16.mxu1 %v9565_v47  ;;  %v9623_v47 = vpack.c.bf16 %v415_v59, %v402_v13  ;;  %v441_v13 = vld [vmem:[%s12463_s1 + $0xce8] sm:$0xff]  ;;  %v248_v59 = vld [vmem:[%s12463_s1 + $0x6e0] sm:$0xff]  ;;  %v9649_v44 = vpack.c.bf16 %v439_v27, %v426_v11  ;;  %v274_v11 = vld [vmem:[%s12463_s1 + $0x7b0] sm:$0xff] }
  0xb9   :  { %13005 = vst [vmem:[#allocation190_spill] sm:$0xff] %v9625_v6  ;;  %v9653_v55 = vpack.c.bf16 %v441_v13, %v428_v24  ;;  %v9655_v45 = vpack.c.bf16 %v261_v22, %v248_v59  ;;  %v287_v27 = vld [vmem:[%s12463_s1 + $0x818] sm:$0xff]  ;;  %v66_v59 = vld [vmem:[%s12463_s1 + $0x130] sm:$0xff] }
  0xba   :  { %6200 = vmatpush1.bf16.msra.mxu0 %v9583_v46  ;;  %13004 = vst [vmem:[#allocation189_spill] sm:$0xff] %v9623_v47  ;;  %13007 = vst [vmem:[#allocation192_spill] sm:$0xff] %v9649_v44  ;;  %v9675_v13 = vpack.c.bf16 %v287_v27, %v274_v11  ;;  %v79_v22 = vld [vmem:[%s12463_s1 + $0x198] sm:$0xff]  ;;  %v9693_v11 = vld [vmem:[%s12462_s0] sm:$0xff] }
  0xbb   :  { %6264 = vmatpush1.bf16.msra.mxu1 %v9587_v49  ;;  %6202 = vmatprep.subr.bf16.mxu0 %v9589_v42  ;;  %13008 = vst [vmem:[#allocation193_spill] sm:$0xff] %v9653_v55  ;;  %13009 = vst [vmem:[#allocation194_spill] sm:$0xff] %v9655_v45  ;;  %v53_v49 = vld [vmem:[%s12463_s1 + $0xc8] sm:$0xff]  ;;  %v9698_v27 = vpack.c.bf16 %v79_v22, %v66_v59  ;;  %v326_v59 = vld [vmem:[%s12463_s1 + $0x950] sm:$0xff] }
  0xbc   :  { %6266 = vmatprep.subr.bf16.mxu1 %v9601_v58  ;;  %v40_v58 = vld [vmem:[%s12463_s1 + $0x60] sm:$0xff]  ;;  %13011 = vst [vmem:[#allocation196_spill] sm:$0xff] %v9675_v13  ;;  %v339_v22 = vld [vmem:[%s12463_s1 + $0x9b8] sm:$0xff] }
  0xbd   :  { %v9671_v24 = vpack.c.bf16 %v53_v49, %v40_v58  ;;  %v300_v49 = vld [vmem:[%s12463_s1 + $0x880] sm:$0xff]  ;;  %v313_v58 = vld [vmem:[%s12463_s1 + $0x8e8] sm:$0xff]  ;;  %13012 = vst [vmem:[#allocation197_spill] sm:$0xff] %v9698_v27 }
  0xbe   :  { %6204 = vmatpush1.bf16.msra.mxu0 %v9619_v41 }
  0xbf   :  { %6268 = vmatpush1.bf16.msra.mxu1 %v9623_v47  ;;  %6206 = vmatprep.subr.bf16.mxu0 %v9625_v6  ;;  %13010 = vst [vmem:[#allocation195_spill] sm:$0xff] %v9671_v24 }
  0xc0   :  { %6270 = vmatprep.subr.bf16.mxu1 %v9637_v54  ;;  %v105_v54 = vld [vmem:[%s12463_s1 + $0x268] sm:$0xff] }
  0xc2   :  { %6208 = vmatpush1.bf16.msra.mxu0 %v9649_v44 }
  0xc3   :  { %6272 = vmatpush1.bf16.msra.mxu1 %v9653_v55  ;;  %6274 = vmatprep.subr.bf16.mxu0 %v9655_v45  ;;  %v92_v55 = vld [vmem:[%s12463_s1 + $0x200] sm:$0xff] }
  0xc4   :  { %6306 = vmatprep.subr.bf16.mxu1 %v7895_v3  ;;  %v9702_v3 = vpack.c.bf16 %v313_v58, %v300_v49  ;;  %v9721_v49 = vpack.c.bf16 %v105_v54, %v92_v55  ;;  %v7821_v58 = vld [vmem:[%s12462_s0 + $0x8] sm:$0xff]  ;;  %v131_v54 = vld [vmem:[%s12463_s1 + $0x338] sm:$0xff]  ;;  %v352_v55 = vld [vmem:[%s12463_s1 + $0xa20] sm:$0xff] }
  0xc5   :  { %886 = vmatmul.mubr.f32.vlgmr.msra.gmra.mrb[8].mxu0 %v9693_v11 }
  0xc6   :  { %963 = vmatmul.mubr.f32.vlgmr.msra.gmra.mrb[8].mxu1 %v9693_v11  ;;  %6276 = vmatpush3.bf16.msra.mxu0 %v9671_v24  ;;  %13013 = vst [vmem:[#allocation198_spill] sm:$0xff] %v9702_v3  ;;  %13014 = vst [vmem:[#allocation199_spill] sm:$0xff] %v9721_v49 }
  0xc7   :  { %6308 = vmatpush1.bf16.msra.mxu1 %v7908_v8  ;;  %6278 = vmatprep.subr.bf16.mxu0 %v9675_v13  ;;  %v9733_v8 = vpack.c.bf16 %v339_v22, %v326_v59 }
  0xc8   :  { %6310 = vmatprep.subr.bf16.mxu1 %v7933_v16  ;;  %891 = vmatprep.mubr.f32.mxu0 %v8697_v31  ;;  %v9729_v16 = vld [vmem:[%s12462_s0 + $0x28] sm:$0xff] }
  0xc9   :  { %892 = vmatmul.mubr.f32.gmra.mrb[10].mxu0 %v8702_v60  ;;  %968 = vmatprep.mubr.f32.mxu1 %v8697_v31  ;;  %13015 = vst [vmem:[#allocation200_spill] sm:$0xff] %v9733_v8  ;;  %v118_v31 = vld [vmem:[%s12463_s1 + $0x2d0] sm:$0xff] }
  0xca   :  { %6280 = vmatpush3.bf16.msra.mxu0 %v9698_v27  ;;  %1039 = vmatprep.mubr.f32.mxu0 %v7821_v58  ;;  %v365_v58 = vld [vmem:[%s12463_s1 + $0xa88] sm:$0xff]  ;;  %v9751_v59 = vpack.c.bf16 %v131_v54, %v118_v31  ;;  %v378_v31 = vld [vmem:[%s12463_s1 + $0xaf0] sm:$0xff]  ;;  %v391_v54 = vld [vmem:[%s12463_s1 + $0xb58] sm:$0xff] }
  0xcb   :  { %6312 = vmatpush1.bf16.msra.mxu1 %v7947_v21  ;;  %6282 = vmatprep.subr.bf16.mxu0 %v9702_v3  ;;  %v9755_v22 = vpack.c.bf16 %v365_v58, %v352_v55  ;;  %v9775_v58 = vpack.c.bf16 %v391_v54, %v378_v31 }
  0xcc   :  { %6314 = vmatprep.subr.bf16.mxu1 %v7962_v26  ;;  %969 = vmatmul.mubr.f32.gmra.mrb[10].mxu1 %v8702_v60  ;;  %13016 = vst [vmem:[#allocation201_spill] sm:$0xff] %v9751_v59  ;;  %v144_v26 = vld [vmem:[%s12463_s1 + $0x3a0] sm:$0xff]  ;;  %v157_v60 = vld [vmem:[%s12463_s1 + $0x408] sm:$0xff] }
  0xcd   :  { %1345 = vmatprep.mubr.f32.mxu1 %v9729_v16  ;;  %13017 = vst [vmem:[#allocation202_spill] sm:$0xff] %v9755_v22  ;;  %v9771_v55 = vpack.c.bf16 %v157_v60, %v144_v26  ;;  %13019 = vst [vmem:[#allocation204_spill] sm:$0xff] %v9775_v58  ;;  %v404_v26 = vld [vmem:[%s12463_s1 + $0xbc0] sm:$0xff]  ;;  %v417_v60 = vld [vmem:[%s12463_s1 + $0xc28] sm:$0xff] }
  0xce   :  { %6284 = vmatpush3.bf16.msra.mxu0 %v9721_v49  ;;  %v9795_v54 = vpack.c.bf16 %v417_v60, %v404_v26 }
  0xcf   :  { %6316 = vmatpush1.bf16.msra.mxu1 %v7985_v34  ;;  %6286 = vmatprep.subr.bf16.mxu0 %v9733_v8  ;;  %13018 = vst [vmem:[#allocation203_spill] sm:$0xff] %v9771_v55  ;;  %v183_v34 = vld [vmem:[%s12463_s1 + $0x4d8] sm:$0xff] }
  0xd0   :  { %6318 = vmatprep.subr.bf16.mxu1 %v8000_v39  ;;  %v170_v39 = vld [vmem:[%s12463_s1 + $0x470] sm:$0xff]  ;;  %13021 = vst [vmem:[#allocation206_spill] sm:$0xff] %v9795_v54 }
  0xd1   :  { %v9791_v31 = vpack.c.bf16 %v183_v34, %v170_v39  ;;  %v430_v34 = vld [vmem:[%s12463_s1 + $0xc90] sm:$0xff]  ;;  %v443_v39 = vld [vmem:[%s12463_s1 + $0xcf8] sm:$0xff] }
  0xd2   :  { %6288 = vmatpush3.bf16.msra.mxu0 %v9751_v59  ;;  %v9815_v60 = vpack.c.bf16 %v443_v39, %v430_v34  ;;  %v13027_v34 = vld [vmem:[#allocation62_spill] sm:$0xff]  ;;  %v13028_v39 = vld [vmem:[#allocation33_spill] sm:$0xff] }
  0xd3   :  { %6320 = vmatpush1.bf16.msra.mxu1 %v8033_v50  ;;  %6290 = vmatprep.subr.bf16.mxu0 %v9755_v22  ;;  %13020 = vst [vmem:[#allocation205_spill] sm:$0xff] %v9791_v31  ;;  %v209_v50 = vld [vmem:[%s12463_s1 + $0x5a8] sm:$0xff] }
  0xd4   :  { %6322 = vmatprep.subr.bf16.mxu1 %v8039_v52  ;;  %v196_v52 = vld [vmem:[%s12463_s1 + $0x540] sm:$0xff]  ;;  %13023 = vst [vmem:[#allocation208_spill] sm:$0xff] %v9815_v60 }
  0xd5   :  { %v9811_v26 = vpack.c.bf16 %v209_v50, %v196_v52  ;;  %v7822_v52 = vld [vmem:[%s12462_s0 + $0x18] sm:$0xff] }
  0xd6   :  { %6292 = vmatpush3.bf16.msra.mxu0 %v9771_v55 }
  0xd7   :  { %6324 = vmatpush1.bf16.msra.mxu1 %v8069_v62  ;;  %6294 = vmatprep.subr.bf16.mxu0 %v9775_v58  ;;  %13022 = vst [vmem:[#allocation207_spill] sm:$0xff] %v9811_v26  ;;  %v235_v62 = vld [vmem:[%s12463_s1 + $0x678] sm:$0xff] }
  0xd8   :  { %6326 = vmatprep.subr.bf16.mxu1 %v8075_v0  ;;  %v222_v0 = vld [vmem:[%s12463_s1 + $0x610] sm:$0xff] }
  0xd9   :  { %v9825_v50 = vpack.c.bf16 %v235_v62, %v222_v0  ;;  %v7823_v62 = vld [vmem:[%s12462_s0 + $0x10] sm:$0xff]  ;;  %v13025_v0 = vld [vmem:[#allocation60_spill] sm:$0xff] }
  0xda   :  { %6296 = vmatpush3.bf16.msra.mxu0 %v9791_v31 }
  0xdb   :  { %6328 = vmatpush1.bf16.msra.mxu1 %v8105_v14  ;;  %6298 = vmatprep.subr.bf16.mxu0 %v9795_v54  ;;  %13024 = vst [vmem:[#allocation209_spill] sm:$0xff] %v9825_v50 }
  0xdc   :  { %6330 = vmatprep.subr.bf16.mxu1 %v8111_v18  ;;  %v1078_v18 = vld [vmem:[%s12465_s3 + $0x10] sm:$0xff] }
  0xde   :  { %6300 = vmatpush3.bf16.msra.mxu0 %v9811_v26 }
  0xdf   :  { %6332 = vmatpush1.bf16.msra.mxu1 %v8141_v32  ;;  %6302 = vmatprep.subr.bf16.mxu0 %v9815_v60 }
  0xe0   :  { %6334 = vmatprep.subr.bf16.mxu1 %v8147_v35 }
  0xe2   :  { %6304 = vmatpush3.bf16.msra.mxu0 %v9825_v50 }
  0xe3   :  { %6336 = vmatpush1.bf16.msra.mxu1 %v8177_v48  ;;  %6370 = vmatprep.subr.bf16.mxu0 %v7906_v7  ;;  %v4703_v48 = vld [vmem:[%s12465_s3 + $0xb58] sm:$0xff] }
  0xe4   :  { %6338 = vmatprep.subr.bf16.mxu1 %v8183_v53  ;;  %v13141_v53 = vld [vmem:[#allocation178_spill] sm:$0xff] }
  0xe5   :  { %1040 = vmatmul.mubr.f32.vlgmr.msra.gmra.mrb[12].mxu0 %v9693_v11  ;;  %v13026_v11 = vld [vmem:[#allocation31_spill] sm:$0xff] }
  0xe6   :  { %6372 = vmatpush1.bf16.msra.mxu0 %v7920_v12  ;;  %1044 = vmatprep.mubr.f32.mxu0 %v7822_v52  ;;  %v13029_v52 = vld [vmem:[#allocation64_spill] sm:$0xff] }
  0xe7   :  { %6340 = vmatpush1.bf16.msra.mxu1 %v8213_v4  ;;  %6374 = vmatprep.subr.bf16.mxu0 %v7935_v17  ;;  %v13125_v4 = vld [vmem:[#allocation162_spill] sm:$0xff] }
  0xe8   :  { %6342 = vmatprep.subr.bf16.mxu1 %v8219_v9  ;;  %v13121_v9 = vld [vmem:[#allocation158_spill] sm:$0xff] }
  0xe9   :  { %1045 = vmatmul.mubr.f32.gmra.mrb[14].mxu0 %v7823_v62  ;;  %v13030_v62 = vld [vmem:[#allocation35_spill] sm:$0xff] }
  0xea   :  { %6376 = vmatpush1.bf16.msra.mxu0 %v7960_v25  ;;  %1422 = vmatprep.mubr.f32.mxu0 %v9729_v16 }
  0xeb   :  { %6344 = vmatpush1.bf16.msra.mxu1 %v8249_v29  ;;  %6378 = vmatprep.subr.bf16.mxu0 %v7973_v30  ;;  %v13081_v29 = vld [vmem:[#allocation116_spill] sm:$0xff] }
  0xec   :  { %6346 = vmatprep.subr.bf16.mxu1 %v8255_v36  ;;  %v13080_v36 = vld [vmem:[#allocation85_spill] sm:$0xff] }
  0xee   :  { %6380 = vmatpush1.bf16.msra.mxu0 %v7998_v38  ;;  %v13139_v38 = vld [vmem:[#allocation176_spill] sm:$0xff] }
  0xef   :  { %6348 = vmatpush1.bf16.msra.mxu1 %v8285_v57  ;;  %6382 = vmatprep.subr.bf16.mxu0 %v8012_v43  ;;  %v13061_v57 = vld [vmem:[#allocation96_spill] sm:$0xff]  ;;  %v13126_v43 = vld [vmem:[#allocation133_spill] sm:$0xff] }
  0xf0   :  { %6350 = vmatprep.subr.bf16.mxu1 %v8294_v61  ;;  %v13060_v61 = vld [vmem:[#allocation65_spill] sm:$0xff] }
  0xf2   :  { %6384 = vmatpush1.bf16.msra.mxu0 %v8037_v51  ;;  %v13119_v51 = vld [vmem:[#allocation156_spill] sm:$0xff] }
  0xf3   :  { %6352 = vmatpush1.bf16.msra.mxu1 %v8328_v28  ;;  %6386 = vmatprep.subr.bf16.mxu0 %v8051_v56  ;;  %v13046_v28 = vld [vmem:[#allocation51_spill] sm:$0xff]  ;;  %v13083_v56 = vld [vmem:[#allocation118_spill] sm:$0xff] }
  0xf4   :  { %6354 = vmatprep.subr.bf16.mxu1 %v8334_v40  ;;  %v13044_v40 = vld [vmem:[#allocation49_spill] sm:$0xff] }
  0xf6   :  { %6388 = vmatpush1.bf16.msra.mxu0 %v8073_v63  ;;  %v13078_v63 = vld [vmem:[#allocation83_spill] sm:$0xff] }
  0xf7   :  { %6356 = vmatpush1.bf16.msra.mxu1 %v8364_v10  ;;  %6390 = vmatprep.subr.bf16.mxu0 %v8087_v5  ;;  %v13037_v10 = vld [vmem:[#allocation72_spill] sm:$0xff]  ;;  %v13063_v5 = vld [vmem:[#allocation98_spill] sm:$0xff] }
  0xf8   :  { %6358 = vmatprep.subr.bf16.mxu1 %v8370_v20  ;;  %v13035_v20 = vld [vmem:[#allocation70_spill] sm:$0xff] }
  0xfa   :  { %6392 = vmatpush1.bf16.msra.mxu0 %v8109_v15  ;;  %v13058_v15 = vld [vmem:[#allocation63_spill] sm:$0xff] }
  0xfb   :  { %6360 = vmatpush1.bf16.msra.mxu1 %v8400_v2  ;;  %6394 = vmatprep.subr.bf16.mxu0 %v8123_v23  ;;  %v9876_v2 = vld [vmem:[%s12462_s0 + $0x20] sm:$0xff] }
  0xfc   :  { %6362 = vmatprep.subr.bf16.mxu1 %v8406_v37  ;;  %v13031_v37 = vld [vmem:[#allocation66_spill] sm:$0xff]  ;;  %v13050_v23 = vld [vmem:[#allocation55_spill] sm:$0xff] }
  0xfe   :  { %6396 = vmatpush1.bf16.msra.mxu0 %v8145_v33  ;;  %v13042_v33 = vld [vmem:[#allocation47_spill] sm:$0xff] }
  0xff   :  { %6364 = vmatpush1.bf16.msra.mxu1 %v13025_v0  ;;  %6398 = vmatprep.subr.bf16.mxu0 %v13026_v11  ;;  %v9882_v0 = vld [vmem:[%s12462_s0 + $0x38] sm:$0xff]  ;;  %v13041_v11 = vld [vmem:[#allocation76_spill] sm:$0xff] }
 0x100   :  { %6366 = vmatprep.subr.bf16.mxu1 %v13027_v34  ;;  %v13032_v34 = vld [vmem:[#allocation37_spill] sm:$0xff] }
 0x102   :  { %6400 = vmatpush1.bf16.msra.mxu0 %v13028_v39  ;;  %v13033_v39 = vld [vmem:[#allocation68_spill] sm:$0xff] }
 0x103   :  { %6368 = vmatpush1.bf16.msra.mxu1 %v13029_v52  ;;  %6402 = vmatprep.subr.bf16.mxu0 %v13030_v62  ;;  %v13034_v52 = vld [vmem:[#allocation39_spill] sm:$0xff]  ;;  %v9891_v62 = vld [vmem:[%s12462_s0 + $0x30] sm:$0xff] }
 0x104   :  { %6434 = vmatprep.subr.bf16.mxu1 %v13031_v37  ;;  %v13036_v37 = vld [vmem:[#allocation41_spill] sm:$0xff] }
 0x106   :  { %1346 = vmatmul.mubr.f32.vlgmr.msra.gmra.mrb[12].mxu1 %v9876_v2  ;;  %6404 = vmatpush1.bf16.msra.mxu0 %v13032_v34  ;;  %v13038_v34 = vld [vmem:[#allocation43_spill] sm:$0xff] }
 0x107   :  { %6436 = vmatpush1.bf16.msra.mxu1 %v13033_v39  ;;  %6406 = vmatprep.subr.bf16.mxu0 %v13034_v52  ;;  %v13039_v39 = vld [vmem:[#allocation74_spill] sm:$0xff]  ;;  %v13040_v52 = vld [vmem:[#allocation45_spill] sm:$0xff] }
 0x108   :  { %6438 = vmatprep.subr.bf16.mxu1 %v13035_v20  ;;  %1351 = vmatprep.mubr.f32.mxu1 %v9882_v0  ;;  %v13043_v20 = vld [vmem:[#allocation78_spill] sm:$0xff] }
 0x10a   :  { %6408 = vmatpush1.bf16.msra.mxu0 %v13036_v37  ;;  %1352 = vmatmul.mubr.f32.gmra.mrb[14].mxu1 %v9891_v62  ;;  %v13045_v37 = vld [vmem:[#allocation80_spill] sm:$0xff] }
 0x10b   :  { %6440 = vmatpush1.bf16.msra.mxu1 %v13037_v10  ;;  %6410 = vmatprep.subr.bf16.mxu0 %v13038_v34  ;;  %v13047_v10 = vld [vmem:[#allocation82_spill] sm:$0xff]  ;;  %v13048_v34 = vld [vmem:[#allocation53_spill] sm:$0xff] }
 0x10c   :  { %6442 = vmatprep.subr.bf16.mxu1 %v13039_v39  ;;  %1499 = vmatprep.mubr.f32.mxu1 %v9729_v16  ;;  %v13049_v39 = vld [vmem:[#allocation84_spill] sm:$0xff] }
 0x10e   :  { %6412 = vmatpush1.bf16.msra.mxu0 %v13040_v52 }
 0x10f   :  { %6444 = vmatpush1.bf16.msra.mxu1 %v13041_v11  ;;  %6414 = vmatprep.subr.bf16.mxu0 %v13042_v33  ;;  %v13051_v11 = vld [vmem:[#allocation86_spill] sm:$0xff] }
 0x110   :  { %6446 = vmatprep.subr.bf16.mxu1 %v13043_v20 }
 0x112   :  { %6416 = vmatpush1.bf16.msra.mxu0 %v13044_v40  ;;  %v13052_v40 = vld [vmem:[#allocation57_spill] sm:$0xff] }
 0x113   :  { %6448 = vmatpush1.bf16.msra.mxu1 %v13045_v37  ;;  %6418 = vmatprep.subr.bf16.mxu0 %v13046_v28  ;;  %v13053_v28 = vld [vmem:[#allocation88_spill] sm:$0xff] }
 0x114   :  { %6450 = vmatprep.subr.bf16.mxu1 %v13047_v10  ;;  %v13054_v10 = vld [vmem:[#allocation59_spill] sm:$0xff] }
 0x116   :  { %6420 = vmatpush1.bf16.msra.mxu0 %v13048_v34  ;;  %v13055_v34 = vld [vmem:[#allocation90_spill] sm:$0xff] }
 0x117   :  { %6452 = vmatpush1.bf16.msra.mxu1 %v13049_v39  ;;  %6422 = vmatprep.subr.bf16.mxu0 %v13050_v23  ;;  %v13056_v39 = vld [vmem:[#allocation61_spill] sm:$0xff]  ;;  %v13057_v23 = vld [vmem:[#allocation92_spill] sm:$0xff] }
 0x118   :  { %v9912_v52 = vpop.f32.mrb[0].mxu0  ;;  %6454 = vmatprep.subr.bf16.mxu1 %v13051_v11  ;;  %v9917_v20 = vpop.f32.mrb[0].mxu1  ;;  %v13059_v11 = vld [vmem:[#allocation94_spill] sm:$0xff] }
 0x119   :  { %v9915_v33 = vpop.f32.mrb[1].mxu0  ;;  %v9920_v37 = vpop.f32.mrb[1].mxu1 }
 0x11a   :  { %6424 = vmatpush1.bf16.msra.mxu0 %v13052_v40  ;;  %v13062_v40 = vld [vmem:[#allocation67_spill] sm:$0xff] }
 0x11b   :  { %6456 = vmatpush1.bf16.msra.mxu1 %v13053_v28  ;;  %6426 = vmatprep.subr.bf16.mxu0 %v13054_v10  ;;  %v13064_v28 = vld [vmem:[#allocation69_spill] sm:$0xff]  ;;  %v13075_v10 = vld [vmem:[#allocation110_spill] sm:$0xff] }
 0x11c   :  { %6458 = vmatprep.subr.bf16.mxu1 %v13055_v34  ;;  %v13065_v34 = vld [vmem:[#allocation100_spill] sm:$0xff] }
 0x11e   :  { %6428 = vmatpush1.bf16.msra.mxu0 %v13056_v39  ;;  %v13073_v39 = vld [vmem:[#allocation108_spill] sm:$0xff] }
 0x11f   :  { %6460 = vmatpush1.bf16.msra.mxu1 %v13057_v23  ;;  %6430 = vmatprep.subr.bf16.mxu0 %v13058_v15  ;;  %v13066_v23 = vld [vmem:[#allocation71_spill] sm:$0xff]  ;;  %v13067_v15 = vld [vmem:[#allocation102_spill] sm:$0xff] }
 0x120   :  { %6462 = vmatprep.subr.bf16.mxu1 %v13059_v11  ;;  %v13068_v11 = vld [vmem:[#allocation73_spill] sm:$0xff] }
 0x122   :  { %6432 = vmatpush1.bf16.msra.mxu0 %v13060_v61 }
 0x123   :  { %6464 = vmatpush1.bf16.msra.mxu1 %v13061_v57  ;;  %6498 = vmatprep.subr.bf16.mxu0 %v13062_v40  ;;  %v13069_v57 = vld [vmem:[#allocation104_spill] sm:$0xff] }
 0x124   :  { %6466 = vmatprep.subr.bf16.mxu1 %v13063_v5  ;;  %v13070_v5 = vld [vmem:[#allocation75_spill] sm:$0xff] }
 0x125   :  { %1423 = vmatmul.mubr.f32.vlgmr.msra.gmra.mrb[16].mxu0 %v9876_v2 }
 0x126   :  { %6500 = vmatpush1.bf16.msra.mxu0 %v13064_v28  ;;  %1428 = vmatprep.mubr.f32.mxu0 %v9882_v0  ;;  %v13071_v28 = vld [vmem:[#allocation106_spill] sm:$0xff] }
 0x127   :  { %6468 = vmatpush1.bf16.msra.mxu1 %v13065_v34  ;;  %6502 = vmatprep.subr.bf16.mxu0 %v13066_v23  ;;  %v13072_v23 = vld [vmem:[#allocation77_spill] sm:$0xff] }
 0x128   :  { %6470 = vmatprep.subr.bf16.mxu1 %v13067_v15  ;;  %v9944_v40 = vpop.f32.mrb[2].mxu0  ;;  %v9949_v34 = vpop.f32.mrb[2].mxu1 }
 0x129   :  { %1429 = vmatmul.mubr.f32.gmra.mrb[18].mxu0 %v9891_v62  ;;  %v9947_v61 = vpop.f32.mrb[3].mxu0  ;;  %v9952_v15 = vpop.f32.mrb[3].mxu1 }
 0x12a   :  { %6504 = vmatpush1.bf16.msra.mxu0 %v13068_v11  ;;  %1576 = vmatprep.mubr.f32.mxu0 %v9729_v16  ;;  %v13074_v11 = vld [vmem:[#allocation79_spill] sm:$0xff] }
 0x12b   :  { %6472 = vmatpush1.bf16.msra.mxu1 %v13069_v57  ;;  %6506 = vmatprep.subr.bf16.mxu0 %v13070_v5  ;;  %v13076_v57 = vld [vmem:[#allocation81_spill] sm:$0xff]  ;;  %v13077_v5 = vld [vmem:[#allocation112_spill] sm:$0xff] }
 0x12c   :  { %6474 = vmatprep.subr.bf16.mxu1 %v13071_v28  ;;  %v13079_v28 = vld [vmem:[#allocation114_spill] sm:$0xff] }
 0x12e   :  { %6508 = vmatpush1.bf16.msra.mxu0 %v13072_v23  ;;  %v13082_v23 = vld [vmem:[#allocation87_spill] sm:$0xff] }
 0x12f   :  { %6476 = vmatpush1.bf16.msra.mxu1 %v13073_v39  ;;  %6510 = vmatprep.subr.bf16.mxu0 %v13074_v11  ;;  %v13084_v39 = vld [vmem:[#allocation89_spill] sm:$0xff]  ;;  %v13085_v11 = vld [vmem:[#allocation120_spill] sm:$0xff] }
 0x130   :  { %6478 = vmatprep.subr.bf16.mxu1 %v13075_v10  ;;  %v13086_v10 = vld [vmem:[#allocation91_spill] sm:$0xff] }
 0x132   :  { %6512 = vmatpush1.bf16.msra.mxu0 %v13076_v57  ;;  %v13087_v57 = vld [vmem:[#allocation122_spill] sm:$0xff] }
 0x133   :  { %6480 = vmatpush1.bf16.msra.mxu1 %v13077_v5  ;;  %6514 = vmatprep.subr.bf16.mxu0 %v13078_v63  ;;  %v13088_v5 = vld [vmem:[#allocation93_spill] sm:$0xff]  ;;  %v13089_v63 = vld [vmem:[#allocation124_spill] sm:$0xff] }
 0x134   :  { %6482 = vmatprep.subr.bf16.mxu1 %v13079_v28  ;;  %v13090_v28 = vld [vmem:[#allocation95_spill] sm:$0xff] }
 0x136   :  { %6516 = vmatpush1.bf16.msra.mxu0 %v13080_v36  ;;  %v13091_v36 = vld [vmem:[#allocation126_spill] sm:$0xff] }
 0x137   :  { %6484 = vmatpush1.bf16.msra.mxu1 %v13081_v29  ;;  %6518 = vmatprep.subr.bf16.mxu0 %v13082_v23  ;;  %v13092_v29 = vld [vmem:[#allocation97_spill] sm:$0xff] }
 0x138   :  { %6486 = vmatprep.subr.bf16.mxu1 %v13083_v56  ;;  %v13093_v56 = vld [vmem:[#allocation99_spill] sm:$0xff] }
 0x13a   :  { %6520 = vmatpush1.bf16.msra.mxu0 %v13084_v39  ;;  %v13094_v39 = vld [vmem:[#allocation130_spill] sm:$0xff] }
 0x13b   :  { %6488 = vmatpush1.bf16.msra.mxu1 %v13085_v11  ;;  %6522 = vmatprep.subr.bf16.mxu0 %v13086_v10  ;;  %v13095_v11 = vld [vmem:[#allocation101_spill] sm:$0xff] }
 0x13c   :  { %6490 = vmatprep.subr.bf16.mxu1 %v13087_v57  ;;  %v13097_v57 = vld [vmem:[#allocation134_spill] sm:$0xff] }
 0x13e   :  { %6524 = vmatpush1.bf16.msra.mxu0 %v13088_v5  ;;  %v13112_v5 = vld [vmem:[#allocation119_spill] sm:$0xff] }
 0x13f   :  { %6492 = vmatpush1.bf16.msra.mxu1 %v13089_v63  ;;  %6526 = vmatprep.subr.bf16.mxu0 %v13090_v28  ;;  %v13096_v63 = vld [vmem:[#allocation103_spill] sm:$0xff]  ;;  %v13107_v28 = vld [vmem:[#allocation144_spill] sm:$0xff] }
 0x140   :  { %6494 = vmatprep.subr.bf16.mxu1 %v13091_v36  ;;  %v13098_v36 = vld [vmem:[#allocation105_spill] sm:$0xff] }
 0x142   :  { %6528 = vmatpush1.bf16.msra.mxu0 %v13092_v29  ;;  %v13104_v29 = vld [vmem:[#allocation111_spill] sm:$0xff] }
 0x143   :  { %6496 = vmatpush1.bf16.msra.mxu1 %v9071_v1  ;;  %6530 = vmatprep.subr.bf16.mxu0 %v13093_v56  ;;  %v13099_v1 = vld [vmem:[#allocation136_spill] sm:$0xff]  ;;  %v13100_v56 = vld [vmem:[#allocation107_spill] sm:$0xff] }
 0x144   :  { %6562 = vmatprep.subr.bf16.mxu1 %v13094_v39  ;;  %v13101_v39 = vld [vmem:[#allocation138_spill] sm:$0xff] }
 0x146   :  { %1500 = vmatmul.mubr.f32.vlgmr.msra.gmra.mrb[16].mxu1 %v9876_v2  ;;  %6532 = vmatpush1.bf16.msra.mxu0 %v13095_v11  ;;  %v13102_v11 = vld [vmem:[#allocation109_spill] sm:$0xff] }
 0x147   :  { %6564 = vmatpush1.bf16.msra.mxu1 %v9107_v19  ;;  %1505 = vmatprep.mubr.f32.mxu1 %v9882_v0  ;;  %v13103_v19 = vld [vmem:[#allocation140_spill] sm:$0xff] }
 0x148   :  { %6534 = vmatprep.subr.bf16.mxu0 %v13096_v63  ;;  %6566 = vmatprep.subr.bf16.mxu1 %v13097_v57  ;;  %v13105_v63 = vld [vmem:[#allocation142_spill] sm:$0xff]  ;;  %v13106_v57 = vld [vmem:[#allocation113_spill] sm:$0xff] }
 0x14a   :  { %1506 = vmatmul.mubr.f32.gmra.mrb[18].mxu1 %v9891_v62  ;;  %6536 = vmatpush1.bf16.msra.mxu0 %v13098_v36  ;;  %v13108_v36 = vld [vmem:[#allocation115_spill] sm:$0xff] }
 0x14b   :  { %6568 = vmatpush1.bf16.msra.mxu1 %v13099_v1  ;;  %6538 = vmatprep.subr.bf16.mxu0 %v13100_v56  ;;  %v13109_v1 = vld [vmem:[#allocation146_spill] sm:$0xff]  ;;  %v13110_v56 = vld [vmem:[#allocation117_spill] sm:$0xff] }
 0x14c   :  { %6570 = vmatprep.subr.bf16.mxu1 %v13101_v39  ;;  %1653 = vmatprep.mubr.f32.mxu1 %v9729_v16  ;;  %v13111_v39 = vld [vmem:[#allocation148_spill] sm:$0xff] }
 0x14e   :  { %6540 = vmatpush1.bf16.msra.mxu0 %v13102_v11 }
 0x14f   :  { %6572 = vmatpush1.bf16.msra.mxu1 %v13103_v19  ;;  %6542 = vmatprep.subr.bf16.mxu0 %v13104_v29  ;;  %v13113_v19 = vld [vmem:[#allocation150_spill] sm:$0xff] }
 0x150   :  { %6574 = vmatprep.subr.bf16.mxu1 %v13105_v63 }
 0x152   :  { %6544 = vmatpush1.bf16.msra.mxu0 %v13106_v57  ;;  %v13114_v57 = vld [vmem:[#allocation121_spill] sm:$0xff] }
 0x153   :  { %6576 = vmatpush1.bf16.msra.mxu1 %v13107_v28  ;;  %6546 = vmatprep.subr.bf16.mxu0 %v13108_v36  ;;  %v13115_v36 = vld [vmem:[#allocation152_spill] sm:$0xff] }
 0x154   :  { %6578 = vmatprep.subr.bf16.mxu1 %v13109_v1  ;;  %v13116_v1 = vld [vmem:[#allocation123_spill] sm:$0xff] }
 0x156   :  { %6548 = vmatpush1.bf16.msra.mxu0 %v13110_v56  ;;  %v13117_v56 = vld [vmem:[#allocation154_spill] sm:$0xff] }
 0x157   :  { %6580 = vmatpush1.bf16.msra.mxu1 %v13111_v39  ;;  %6550 = vmatprep.subr.bf16.mxu0 %v13112_v5 }
 0x158   :  { %v10000_v11 = vpop.f32.mrb[4].mxu0  ;;  %6582 = vmatprep.subr.bf16.mxu1 %v13113_v19  ;;  %v10005_v63 = vpop.f32.mrb[4].mxu1  ;;  %v13118_v19 = vld [vmem:[#allocation125_spill] sm:$0xff] }
 0x159   :  { %v10003_v29 = vpop.f32.mrb[5].mxu0  ;;  %v10008_v28 = vpop.f32.mrb[5].mxu1 }
 0x15a   :  { %6552 = vmatpush1.bf16.msra.mxu0 %v13114_v57  ;;  %v13120_v57 = vld [vmem:[#allocation127_spill] sm:$0xff] }
 0x15b   :  { %6584 = vmatpush1.bf16.msra.mxu1 %v13115_v36  ;;  %6554 = vmatprep.subr.bf16.mxu0 %v13116_v1  ;;  %v13122_v36 = vld [vmem:[#allocation129_spill] sm:$0xff]  ;;  %v13123_v1 = vld [vmem:[#allocation160_spill] sm:$0xff] }
 0x15c   :  { %6586 = vmatprep.subr.bf16.mxu1 %v13117_v56  ;;  %v10013_v39 = vpop.f32.mrb[6].mxu0  ;;  %v10017_v10 = vpop.f32.mrb[6].mxu1  ;;  %v13124_v56 = vld [vmem:[#allocation131_spill] sm:$0xff] }
 0x15d   :  { %v10015_v5 = vpop.f32.mrb[7].mxu0  ;;  %v10020_v23 = vpop.f32.mrb[7].mxu1 }
 0x15e   :  { %6556 = vmatpush1.bf16.msra.mxu0 %v13118_v19  ;;  %v13127_v19 = vld [vmem:[#allocation164_spill] sm:$0xff] }
 0x15f   :  { %6588 = vmatpush1.bf16.msra.mxu1 %v13119_v51  ;;  %6558 = vmatprep.subr.bf16.mxu0 %v13120_v57  ;;  %v13128_v51 = vld [vmem:[#allocation135_spill] sm:$0xff]  ;;  %v13129_v57 = vld [vmem:[#allocation166_spill] sm:$0xff] }
 0x160   :  { %6590 = vmatprep.subr.bf16.mxu1 %v13121_v9  ;;  %v13130_v9 = vld [vmem:[#allocation137_spill] sm:$0xff] }
 0x162   :  { %6560 = vmatpush1.bf16.msra.mxu0 %v13122_v36  ;;  %v13135_v36 = vld [vmem:[#allocation172_spill] sm:$0xff] }
 0x163   :  { %6592 = vmatpush1.bf16.msra.mxu1 %v13123_v1  ;;  %6626 = vmatprep.subr.bf16.mxu0 %v13124_v56  ;;  %v13131_v1 = vld [vmem:[#allocation168_spill] sm:$0xff]  ;;  %v13133_v56 = vld [vmem:[#allocation170_spill] sm:$0xff] }
 0x164   :  { %6594 = vmatprep.subr.bf16.mxu1 %v13125_v4  ;;  %v13132_v4 = vld [vmem:[#allocation139_spill] sm:$0xff] }
 0x165   :  { %1577 = vmatmul.mubr.f32.vlgmr.msra.gmra.mrb[20].mxu0 %v9876_v2 }
 0x166   :  { %6628 = vmatpush1.bf16.msra.mxu0 %v13126_v43  ;;  %1582 = vmatprep.mubr.f32.mxu0 %v9882_v0  ;;  %v13134_v43 = vld [vmem:[#allocation141_spill] sm:$0xff] }
 0x167   :  { %6596 = vmatpush1.bf16.msra.mxu1 %v13127_v19  ;;  %6630 = vmatprep.subr.bf16.mxu0 %v13128_v51  ;;  %v13136_v19 = vld [vmem:[#allocation143_spill] sm:$0xff]  ;;  %v13137_v51 = vld [vmem:[#allocation174_spill] sm:$0xff] }
 0x168   :  { %6598 = vmatprep.subr.bf16.mxu1 %v13129_v57  ;;  %v13138_v57 = vld [vmem:[#allocation145_spill] sm:$0xff] }
 0x169   :  { %1583 = vmatmul.mubr.f32.gmra.mrb[22].mxu0 %v9891_v62 }
 0x16a   :  { %6632 = vmatpush1.bf16.msra.mxu0 %v13130_v9  ;;  %1730 = vmatprep.mubr.f32.mxu0 %v9729_v16  ;;  %v13140_v9 = vld [vmem:[#allocation147_spill] sm:$0xff] }
 0x16b   :  { %6600 = vmatpush1.bf16.msra.mxu1 %v13131_v1  ;;  %6634 = vmatprep.subr.bf16.mxu0 %v13132_v4  ;;  %v13142_v1 = vld [vmem:[#allocation149_spill] sm:$0xff]  ;;  %v13143_v4 = vld [vmem:[#allocation180_spill] sm:$0xff] }
 0x16c   :  { %6602 = vmatprep.subr.bf16.mxu1 %v13133_v56  ;;  %v13144_v56 = vld [vmem:[#allocation151_spill] sm:$0xff] }
 0x16e   :  { %6636 = vmatpush1.bf16.msra.mxu0 %v13134_v43  ;;  %v13145_v43 = vld [vmem:[#allocation182_spill] sm:$0xff] }
 0x16f   :  { %6604 = vmatpush1.bf16.msra.mxu1 %v13135_v36  ;;  %6638 = vmatprep.subr.bf16.mxu0 %v13136_v19  ;;  %v13146_v36 = vld [vmem:[#allocation153_spill] sm:$0xff] }
 0x170   :  { %6606 = vmatprep.subr.bf16.mxu1 %v13137_v51  ;;  %v13147_v51 = vld [vmem:[#allocation155_spill] sm:$0xff] }
 0x172   :  { %6640 = vmatpush1.bf16.msra.mxu0 %v13138_v57 }
 0x173   :  { %6608 = vmatpush1.bf16.msra.mxu1 %v13139_v38  ;;  %6642 = vmatprep.subr.bf16.mxu0 %v13140_v9  ;;  %v13148_v38 = vld [vmem:[#allocation157_spill] sm:$0xff] }
 0x174   :  { %6610 = vmatprep.subr.bf16.mxu1 %v13141_v53  ;;  %v13149_v53 = vld [vmem:[#allocation159_spill] sm:$0xff] }
 0x176   :  { %6644 = vmatpush1.bf16.msra.mxu0 %v13142_v1 }
 0x177   :  { %6612 = vmatpush1.bf16.msra.mxu1 %v13143_v4  ;;  %6646 = vmatprep.subr.bf16.mxu0 %v13144_v56  ;;  %v13150_v4 = vld [vmem:[#allocation161_spill] sm:$0xff] }
 0x178   :  { %6614 = vmatprep.subr.bf16.mxu1 %v13145_v43  ;;  %v13151_v43 = vld [vmem:[#allocation163_spill] sm:$0xff] }
 0x17a   :  { %6648 = vmatpush1.bf16.msra.mxu0 %v13146_v36 }
 0x17b   :  { %6616 = vmatpush1.bf16.msra.mxu1 %v9583_v46  ;;  %6650 = vmatprep.subr.bf16.mxu0 %v13147_v51  ;;  %v13152_v46 = vld [vmem:[#allocation165_spill] sm:$0xff] }
 0x17c   :  { %6618 = vmatprep.subr.bf16.mxu1 %v9589_v42  ;;  %v4542_v42 = vld [vmem:[%s12465_s3 + $0x650] sm:$0xff] }
 0x17d   :  { %v4626_v51 = vld [vmem:[%s12465_s3 + $0x8f0] sm:$0xff] }
 0x17e   :  { %6652 = vmatpush1.bf16.msra.mxu0 %v13148_v38 }
 0x17f   :  { %6620 = vmatpush1.bf16.msra.mxu1 %v9619_v41  ;;  %6654 = vmatprep.subr.bf16.mxu0 %v13149_v53  ;;  %v13153_v41 = vld [vmem:[#allocation167_spill] sm:$0xff] }
 0x180   :  { %6622 = vmatprep.subr.bf16.mxu1 %v9625_v6  ;;  %v13154_v6 = vld [vmem:[#allocation169_spill] sm:$0xff] }
 0x182   :  { %6656 = vmatpush1.bf16.msra.mxu0 %v13150_v4 }
 0x183   :  { %6624 = vmatpush1.bf16.msra.mxu1 %v9649_v44  ;;  %6658 = vmatprep.subr.bf16.mxu0 %v13151_v43  ;;  %v13155_v44 = vld [vmem:[#allocation171_spill] sm:$0xff] }
 0x184   :  { %6690 = vmatprep.subr.bf16.mxu1 %v9655_v45  ;;  %v13156_v45 = vld [vmem:[#allocation173_spill] sm:$0xff]  ;;  %v4560_v43 = vld [vmem:[%s12465_s3 + $0x6e0] sm:$0xff] }
 0x186   :  { %1654 = vmatmul.mubr.f32.vlgmr.msra.gmra.mrb[20].mxu1 %v9876_v2  ;;  %6660 = vmatpush1.bf16.msra.mxu0 %v13152_v46 }
 0x187   :  { %6692 = vmatpush3.bf16.msra.mxu1 %v9671_v24  ;;  %1659 = vmatprep.mubr.f32.mxu1 %v9882_v0  ;;  %v13157_v24 = vld [vmem:[#allocation175_spill] sm:$0xff] }
 0x188   :  { %6662 = vmatprep.subr.bf16.mxu0 %v13153_v41  ;;  %6694 = vmatprep.subr.bf16.mxu1 %v9675_v13  ;;  %v13158_v13 = vld [vmem:[#allocation177_spill] sm:$0xff] }
 0x189   :  { %v4590_v41 = vld [vmem:[%s12465_s3 + $0x7d0] sm:$0xff] }
 0x18a   :  { %1660 = vmatmul.mubr.f32.gmra.mrb[22].mxu1 %v9891_v62  ;;  %6664 = vmatpush1.bf16.msra.mxu0 %v13154_v6  ;;  %v13159_v6 = vld [vmem:[#allocation179_spill] sm:$0xff] }
 0x18b   :  { %6696 = vmatpush3.bf16.msra.mxu1 %v9698_v27  ;;  %6666 = vmatprep.subr.bf16.mxu0 %v13155_v44  ;;  %v13160_v27 = vld [vmem:[#allocation181_spill] sm:$0xff] }
 0x18c   :  { %6698 = vmatprep.subr.bf16.mxu1 %v9702_v3  ;;  %1807 = vmatprep.mubr.f32.mxu1 %v9729_v16  ;;  %v13161_v16 = vld [vmem:[#allocation183_spill] sm:$0xff]  ;;  %v13165_v44 = vld [vmem:[#allocation193_spill] sm:$0xff] }
 0x18e   :  { %6668 = vmatpush1.bf16.msra.mxu0 %v13156_v45  ;;  %v4541_v45 = vld [vmem:[%s12465_s3 + $0x648] sm:$0xff] }
 0x18f   :  { %6700 = vmatpush3.bf16.msra.mxu1 %v9721_v49  ;;  %6670 = vmatprep.subr.bf16.mxu0 %v13157_v24  ;;  %v4540_v24 = vld [vmem:[%s12465_s3 + $0x640] sm:$0xff] }
 0x190   :  { %6702 = vmatprep.subr.bf16.mxu1 %v9733_v8 }
 0x192   :  { %6672 = vmatpush1.bf16.msra.mxu0 %v13158_v13  ;;  %v13162_v13 = vld [vmem:[#allocation185_spill] sm:$0xff] }
 0x193   :  { %6704 = vmatpush3.bf16.msra.mxu1 %v9751_v59  ;;  %6674 = vmatprep.subr.bf16.mxu0 %v13159_v6 }
 0x194   :  { %6706 = vmatprep.subr.bf16.mxu1 %v9755_v22  ;;  %v13163_v22 = vld [vmem:[#allocation187_spill] sm:$0xff] }
 0x196   :  { %6676 = vmatpush1.bf16.msra.mxu0 %v13160_v27 }
 0x197   :  { %6708 = vmatpush3.bf16.msra.mxu1 %v9771_v55  ;;  %6678 = vmatprep.subr.bf16.mxu0 %v13161_v16  ;;  %v4557_v16 = vld [vmem:[%s12465_s3 + $0x6c8] sm:$0xff] }
 0x198   :  { %v10088_v3 = vpop.f32.mrb[8].mxu0  ;;  %6710 = vmatprep.subr.bf16.mxu1 %v9775_v58  ;;  %v4556_v58 = vld [vmem:[%s12465_s3 + $0x6c0] sm:$0xff] }
 0x199   :  { %v10091_v49 = vpop.f32.mrb[9].mxu0  ;;  %v10093_v8 = vpop.f32.mrb[8].mxu1 }
 0x19a   :  { %6680 = vmatpush1.bf16.msra.mxu0 %v13162_v13  ;;  %v10096_v59 = vpop.f32.mrb[9].mxu1  ;;  %v6721_v13 = vpack.c.bf16 %v4557_v16, %v4556_v58  ;;  %v4559_v58 = vld [vmem:[%s12465_s3 + $0x6d8] sm:$0xff]  ;;  %v4572_v16 = vld [vmem:[%s12465_s3 + $0x740] sm:$0xff] }
 0x19b   :  { %6712 = vmatpush3.bf16.msra.mxu1 %v9791_v31  ;;  %6682 = vmatprep.subr.bf16.mxu0 %v13163_v22  ;;  %v4588_v31 = vld [vmem:[%s12465_s3 + $0x7c0] sm:$0xff] }
 0x19c   :  { %6714 = vmatprep.subr.bf16.mxu1 %v9795_v54  ;;  %v10101_v55 = vpop.f32.mrb[10].mxu0  ;;  %v4589_v54 = vld [vmem:[%s12465_s3 + $0x7c8] sm:$0xff]  ;;  %v13164_v22 = vld [vmem:[#allocation191_spill] sm:$0xff] }
 0x19d   :  { %v10109_v27 = vpop.f32.mrb[11].mxu0 }
 0x19e   :  { %6684 = vmatpush1.bf16.msra.mxu0 %v9623_v47  ;;  %v4558_v47 = vld [vmem:[%s12465_s3 + $0x6d0] sm:$0xff] }
 0x19f   :  { %6716 = vmatpush3.bf16.msra.mxu1 %v9811_v26  ;;  %6686 = vmatprep.subr.bf16.mxu0 %v13164_v22  ;;  %v10120_v6 = vpop.f32.mrb[10].mxu1  ;;  %v6753_v22 = vpack.c.bf16 %v4589_v54, %v4588_v31  ;;  %v4591_v31 = vld [vmem:[%s12465_s3 + $0x7d8] sm:$0xff]  ;;  %v6723_v54 = vpack.c.bf16 %v4541_v45, %v4540_v24  ;;  %v6725_v46 = vpack.c.bf16 %v4559_v58, %v4558_v47  ;;  %v4561_v47 = vld [vmem:[%s12465_s3 + $0x6e8] sm:$0xff]  ;;  %v4574_v24 = vld [vmem:[%s12465_s3 + $0x750] sm:$0xff] }
 0x1a0   :  { %6718 = vmatprep.subr.bf16.mxu1 %v9815_v60  ;;  %v10132_v26 = vpop.f32.mrb[11].mxu1  ;;  %v4573_v60 = vld [vmem:[%s12465_s3 + $0x748] sm:$0xff]  ;;  %v6757_v45 = vpack.c.bf16 %v4591_v31, %v4590_v41  ;;  %v6729_v58 = vpack.c.bf16 %v4561_v47, %v4560_v43  ;;  %v4562_v31 = vld [vmem:[%s12465_s3 + $0x6f0] sm:$0xff]  ;;  %v4563_v43 = vld [vmem:[%s12465_s3 + $0x6f8] sm:$0xff] }
 0x1a1   :  { %v6755_v4 = vpack.c.bf16 %v4573_v60, %v4572_v16  ;;  %v4593_v41 = vld [vmem:[%s12465_s3 + $0x7e8] sm:$0xff]  ;;  %v6733_v47 = vpack.c.bf16 %v4563_v43, %v4562_v31  ;;  %v4548_v43 = vld [vmem:[%s12465_s3 + $0x680] sm:$0xff] }
 0x1a2   :  { %6688 = vmatpush1.bf16.msra.mxu0 %v13165_v44  ;;  %v4543_v44 = vld [vmem:[%s12465_s3 + $0x658] sm:$0xff]  ;;  %v4545_v16 = vld [vmem:[%s12465_s3 + $0x668] sm:$0xff] }
 0x1a3   :  { %6720 = vmatpush3.bf16.msra.mxu1 %v9825_v50  ;;  %6722 = vmatprep.subr.bf16.mxu0 %v6721_v13  ;;  %v4575_v13 = vld [vmem:[%s12465_s3 + $0x758] sm:$0xff]  ;;  %v6727_v60 = vpack.c.bf16 %v4543_v44, %v4542_v42  ;;  %v4577_v44 = vld [vmem:[%s12465_s3 + $0x768] sm:$0xff] }
 0x1a4   :  { %6754 = vmatprep.subr.bf16.mxu1 %v6753_v22  ;;  %v4592_v22 = vld [vmem:[%s12465_s3 + $0x7e0] sm:$0xff]  ;;  %v6759_v50 = vpack.c.bf16 %v4575_v13, %v4574_v24 }
 0x1a5   :  { %1731 = vmatmul.mubr.f32.vlgmr.msra.gmra.mrb[24].mxu0 %v9876_v2  ;;  %v6761_v42 = vpack.c.bf16 %v4593_v41, %v4592_v22  ;;  %v4564_v24 = vld [vmem:[%s12465_s3 + $0x700] sm:$0xff]  ;;  %v4565_v22 = vld [vmem:[%s12465_s3 + $0x708] sm:$0xff] }
 0x1a6   :  { %1808 = vmatmul.mubr.f32.vlgmr.msra.gmra.mrb[24].mxu1 %v9876_v2  ;;  %1736 = vmatprep.mubr.f32.mxu0 %v9882_v0  ;;  %v4544_v2 = vld [vmem:[%s12465_s3 + $0x660] sm:$0xff]  ;;  %v6737_v31 = vpack.c.bf16 %v4565_v22, %v4564_v24  ;;  %v4550_v22 = vld [vmem:[%s12465_s3 + $0x690] sm:$0xff] }
 0x1a7   :  { %1812 = vmatprep.mubr.f32.mxu1 %v9882_v0  ;;  %6724 = vmatpush3.bf16.msra.mxu0 %v6723_v54  ;;  %v4595_v0 = vld [vmem:[%s12465_s3 + $0x7f8] sm:$0xff]  ;;  %v6731_v54 = vpack.c.bf16 %v4545_v16, %v4544_v2  ;;  %v4596_v2 = vld [vmem:[%s12465_s3 + $0x800] sm:$0xff] }
 0x1a8   :  { %6726 = vmatprep.subr.bf16.mxu0 %v6725_v46  ;;  %6756 = vmatpush3.bf16.msra.mxu1 %v6755_v4  ;;  %v4576_v46 = vld [vmem:[%s12465_s3 + $0x760] sm:$0xff]  ;;  %v4594_v4 = vld [vmem:[%s12465_s3 + $0x7f0] sm:$0xff] }
 0x1a9   :  { %1737 = vmatmul.mubr.f32.gmra.mrb[26].mxu0 %v9891_v62  ;;  %6758 = vmatprep.subr.bf16.mxu1 %v6757_v45  ;;  %v4546_v45 = vld [vmem:[%s12465_s3 + $0x670] sm:$0xff]  ;;  %v6763_v13 = vpack.c.bf16 %v4577_v44, %v4576_v46  ;;  %v6765_v41 = vpack.c.bf16 %v4595_v0, %v4594_v4  ;;  %v4567_v4 = vld [vmem:[%s12465_s3 + $0x718] sm:$0xff] }
 0x1aa   :  { %1813 = vmatmul.mubr.f32.gmra.mrb[26].mxu1 %v9891_v62  ;;  %v4547_v62 = vld [vmem:[%s12465_s3 + $0x678] sm:$0xff]  ;;  %v4566_v46 = vld [vmem:[%s12465_s3 + $0x710] sm:$0xff] }
 0x1ab   :  { %6728 = vmatpush3.bf16.msra.mxu0 %v6727_v60  ;;  %v4578_v60 = vld [vmem:[%s12465_s3 + $0x770] sm:$0xff]  ;;  %v6735_v16 = vpack.c.bf16 %v4547_v62, %v4546_v45  ;;  %v4599_v62 = vld [vmem:[%s12465_s3 + $0x818] sm:$0xff] }
 0x1ac   :  { %6730 = vmatprep.subr.bf16.mxu0 %v6729_v58  ;;  %6760 = vmatpush3.bf16.msra.mxu1 %v6759_v50  ;;  %v4579_v58 = vld [vmem:[%s12465_s3 + $0x778] sm:$0xff]  ;;  %v4597_v50 = vld [vmem:[%s12465_s3 + $0x808] sm:$0xff]  ;;  %v4598_v45 = vld [vmem:[%s12465_s3 + $0x810] sm:$0xff] }
 0x1ad   :  { %6762 = vmatprep.subr.bf16.mxu1 %v6761_v42  ;;  %v4549_v42 = vld [vmem:[%s12465_s3 + $0x688] sm:$0xff]  ;;  %v6767_v44 = vpack.c.bf16 %v4579_v58, %v4578_v60  ;;  %v6769_v0 = vpack.c.bf16 %v4597_v50, %v4596_v2  ;;  %v4568_v60 = vld [vmem:[%s12465_s3 + $0x720] sm:$0xff]  ;;  %v6773_v50 = vpack.c.bf16 %v4599_v62, %v4598_v45 }
 0x1ae   :  { %v6739_v24 = vpack.c.bf16 %v4549_v42, %v4548_v43  ;;  %v4569_v2 = vld [vmem:[%s12465_s3 + $0x728] sm:$0xff]  ;;  %v4600_v43 = vld [vmem:[%s12465_s3 + $0x820] sm:$0xff] }
 0x1af   :  { %6732 = vmatpush3.bf16.msra.mxu0 %v6731_v54  ;;  %v4580_v54 = vld [vmem:[%s12465_s3 + $0x780] sm:$0xff]  ;;  %v4601_v42 = vld [vmem:[%s12465_s3 + $0x828] sm:$0xff] }
 0x1b0   :  { %6734 = vmatprep.subr.bf16.mxu0 %v6733_v47  ;;  %6764 = vmatpush3.bf16.msra.mxu1 %v6763_v13  ;;  %v4581_v47 = vld [vmem:[%s12465_s3 + $0x788] sm:$0xff]  ;;  %v6741_v13 = vpack.c.bf16 %v4567_v4, %v4566_v46  ;;  %v6745_v4 = vpack.c.bf16 %v4569_v2, %v4568_v60  ;;  %v4603_v2 = vld [vmem:[%s12465_s3 + $0x838] sm:$0xff] }
 0x1b1   :  { %6766 = vmatprep.subr.bf16.mxu1 %v6765_v41  ;;  %v4551_v41 = vld [vmem:[%s12465_s3 + $0x698] sm:$0xff]  ;;  %v6771_v58 = vpack.c.bf16 %v4581_v47, %v4580_v54  ;;  %v4553_v54 = vld [vmem:[%s12465_s3 + $0x6a8] sm:$0xff]  ;;  %v4570_v47 = vld [vmem:[%s12465_s3 + $0x730] sm:$0xff] }
 0x1b2   :  { %v6743_v46 = vpack.c.bf16 %v4551_v41, %v4550_v22  ;;  %v4584_v22 = vld [vmem:[%s12465_s3 + $0x7a0] sm:$0xff]  ;;  %v4585_v41 = vld [vmem:[%s12465_s3 + $0x7a8] sm:$0xff] }
 0x1b3   :  { %6736 = vmatpush3.bf16.msra.mxu0 %v6735_v16  ;;  %v4582_v16 = vld [vmem:[%s12465_s3 + $0x790] sm:$0xff] }
 0x1b4   :  { %6738 = vmatprep.subr.bf16.mxu0 %v6737_v31  ;;  %6768 = vmatpush3.bf16.msra.mxu1 %v6767_v44  ;;  %v4583_v31 = vld [vmem:[%s12465_s3 + $0x798] sm:$0xff] }
 0x1b5   :  { %6770 = vmatprep.subr.bf16.mxu1 %v6769_v0  ;;  %v4552_v0 = vld [vmem:[%s12465_s3 + $0x6a0] sm:$0xff]  ;;  %v6775_v45 = vpack.c.bf16 %v4583_v31, %v4582_v16  ;;  %v4554_v31 = vld [vmem:[%s12465_s3 + $0x6b0] sm:$0xff] }
 0x1b7   :  { %6740 = vmatpush3.bf16.msra.mxu0 %v6739_v24  ;;  %v4571_v24 = vld [vmem:[%s12465_s3 + $0x738] sm:$0xff] }
 0x1b8   :  { %v4983_v44 = vpop.f32.mrb[12].mxu0  ;;  %6742 = vmatprep.subr.bf16.mxu0 %v6741_v13  ;;  %6772 = vmatpush3.bf16.msra.mxu1 %v6771_v58  ;;  %v6777_v13 = vpack.c.bf16 %v4601_v42, %v4600_v43  ;;  %v4602_v58 = vld [vmem:[%s12465_s3 + $0x830] sm:$0xff]  ;;  %v6749_v16 = vpack.c.bf16 %v4571_v24, %v4570_v47  ;;  %v4555_v43 = vld [vmem:[%s12465_s3 + $0x6b8] sm:$0xff]  ;;  %v4653_v24 = vld [vmem:[%s12465_s3 + $0x9c8] sm:$0xff] }
 0x1b9   :  { %v4984_v62 = vpop.f32.mrb[13].mxu0  ;;  %6774 = vmatprep.subr.bf16.mxu1 %v6773_v50  ;;  %v6747_v50 = vpack.c.bf16 %v4553_v54, %v4552_v0  ;;  %v4620_v0 = vld [vmem:[%s12465_s3 + $0x8c0] sm:$0xff]  ;;  %v4621_v54 = vld [vmem:[%s12465_s3 + $0x8c8] sm:$0xff] }
 0x1ba   :  { %v10295_v60 = vadd.f32 %v4984_v62, %v4983_v44  ;;  %v6779_v44 = vpack.c.bf16 %v4585_v41, %v4584_v22  ;;  %v4586_v62 = vld [vmem:[%s12465_s3 + $0x7b0] sm:$0xff]  ;;  %v6785_v41 = vpack.c.bf16 %v4621_v54, %v4620_v0  ;;  %v4605_v0 = vld [vmem:[%s12465_s3 + $0x848] sm:$0xff] }
 0x1bb   :  { %6744 = vmatpush3.bf16.msra.mxu0 %v6743_v46  ;;  %v6781_v46 = vpack.c.bf16 %v4603_v2, %v4602_v58 }
 0x1bc   :  { %6746 = vmatprep.subr.bf16.mxu0 %v6745_v4  ;;  %v4986_v42 = vpop.f32.mrb[14].mxu0  ;;  %6776 = vmatpush3.bf16.msra.mxu1 %v6775_v45  ;;  %v4587_v4 = vld [vmem:[%s12465_s3 + $0x7b8] sm:$0xff]  ;;  %v4652_v45 = vld [vmem:[%s12465_s3 + $0x9c0] sm:$0xff] }
 0x1bd   :  { %v4987_v53 = vpop.f32.mrb[15].mxu0  ;;  %6778 = vmatprep.subr.bf16.mxu1 %v6777_v13  ;;  %v6751_v13 = vpack.c.bf16 %v4555_v43, %v4554_v31  ;;  %v6783_v22 = vpack.c.bf16 %v4587_v4, %v4586_v62  ;;  %v6817_v58 = vpack.c.bf16 %v4653_v24, %v4652_v45  ;;  %v4604_v4 = vld [vmem:[%s12465_s3 + $0x840] sm:$0xff]  ;;  %v4622_v45 = vld [vmem:[%s12465_s3 + $0x8d0] sm:$0xff]  ;;  %v4623_v24 = vld [vmem:[%s12465_s3 + $0x8d8] sm:$0xff] }
 0x1be   :  { %v10321_v47 = vadd.f32 %v4987_v53, %v4986_v42  ;;  %v448_v53 = vlaneseq }
 0x1bf   :  { %6748 = vmatpush3.bf16.msra.mxu0 %v6747_v50  ;;  %v10335_v50 = vld [vmem:[%s12464_s2] sm:$0xff] }
 0x1c0   :  { %6750 = vmatprep.subr.bf16.mxu0 %v6749_v16  ;;  %6780 = vmatpush3.bf16.msra.mxu1 %v6779_v44  ;;  %v10329_v2 = vshrl.u32 %v448_v53, 7  ;;  %v6789_v53 = vpack.c.bf16 %v4623_v24, %v4622_v45 }
 0x1c1   :  { %6782 = vmatprep.subr.bf16.mxu1 %v6781_v46 }
 0x1c2   :  { %v12808_v42 = vsub.s32 0, %v10329_v2  ;;  %v12807_v16 = vsub.s32 1, %v10329_v2 }
 0x1c3   :  { %6752 = vmatpush3.bf16.msra.mxu0 %v6751_v13 }
 0x1c4   :  { %6784 = vmatpush3.bf16.msra.mxu1 %v6783_v22  ;;  %6786 = vmatprep.subr.bf16.mxu0 %v6785_v41  ;;  %v10341_v31 = vrot.slane %v10335_v50, %v12808_v42  ;;  %v10346_v43 = vrot.slane %v10335_v50, %v12807_v16  ;;  %v6787_v41 = vpack.c.bf16 %v4605_v0, %v4604_v4  ;;  %v4625_v4 = vld [vmem:[%s12465_s3 + $0x8e8] sm:$0xff] }
 0x1c5   :  { %6818 = vmatprep.subr.bf16.mxu1 %v6817_v58 }
 0x1d9   :  { %v1347_v44 = vpop.f32.mrb[12].mxu1 }
 0x1da   :  { %v1348_v62 = vadd.f32 %v1347_v44, %v10341_v31  ;;  %v1349_v46 = vpop.f32.mrb[13].mxu1  ;;  %v4606_v44 = vld [vmem:[%s12465_s3 + $0x850] sm:$0xff] }
 0x1db   :  { %v1350_v54 = vadd.f32 %v1349_v46, %v10346_v43  ;;  %v4607_v46 = vld [vmem:[%s12465_s3 + $0x858] sm:$0xff] }
 0x1dc   :  { %v1818_v13 = vmul.f32 %v1348_v62, %v1348_v62  ;;  %v4624_v62 = vld [vmem:[%s12465_s3 + $0x8e0] sm:$0xff]  ;;  %v6791_v45 = vpack.c.bf16 %v4607_v46, %v4606_v44  ;;  %v4629_v46 = vld [vmem:[%s12465_s3 + $0x908] sm:$0xff] }
 0x1dd   :  { %v1819_v22 = vmul.f32 %v1350_v54, %v1350_v54  ;;  %v1353_v58 = vpop.f32.mrb[14].mxu1  ;;  %v6793_v38 = vpack.c.bf16 %v4625_v4, %v4624_v62  ;;  %v4628_v44 = vld [vmem:[%s12465_s3 + $0x900] sm:$0xff]  ;;  %v4613_v4 = vld [vmem:[%s12465_s3 + $0x888] sm:$0xff] }
 0x1de   :  { %v1354_v16 = vadd.f32 %v1353_v58, %v10341_v31  ;;  %v1355_v42 = vpop.f32.mrb[15].mxu1  ;;  %v4609_v58 = vld [vmem:[%s12465_s3 + $0x868] sm:$0xff] }
 0x1df   :  { %2116 = vmatprep.mubr.f32.mxu0 %v1819_v22  ;;  %v1356_v0 = vadd.f32 %v1355_v42, %v10346_v43  ;;  %v4608_v22 = vld [vmem:[%s12465_s3 + $0x860] sm:$0xff]  ;;  %v4627_v42 = vld [vmem:[%s12465_s3 + $0x8f8] sm:$0xff] }
 0x1e0   :  { %2117 = vmatmul.mubr.f32.vlgmr.msra.gmra.mrb[28].mxu0 %v1818_v13  ;;  %v1831_v54 = vmul.f32 %v1354_v16, %v1354_v16  ;;  %v6795_v16 = vpack.c.bf16 %v4609_v58, %v4608_v22  ;;  %v6797_v13 = vpack.c.bf16 %v4627_v42, %v4626_v51  ;;  %v4612_v51 = vld [vmem:[%s12465_s3 + $0x880] sm:$0xff]  ;;  %v4614_v22 = vld [vmem:[%s12465_s3 + $0x890] sm:$0xff]  ;;  %v4615_v58 = vld [vmem:[%s12465_s3 + $0x898] sm:$0xff] }
 0x1e1   :  { %6788 = vmatpush3.bf16.msra.mxu0 %v6787_v41  ;;  %v1832_v24 = vmul.f32 %v1356_v0, %v1356_v0  ;;  %v4610_v41 = vld [vmem:[%s12465_s3 + $0x870] sm:$0xff]  ;;  %v4632_v42 = vld [vmem:[%s12465_s3 + $0x920] sm:$0xff] }
 0x1e2   :  { %6790 = vmatprep.subr.bf16.mxu0 %v6789_v53  ;;  %v4611_v53 = vld [vmem:[%s12465_s3 + $0x878] sm:$0xff]  ;;  %v4630_v0 = vld [vmem:[%s12465_s3 + $0x910] sm:$0xff] }
 0x1e3   :  { %2121 = vmatprep.mubr.f32.mxu0 %v1832_v24  ;;  %v6799_v62 = vpack.c.bf16 %v4611_v53, %v4610_v41  ;;  %v4616_v53 = vld [vmem:[%s12465_s3 + $0x8a0] sm:$0xff] }
 0x1e4   :  { %2122 = vmatmul.mubr.f32.gmra.mrb[30].mxu0 %v1831_v54  ;;  %v4631_v54 = vld [vmem:[%s12465_s3 + $0x918] sm:$0xff] }
 0x1e5   :  { %6792 = vmatpush3.bf16.msra.mxu0 %v6791_v45  ;;  %v6803_v45 = vpack.c.bf16 %v4613_v4, %v4612_v51  ;;  %v6805_v24 = vpack.c.bf16 %v4631_v54, %v4630_v0  ;;  %v12809_v51 = vsub.s32 3, %v10329_v2  ;;  %v4618_v54 = vld [vmem:[%s12465_s3 + $0x8b0] sm:$0xff] }
 0x1e6   :  { %6794 = vmatprep.subr.bf16.mxu0 %v6793_v38  ;;  %v6801_v38 = vpack.c.bf16 %v4629_v46, %v4628_v44  ;;  %v4617_v44 = vld [vmem:[%s12465_s3 + $0x8a8] sm:$0xff]  ;;  %v12810_v46 = vsub.s32 2, %v10329_v2 }
 0x1e7   :  { %v6811_v4 = vpack.c.bf16 %v4617_v44, %v4616_v53  ;;  %v4636_v44 = vld [vmem:[%s12465_s3 + $0x940] sm:$0xff] }
 0x1e9   :  { %6796 = vmatpush3.bf16.msra.mxu0 %v6795_v16  ;;  %v4633_v16 = vld [vmem:[%s12465_s3 + $0x928] sm:$0xff] }
 0x1ea   :  { %6798 = vmatprep.subr.bf16.mxu0 %v6797_v13  ;;  %v6807_v13 = vpack.c.bf16 %v4615_v58, %v4614_v22  ;;  %v6809_v41 = vpack.c.bf16 %v4633_v16, %v4632_v42  ;;  %v4684_v22 = vld [vmem:[%s12465_s3 + $0xac0] sm:$0xff]  ;;  %v4685_v58 = vld [vmem:[%s12465_s3 + $0xac8] sm:$0xff]  ;;  %v10458_v42 = vrot.slane %v10335_v50, %v12809_v51  ;;  %v4654_v51 = vld [vmem:[%s12465_s3 + $0x9d0] sm:$0xff] }
 0x1ed   :  { %6800 = vmatpush3.bf16.msra.mxu0 %v6799_v62  ;;  %v4634_v62 = vld [vmem:[%s12465_s3 + $0x930] sm:$0xff] }
 0x1ee   :  { %6802 = vmatprep.subr.bf16.mxu0 %v6801_v38  ;;  %v4635_v38 = vld [vmem:[%s12465_s3 + $0x938] sm:$0xff] }
 0x1ef   :  { %v6813_v0 = vpack.c.bf16 %v4635_v38, %v4634_v62  ;;  %v4637_v62 = vld [vmem:[%s12465_s3 + $0x948] sm:$0xff] }
 0x1f0   :  { %v6819_v36 = vpack.c.bf16 %v4637_v62, %v4636_v44  ;;  %v4641_v62 = vld [vmem:[%s12465_s3 + $0x968] sm:$0xff] }
 0x1f1   :  { %6804 = vmatpush3.bf16.msra.mxu0 %v6803_v45  ;;  %v4619_v45 = vld [vmem:[%s12465_s3 + $0x8b8] sm:$0xff] }
 0x1f2   :  { %6806 = vmatprep.subr.bf16.mxu0 %v6805_v24  ;;  %v10447_v24 = vrot.slane %v10335_v50, %v12810_v46  ;;  %v6815_v53 = vpack.c.bf16 %v4619_v45, %v4618_v54  ;;  %v6849_v54 = vpack.c.bf16 %v4685_v58, %v4684_v22  ;;  %v4656_v58 = vld [vmem:[%s12465_s3 + $0x9e0] sm:$0xff] }
 0x1f5   :  { %6808 = vmatpush3.bf16.msra.mxu0 %v6807_v13 }
 0x1f6   :  { %6810 = vmatprep.subr.bf16.mxu0 %v6809_v41 }
 0x1f8   :  { %v1424_v16 = vpop.f32.mrb[16].mxu0 }
 0x1f9   :  { %v1425_v13 = vadd.f32 %v1424_v16, %v10447_v24  ;;  %v1426_v41 = vpop.f32.mrb[17].mxu0  ;;  %6812 = vmatpush3.bf16.msra.mxu0 %v6811_v4  ;;  %v4655_v4 = vld [vmem:[%s12465_s3 + $0x9d8] sm:$0xff] }
 0x1fa   :  { %v1427_v38 = vadd.f32 %v1426_v41, %v10458_v42  ;;  %6814 = vmatprep.subr.bf16.mxu0 %v6813_v0  ;;  %v6821_v9 = vpack.c.bf16 %v4655_v4, %v4654_v51  ;;  %v4638_v0 = vld [vmem:[%s12465_s3 + $0x950] sm:$0xff]  ;;  %v4639_v41 = vld [vmem:[%s12465_s3 + $0x958] sm:$0xff] }
 0x1fb   :  { %v1820_v45 = vmul.f32 %v1425_v13, %v1425_v13  ;;  %v4642_v4 = vld [vmem:[%s12465_s3 + $0x970] sm:$0xff] }
 0x1fc   :  { %v1821_v16 = vmul.f32 %v1427_v38, %v1427_v38  ;;  %v1430_v46 = vpop.f32.mrb[18].mxu0  ;;  %v4658_v38 = vld [vmem:[%s12465_s3 + $0x9f0] sm:$0xff] }
 0x1fd   :  { %v1431_v56 = vadd.f32 %v1430_v46, %v10447_v24  ;;  %v1432_v1 = vpop.f32.mrb[19].mxu0  ;;  %6816 = vmatpush3.bf16.msra.mxu0 %v6815_v53  ;;  %v4657_v46 = vld [vmem:[%s12465_s3 + $0x9e8] sm:$0xff]  ;;  %v6823_v53 = vpack.c.bf16 %v4639_v41, %v4638_v0 }
 0x1fe   :  { %2191 = vmatprep.mubr.f32.mxu1 %v1821_v16  ;;  %v1433_v22 = vadd.f32 %v1432_v1, %v10458_v42  ;;  %6850 = vmatprep.subr.bf16.mxu0 %v6849_v54  ;;  %v6825_v44 = vpack.c.bf16 %v4657_v46, %v4656_v58  ;;  %v4640_v1 = vld [vmem:[%s12465_s3 + $0x960] sm:$0xff]  ;;  %v4643_v54 = vld [vmem:[%s12465_s3 + $0x978] sm:$0xff]  ;;  %v4661_v16 = vld [vmem:[%s12465_s3 + $0xa08] sm:$0xff] }
 0x1ff   :  { %2192 = vmatmul.mubr.f32.vlgmr.msra.gmra.mrb[28].mxu1 %v1820_v45  ;;  %v1833_v51 = vmul.f32 %v1431_v56, %v1431_v56  ;;  %v4659_v56 = vld [vmem:[%s12465_s3 + $0x9f8] sm:$0xff]  ;;  %v4660_v45 = vld [vmem:[%s12465_s3 + $0xa00] sm:$0xff]  ;;  %v6831_v0 = vpack.c.bf16 %v4643_v54, %v4642_v4  ;;  %v4645_v58 = vld [vmem:[%s12465_s3 + $0x988] sm:$0xff] }
 0x200   :  { %v1834_v13 = vmul.f32 %v1433_v22, %v1433_v22  ;;  %6820 = vmatpush3.bf16.msra.mxu1 %v6819_v36  ;;  %v6829_v36 = vpack.c.bf16 %v4659_v56, %v4658_v38  ;;  %v6833_v41 = vpack.c.bf16 %v4661_v16, %v4660_v45  ;;  %v4644_v22 = vld [vmem:[%s12465_s3 + $0x980] sm:$0xff]  ;;  %v4662_v46 = vld [vmem:[%s12465_s3 + $0xa10] sm:$0xff]  ;;  %v4665_v38 = vld [vmem:[%s12465_s3 + $0xa28] sm:$0xff]  ;;  %v12811_v16 = vsub.s32 4, %v10329_v2 }
 0x201   :  { %6822 = vmatprep.subr.bf16.mxu1 %v6821_v9  ;;  %v6827_v9 = vpack.c.bf16 %v4641_v62, %v4640_v1  ;;  %v4647_v1 = vld [vmem:[%s12465_s3 + $0x998] sm:$0xff]  ;;  %v4664_v62 = vld [vmem:[%s12465_s3 + $0xa20] sm:$0xff]  ;;  %v4649_v4 = vld [vmem:[%s12465_s3 + $0x9a8] sm:$0xff] }
 0x202   :  { %2196 = vmatprep.mubr.f32.mxu1 %v1834_v13  ;;  %v6835_v13 = vpack.c.bf16 %v4645_v58, %v4644_v22  ;;  %v4666_v54 = vld [vmem:[%s12465_s3 + $0xa30] sm:$0xff]  ;;  %v4667_v45 = vld [vmem:[%s12465_s3 + $0xa38] sm:$0xff] }
 0x203   :  { %2197 = vmatmul.mubr.f32.gmra.mrb[30].mxu1 %v1833_v51  ;;  %v4663_v51 = vld [vmem:[%s12465_s3 + $0xa18] sm:$0xff]  ;;  %v6845_v22 = vpack.c.bf16 %v4667_v45, %v4666_v54  ;;  %v4650_v58 = vld [vmem:[%s12465_s3 + $0x9b0] sm:$0xff] }
 0x204   :  { %6824 = vmatpush3.bf16.msra.mxu1 %v6823_v53  ;;  %v6837_v53 = vpack.c.bf16 %v4663_v51, %v4662_v46  ;;  %v4651_v46 = vld [vmem:[%s12465_s3 + $0x9b8] sm:$0xff]  ;;  %v4716_v51 = vld [vmem:[%s12465_s3 + $0xbc0] sm:$0xff]  ;;  %v4686_v45 = vld [vmem:[%s12465_s3 + $0xad0] sm:$0xff] }
 0x205   :  { %6826 = vmatprep.subr.bf16.mxu1 %v6825_v44  ;;  %v4646_v44 = vld [vmem:[%s12465_s3 + $0x990] sm:$0xff] }
 0x206   :  { %v6839_v56 = vpack.c.bf16 %v4647_v1, %v4646_v44  ;;  %v6847_v44 = vpack.c.bf16 %v4651_v46, %v4650_v58 }
 0x208   :  { %6828 = vmatpush3.bf16.msra.mxu1 %v6827_v9  ;;  %v6841_v9 = vpack.c.bf16 %v4665_v38, %v4664_v62 }
 0x209   :  { %6830 = vmatprep.subr.bf16.mxu1 %v6829_v36  ;;  %v4648_v36 = vld [vmem:[%s12465_s3 + $0x9a0] sm:$0xff] }
 0x20c   :  { %6832 = vmatpush3.bf16.msra.mxu1 %v6831_v0  ;;  %v6843_v0 = vpack.c.bf16 %v4649_v4, %v4648_v36  ;;  %v4668_v36 = vld [vmem:[%s12465_s3 + $0xa40] sm:$0xff]  ;;  %v4669_v4 = vld [vmem:[%s12465_s3 + $0xa48] sm:$0xff] }
 0x20d   :  { %6834 = vmatprep.subr.bf16.mxu1 %v6833_v41  ;;  %v470_v41 = vsub.s32 5, %v10329_v2  ;;  %v6851_v46 = vpack.c.bf16 %v4669_v4, %v4668_v36 }
 0x20f   :  { %v10568_v1 = vrot.slane %v10335_v50, %v470_v41 }
 0x210   :  { %6836 = vmatpush3.bf16.msra.mxu1 %v6835_v13  ;;  %v4717_v13 = vld [vmem:[%s12465_s3 + $0xbc8] sm:$0xff] }
 0x211   :  { %6838 = vmatprep.subr.bf16.mxu1 %v6837_v53  ;;  %v10565_v53 = vrot.slane %v10335_v50, %v12811_v16  ;;  %v6881_v38 = vpack.c.bf16 %v4717_v13, %v4716_v51  ;;  %v4671_v16 = vld [vmem:[%s12465_s3 + $0xa58] sm:$0xff] }
 0x214   :  { %6840 = vmatpush3.bf16.msra.mxu1 %v6839_v56 }
 0x215   :  { %6842 = vmatprep.subr.bf16.mxu1 %v6841_v9 }
 0x218   :  { %6844 = vmatpush3.bf16.msra.mxu1 %v6843_v0  ;;  %v4687_v0 = vld [vmem:[%s12465_s3 + $0xad8] sm:$0xff] }
 0x219   :  { %v1501_v62 = vpop.f32.mrb[16].mxu1  ;;  %6846 = vmatprep.subr.bf16.mxu1 %v6845_v22 }
 0x21a   :  { %v1502_v56 = vadd.f32 %v1501_v62, %v10565_v53  ;;  %v1503_v9 = vpop.f32.mrb[17].mxu1  ;;  %v6853_v62 = vpack.c.bf16 %v4687_v0, %v4686_v45  ;;  %v4672_v45 = vld [vmem:[%s12465_s3 + $0xa60] sm:$0xff]  ;;  %v4673_v0 = vld [vmem:[%s12465_s3 + $0xa68] sm:$0xff] }
 0x21b   :  { %v1504_v54 = vadd.f32 %v1503_v9, %v10568_v1  ;;  %v4670_v9 = vld [vmem:[%s12465_s3 + $0xa50] sm:$0xff] }
 0x21c   :  { %v1822_v41 = vmul.f32 %v1502_v56, %v1502_v56  ;;  %6848 = vmatpush3.bf16.msra.mxu1 %v6847_v44  ;;  %v4688_v44 = vld [vmem:[%s12465_s3 + $0xae0] sm:$0xff]  ;;  %v6855_v4 = vpack.c.bf16 %v4671_v16, %v4670_v9  ;;  %v6859_v16 = vpack.c.bf16 %v4673_v0, %v4672_v45  ;;  %v4678_v45 = vld [vmem:[%s12465_s3 + $0xa90] sm:$0xff]  ;;  %v4679_v0 = vld [vmem:[%s12465_s3 + $0xa98] sm:$0xff] }
 0x21d   :  { %v1823_v22 = vmul.f32 %v1504_v54, %v1504_v54  ;;  %v1507_v58 = vpop.f32.mrb[18].mxu1  ;;  %6882 = vmatprep.subr.bf16.mxu1 %v6881_v38  ;;  %v4689_v38 = vld [vmem:[%s12465_s3 + $0xae8] sm:$0xff] }
 0x21e   :  { %v1508_v51 = vadd.f32 %v1507_v58, %v10565_v53  ;;  %v1509_v13 = vpop.f32.mrb[19].mxu1  ;;  %v6857_v54 = vpack.c.bf16 %v4689_v38, %v4688_v44  ;;  %v4674_v58 = vld [vmem:[%s12465_s3 + $0xa70] sm:$0xff]  ;;  %v4676_v44 = vld [vmem:[%s12465_s3 + $0xa80] sm:$0xff]  ;;  %v4677_v38 = vld [vmem:[%s12465_s3 + $0xa88] sm:$0xff] }
 0x21f   :  { %v1510_v57 = vadd.f32 %v1509_v13, %v10568_v1  ;;  %2266 = vmatprep.mubr.f32.mxu0 %v1823_v22  ;;  %v4690_v22 = vld [vmem:[%s12465_s3 + $0xaf0] sm:$0xff]  ;;  %v4693_v13 = vld [vmem:[%s12465_s3 + $0xb08] sm:$0xff] }
 0x220   :  { %v1835_v56 = vmul.f32 %v1508_v51, %v1508_v51  ;;  %2267 = vmatmul.mubr.f32.vlgmr.msra.gmra.mrb[32].mxu0 %v1822_v41  ;;  %v4692_v51 = vld [vmem:[%s12465_s3 + $0xb00] sm:$0xff] }
 0x221   :  { %v1836_v36 = vmul.f32 %v1510_v57, %v1510_v57  ;;  %6852 = vmatpush3.bf16.msra.mxu0 %v6851_v46  ;;  %v4691_v57 = vld [vmem:[%s12465_s3 + $0xaf8] sm:$0xff]  ;;  %v6865_v9 = vpack.c.bf16 %v4693_v13, %v4692_v51  ;;  %v474_v51 = vsub.s32 6, %v10329_v2  ;;  %v4698_v13 = vld [vmem:[%s12465_s3 + $0xb30] sm:$0xff] }
 0x222   :  { %6854 = vmatprep.subr.bf16.mxu0 %v6853_v62  ;;  %v6861_v41 = vpack.c.bf16 %v4691_v57, %v4690_v22  ;;  %v4675_v46 = vld [vmem:[%s12465_s3 + $0xa78] sm:$0xff]  ;;  %v4696_v22 = vld [vmem:[%s12465_s3 + $0xb20] sm:$0xff]  ;;  %v4697_v57 = vld [vmem:[%s12465_s3 + $0xb28] sm:$0xff] }
 0x223   :  { %2271 = vmatprep.mubr.f32.mxu0 %v1836_v36  ;;  %v6863_v62 = vpack.c.bf16 %v4675_v46, %v4674_v58  ;;  %v4695_v36 = vld [vmem:[%s12465_s3 + $0xb18] sm:$0xff]  ;;  %v4680_v58 = vld [vmem:[%s12465_s3 + $0xaa0] sm:$0xff]  ;;  %v4681_v46 = vld [vmem:[%s12465_s3 + $0xaa8] sm:$0xff] }
 0x224   :  { %2272 = vmatmul.mubr.f32.gmra.mrb[34].mxu0 %v1835_v56  ;;  %v4694_v56 = vld [vmem:[%s12465_s3 + $0xb10] sm:$0xff] }
 0x225   :  { %6856 = vmatpush3.bf16.msra.mxu0 %v6855_v4  ;;  %v6867_v4 = vpack.c.bf16 %v4677_v38, %v4676_v44  ;;  %v6875_v44 = vpack.c.bf16 %v4681_v46, %v4680_v58  ;;  %v4700_v58 = vld [vmem:[%s12465_s3 + $0xb40] sm:$0xff]  ;;  %v4701_v46 = vld [vmem:[%s12465_s3 + $0xb48] sm:$0xff] }
 0x226   :  { %6858 = vmatprep.subr.bf16.mxu0 %v6857_v54  ;;  %v6869_v54 = vpack.c.bf16 %v4695_v36, %v4694_v56  ;;  %v4682_v56 = vld [vmem:[%s12465_s3 + $0xab0] sm:$0xff]  ;;  %v4683_v36 = vld [vmem:[%s12465_s3 + $0xab8] sm:$0xff] }
 0x229   :  { %6860 = vmatpush3.bf16.msra.mxu0 %v6859_v16  ;;  %v6871_v16 = vpack.c.bf16 %v4679_v0, %v4678_v45  ;;  %v4733_v45 = vld [vmem:[%s12465_s3 + $0xc48] sm:$0xff] }
 0x22a   :  { %6862 = vmatprep.subr.bf16.mxu0 %v6861_v41  ;;  %v6873_v41 = vpack.c.bf16 %v4697_v57, %v4696_v22 }
 0x22d   :  { %6864 = vmatpush3.bf16.msra.mxu0 %v6863_v62  ;;  %v4699_v62 = vld [vmem:[%s12465_s3 + $0xb38] sm:$0xff] }
 0x22e   :  { %6866 = vmatprep.subr.bf16.mxu0 %v6865_v9  ;;  %v478_v9 = vsub.s32 7, %v10329_v2  ;;  %v6877_v38 = vpack.c.bf16 %v4699_v62, %v4698_v13  ;;  %v4719_v13 = vld [vmem:[%s12465_s3 + $0xbd8] sm:$0xff] }
 0x230   :  { %v10676_v0 = vrot.slane %v10335_v50, %v478_v9 }
 0x231   :  { %6868 = vmatpush3.bf16.msra.mxu0 %v6867_v4  ;;  %v10667_v4 = vrot.slane %v10335_v50, %v474_v51  ;;  %v4718_v50 = vld [vmem:[%s12465_s3 + $0xbd0] sm:$0xff] }
 0x232   :  { %6870 = vmatprep.subr.bf16.mxu0 %v6869_v54  ;;  %v4732_v54 = vld [vmem:[%s12465_s3 + $0xc40] sm:$0xff] }
 0x233   :  { %v10692_v62 = vpack.c.bf16 %v4733_v45, %v4732_v54  ;;  %v4720_v45 = vld [vmem:[%s12465_s3 + $0xbe0] sm:$0xff] }
 0x235   :  { %6872 = vmatpush3.bf16.msra.mxu0 %v6871_v16 }
 0x236   :  { %6874 = vmatprep.subr.bf16.mxu0 %v6873_v41  ;;  %v6879_v41 = vpack.c.bf16 %v4683_v36, %v4682_v56  ;;  %v6883_v36 = vpack.c.bf16 %v4701_v46, %v4700_v58 }
 0x238   :  { %v1578_v22 = vpop.f32.mrb[20].mxu0 }
 0x239   :  { %v1579_v57 = vadd.f32 %v1578_v22, %v10667_v4  ;;  %v1580_v16 = vpop.f32.mrb[21].mxu0  ;;  %6876 = vmatpush3.bf16.msra.mxu0 %v6875_v44 }
 0x23a   :  { %v1581_v51 = vadd.f32 %v1580_v16, %v10676_v0  ;;  %6878 = vmatprep.subr.bf16.mxu0 %v6877_v38  ;;  %v6885_v16 = vpack.c.bf16 %v4719_v13, %v4718_v50  ;;  %v4702_v38 = vld [vmem:[%s12465_s3 + $0xb50] sm:$0xff]  ;;  %v4705_v50 = vld [vmem:[%s12465_s3 + $0xb68] sm:$0xff] }
 0x23b   :  { %v1824_v9 = vmul.f32 %v1579_v57, %v1579_v57  ;;  %v4721_v57 = vld [vmem:[%s12465_s3 + $0xbe8] sm:$0xff]  ;;  %v6887_v46 = vpack.c.bf16 %v4703_v48, %v4702_v38  ;;  %v4722_v13 = vld [vmem:[%s12465_s3 + $0xbf0] sm:$0xff] }
 0x23c   :  { %v1825_v44 = vmul.f32 %v1581_v51, %v1581_v51  ;;  %v1584_v56 = vpop.f32.mrb[22].mxu0  ;;  %v6889_v51 = vpack.c.bf16 %v4721_v57, %v4720_v45  ;;  %v4708_v45 = vld [vmem:[%s12465_s3 + $0xb80] sm:$0xff]  ;;  %v4709_v57 = vld [vmem:[%s12465_s3 + $0xb88] sm:$0xff] }
 0x23d   :  { %v1585_v22 = vadd.f32 %v1584_v56, %v10667_v4  ;;  %v1586_v19 = vpop.f32.mrb[23].mxu0  ;;  %6880 = vmatpush3.bf16.msra.mxu0 %v6879_v41  ;;  %v4706_v56 = vld [vmem:[%s12465_s3 + $0xb70] sm:$0xff] }
 0x23e   :  { %v1587_v54 = vadd.f32 %v1586_v19, %v10676_v0  ;;  %2341 = vmatprep.mubr.f32.mxu1 %v1825_v44  ;;  %6914 = vmatprep.subr.bf16.mxu0 %v10692_v62  ;;  %v4704_v19 = vld [vmem:[%s12465_s3 + $0xb60] sm:$0xff] }
 0x23f   :  { %v1837_v41 = vmul.f32 %v1585_v22, %v1585_v22  ;;  %2342 = vmatmul.mubr.f32.vlgmr.msra.gmra.mrb[32].mxu1 %v1824_v9  ;;  %v4723_v9 = vld [vmem:[%s12465_s3 + $0xbf8] sm:$0xff]  ;;  %v6891_v48 = vpack.c.bf16 %v4705_v50, %v4704_v19  ;;  %v4724_v22 = vld [vmem:[%s12465_s3 + $0xc00] sm:$0xff]  ;;  %v4710_v19 = vld [vmem:[%s12465_s3 + $0xb90] sm:$0xff] }
 0x240   :  { %v1838_v58 = vmul.f32 %v1587_v54, %v1587_v54  ;;  %6884 = vmatpush3.bf16.msra.mxu1 %v6883_v36  ;;  %v6893_v44 = vpack.c.bf16 %v4723_v9, %v4722_v13  ;;  %v4707_v36 = vld [vmem:[%s12465_s3 + $0xb78] sm:$0xff]  ;;  %v4728_v13 = vld [vmem:[%s12465_s3 + $0xc20] sm:$0xff]  ;;  %v4729_v9 = vld [vmem:[%s12465_s3 + $0xc28] sm:$0xff] }
 0x241   :  { %6886 = vmatprep.subr.bf16.mxu1 %v6885_v16  ;;  %v4725_v16 = vld [vmem:[%s12465_s3 + $0xc08] sm:$0xff]  ;;  %v6895_v38 = vpack.c.bf16 %v4707_v36, %v4706_v56  ;;  %v4711_v50 = vld [vmem:[%s12465_s3 + $0xb98] sm:$0xff]  ;;  %v4712_v56 = vld [vmem:[%s12465_s3 + $0xba0] sm:$0xff] }
 0x242   :  { %2346 = vmatprep.mubr.f32.mxu1 %v1838_v58  ;;  %v6897_v54 = vpack.c.bf16 %v4725_v16, %v4724_v22  ;;  %v4727_v58 = vld [vmem:[%s12465_s3 + $0xc18] sm:$0xff]  ;;  %v4713_v36 = vld [vmem:[%s12465_s3 + $0xba8] sm:$0xff]  ;;  %v4730_v22 = vld [vmem:[%s12465_s3 + $0xc30] sm:$0xff] }
 0x243   :  { %2347 = vmatmul.mubr.f32.gmra.mrb[34].mxu1 %v1837_v41  ;;  %v4726_v41 = vld [vmem:[%s12465_s3 + $0xc10] sm:$0xff]  ;;  %v4731_v16 = vld [vmem:[%s12465_s3 + $0xc38] sm:$0xff] }
 0x244   :  { %6888 = vmatpush3.bf16.msra.mxu1 %v6887_v46  ;;  %v6899_v46 = vpack.c.bf16 %v4709_v57, %v4708_v45  ;;  %v6909_v45 = vpack.c.bf16 %v4731_v16, %v4730_v22  ;;  %v4714_v57 = vld [vmem:[%s12465_s3 + $0xbb0] sm:$0xff] }
 0x245   :  { %6890 = vmatprep.subr.bf16.mxu1 %v6889_v51  ;;  %v6901_v51 = vpack.c.bf16 %v4727_v58, %v4726_v41  ;;  %v4715_v41 = vld [vmem:[%s12465_s3 + $0xbb8] sm:$0xff]  ;;  %v1092_v58 = vld [vmem:[%s12465_s3 + $0x80] sm:$0xff]  ;;  %v4734_v16 = vld [vmem:[%s12465_s3 + $0xc50] sm:$0xff] }
 0x248   :  { %6892 = vmatpush3.bf16.msra.mxu1 %v6891_v48  ;;  %v6903_v48 = vpack.c.bf16 %v4711_v50, %v4710_v19  ;;  %v6911_v50 = vpack.c.bf16 %v4715_v41, %v4714_v57 }
 0x249   :  { %6894 = vmatprep.subr.bf16.mxu1 %v6893_v44  ;;  %v6905_v44 = vpack.c.bf16 %v4729_v9, %v4728_v13  ;;  %v13167_v13 = vsub.s32 1, %v10329_v2 }
 0x24c   :  { %6896 = vmatpush3.bf16.msra.mxu1 %v6895_v38  ;;  %v6907_v38 = vpack.c.bf16 %v4713_v36, %v4712_v56 }
 0x24d   :  { %6898 = vmatprep.subr.bf16.mxu1 %v6897_v54  ;;  %v10772_v54 = vld [vmem:[%s12464_s2 + $0x8] sm:$0x1f] }
 0x24e   :  { %v10794_v9 = vrot.slane %v10772_v54, %v13167_v13 }
 0x250   :  { %6900 = vmatpush3.bf16.msra.mxu1 %v6899_v46  ;;  %v1093_v46 = vld [vmem:[%s12465_s3 + $0x88] sm:$0xff] }
 0x251   :  { %6902 = vmatprep.subr.bf16.mxu1 %v6901_v51  ;;  %v13166_v51 = vsub.s32 0, %v10329_v2 }
 0x253   :  { %v10789_v19 = vrot.slane %v10772_v54, %v13166_v51 }
 0x254   :  { %6904 = vmatpush3.bf16.msra.mxu1 %v6903_v48 }
 0x255   :  { %6906 = vmatprep.subr.bf16.mxu1 %v6905_v44  ;;  %v6929_v44 = vpack.c.bf16 %v1093_v46, %v1092_v58 }
 0x258   :  { %6908 = vmatpush3.bf16.msra.mxu1 %v6907_v38  ;;  %v4735_v38 = vld [vmem:[%s12465_s3 + $0xc58] sm:$0xff] }
 0x259   :  { %v1655_v48 = vpop.f32.mrb[20].mxu1  ;;  %6910 = vmatprep.subr.bf16.mxu1 %v6909_v45  ;;  %v6917_v46 = vpack.c.bf16 %v4735_v38, %v4734_v16  ;;  %v4739_v16 = vld [vmem:[%s12465_s3 + $0xc78] sm:$0xff] }
 0x25a   :  { %v1656_v56 = vadd.f32 %v1655_v48, %v10789_v19  ;;  %v1657_v36 = vpop.f32.mrb[21].mxu1  ;;  %v4736_v48 = vld [vmem:[%s12465_s3 + $0xc60] sm:$0xff] }
 0x25b   :  { %v1658_v22 = vadd.f32 %v1657_v36, %v10794_v9  ;;  %v4737_v36 = vld [vmem:[%s12465_s3 + $0xc68] sm:$0xff] }
 0x25c   :  { %v1826_v57 = vmul.f32 %v1656_v56, %v1656_v56  ;;  %6912 = vmatpush3.bf16.msra.mxu1 %v6911_v50 }
 0x25d   :  { %v1827_v41 = vmul.f32 %v1658_v22, %v1658_v22  ;;  %v1661_v51 = vpop.f32.mrb[22].mxu1  ;;  %6930 = vmatprep.subr.bf16.mxu1 %v6929_v44  ;;  %v6921_v44 = vpack.c.bf16 %v4737_v36, %v4736_v48  ;;  %v4738_v22 = vld [vmem:[%s12465_s3 + $0xc70] sm:$0xff] }
 0x25e   :  { %v1662_v45 = vadd.f32 %v1661_v51, %v10789_v19  ;;  %v1663_v58 = vpop.f32.mrb[23].mxu1  ;;  %v6925_v38 = vpack.c.bf16 %v4739_v16, %v4738_v22  ;;  %v13168_v51 = vsub.s32 2, %v10329_v2 }
 0x25f   :  { %v1664_v13 = vadd.f32 %v1663_v58, %v10794_v9  ;;  %2416 = vmatprep.mubr.f32.mxu0 %v1827_v41  ;;  %v13169_v58 = vsub.s32 3, %v10329_v2 }
 0x260   :  { %v1839_v56 = vmul.f32 %v1662_v45, %v1662_v45  ;;  %2417 = vmatmul.mubr.f32.vlgmr.msra.gmra.mrb[36].mxu0 %v1826_v57  ;;  %v1124_v57 = vld [vmem:[%s12465_s3 + $0x180] sm:$0xff]  ;;  %v10828_v45 = vrot.slane %v10772_v54, %v13168_v51 }
 0x261   :  { %v1840_v50 = vmul.f32 %v1664_v13, %v1664_v13  ;;  %6916 = vmatpush3.bf16.msra.mxu0 %v10692_v62  ;;  %v1125_v62 = vld [vmem:[%s12465_s3 + $0x188] sm:$0xff] }
 0x262   :  { %6918 = vmatprep.subr.bf16.mxu0 %v6917_v46  ;;  %v6961_v41 = vpack.c.bf16 %v1125_v62, %v1124_v57  ;;  %v1095_v57 = vld [vmem:[%s12465_s3 + $0x98] sm:$0xff]  ;;  %v13170_v62 = vsub.s32 4, %v10329_v2 }
 0x263   :  { %2421 = vmatprep.mubr.f32.mxu0 %v1840_v50  ;;  %v1076_v50 = vld [vmem:[%s12465_s3] sm:$0xff]  ;;  %v1079_v2 = vld [vmem:[%s12465_s3 + $0x18] sm:$0xff] }
 0x264   :  { %2422 = vmatmul.mubr.f32.gmra.mrb[38].mxu0 %v1839_v56 }
 0x265   :  { %6920 = vmatpush3.bf16.msra.mxu0 %v6917_v46  ;;  %v10833_v46 = vrot.slane %v10772_v54, %v13169_v58 }
 0x266   :  { %6922 = vmatprep.subr.bf16.mxu0 %v6921_v44 }
 0x269   :  { %6924 = vmatpush3.bf16.msra.mxu0 %v6921_v44  ;;  %v1077_v44 = vld [vmem:[%s12465_s3 + $0x8] sm:$0xff] }
 0x26a   :  { %6926 = vmatprep.subr.bf16.mxu0 %v6925_v38  ;;  %v6931_v30 = vpack.c.bf16 %v1077_v44, %v1076_v50  ;;  %v1096_v50 = vld [vmem:[%s12465_s3 + $0xa0] sm:$0xff]  ;;  %v1097_v44 = vld [vmem:[%s12465_s3 + $0xa8] sm:$0xff] }
 0x26d   :  { %6928 = vmatpush3.bf16.msra.mxu0 %v6925_v38  ;;  %v1094_v38 = vld [vmem:[%s12465_s3 + $0x90] sm:$0xff] }
 0x26e   :  { %6962 = vmatprep.subr.bf16.mxu0 %v6961_v41  ;;  %v10852_v41 = vrot.slane %v10772_v54, %v13170_v62  ;;  %v6933_v12 = vpack.c.bf16 %v1095_v57, %v1094_v38  ;;  %v582_v54 = vadd.f32 %v9915_v33, %v10346_v43  ;;  %v1108_v33 = vld [vmem:[%s12465_s3 + $0x100] sm:$0xff]  ;;  %v659_v57 = vadd.f32 %v9920_v37, %v10458_v42 }
 0x26f   :  { %v1080_v37 = vld [vmem:[%s12465_s3 + $0x20] sm:$0xff] }
 0x278   :  { %v1732_v13 = vpop.f32.mrb[24].mxu0 }
 0x279   :  { %v1733_v48 = vadd.f32 %v1732_v13, %v10828_v45  ;;  %v1734_v36 = vpop.f32.mrb[25].mxu0  ;;  %v5021_v56 = vpop.f32.mrb[24].mxu1 }
 0x27a   :  { %v1735_v22 = vadd.f32 %v1734_v36, %v10833_v46  ;;  %v5022_v16 = vpop.f32.mrb[25].mxu1 }
 0x27b   :  { %v5023_v51 = vadd.f32 %v5022_v16, %v5021_v56  ;;  %v1828_v25 = vmul.f32 %v1733_v48, %v1733_v48 }
 0x27c   :  { %v1829_v58 = vmul.f32 %v1735_v22, %v1735_v22  ;;  %v1738_v13 = vpop.f32.mrb[26].mxu0 }
 0x27d   :  { %v1810_v36 = vadd.f32 %v5023_v51, %v10852_v41  ;;  %v1739_v35 = vadd.f32 %v1738_v13, %v10828_v45  ;;  %v5024_v32 = vpop.f32.mrb[26].mxu1  ;;  %v1740_v17 = vpop.f32.mrb[27].mxu0  ;;  %v6935_v51 = vpack.c.bf16 %v1079_v2, %v1078_v18  ;;  %v1051_v18 = vmul.f32 %v582_v54, %v582_v54  ;;  %v1111_v54 = vld [vmem:[%s12465_s3 + $0x118] sm:$0xff] }
 0x27e   :  { %v1741_v48 = vadd.f32 %v1740_v17, %v10833_v46  ;;  %v5025_v56 = vpop.f32.mrb[27].mxu1  ;;  %2491 = vmatprep.mubr.f32.mxu1 %v1829_v58  ;;  %v1109_v17 = vld [vmem:[%s12465_s3 + $0x108] sm:$0xff]  ;;  %v6937_v58 = vpack.c.bf16 %v1097_v44, %v1096_v50  ;;  %v1053_v50 = vmul.f32 %v659_v57, %v659_v57 }
 0x27f   :  { %v1830_v22 = vmul.f32 %v1810_v36, %v1810_v36  ;;  %v1841_v16 = vmul.f32 %v1739_v35, %v1739_v35  ;;  %v5026_v38 = vadd.f32 %v5025_v56, %v5024_v32  ;;  %2492 = vmatmul.mubr.f32.vlgmr.msra.gmra.mrb[36].mxu1 %v1828_v25  ;;  %v1126_v35 = vld [vmem:[%s12465_s3 + $0x190] sm:$0xff]  ;;  %v1127_v25 = vld [vmem:[%s12465_s3 + $0x198] sm:$0xff]  ;;  %v6963_v13 = vpack.c.bf16 %v1109_v17, %v1108_v33 }
 0x280   :  { %v1842_v62 = vmul.f32 %v1741_v48, %v1741_v48  ;;  %6932 = vmatpush3.bf16.msra.mxu1 %v6931_v30  ;;  %v1081_v30 = vld [vmem:[%s12465_s3 + $0x28] sm:$0xff]  ;;  %v1098_v36 = vld [vmem:[%s12465_s3 + $0xb0] sm:$0xff]  ;;  %v6965_v48 = vpack.c.bf16 %v1127_v25, %v1126_v35  ;;  %v1083_v17 = vld [vmem:[%s12465_s3 + $0x38] sm:$0xff] }
 0x281   :  { %v1815_v32 = vadd.f32 %v5026_v38, %v10852_v41  ;;  %6934 = vmatprep.subr.bf16.mxu1 %v6933_v12  ;;  %5813 = vmatprep.mubr.msk.f32.mxu0 %vm2045_vm0, %v1830_v22  ;;  %v1099_v12 = vld [vmem:[%s12465_s3 + $0xb8] sm:$0xff]  ;;  %v1110_v56 = vld [vmem:[%s12465_s3 + $0x110] sm:$0xff]  ;;  %v6939_v44 = vpack.c.bf16 %v1081_v30, %v1080_v37  ;;  %v1128_v22 = vld [vmem:[%s12465_s3 + $0x1a0] sm:$0xff] }
 0x282   :  { %2496 = vmatprep.mubr.f32.mxu1 %v1842_v62  ;;  %v6941_v38 = vpack.c.bf16 %v1099_v12, %v1098_v36  ;;  %v1082_v33 = vld [vmem:[%s12465_s3 + $0x30] sm:$0xff]  ;;  %v6967_v57 = vpack.c.bf16 %v1111_v54, %v1110_v56  ;;  %v1100_v62 = vld [vmem:[%s12465_s3 + $0xc0] sm:$0xff]  ;;  %v1131_v30 = vld [vmem:[%s12465_s3 + $0x1b8] sm:$0xff] }
 0x283   :  { %v1843_v2 = vmul.f32 %v1815_v32, %v1815_v32  ;;  %2497 = vmatmul.mubr.f32.gmra.mrb[38].mxu1 %v1841_v16  ;;  %v1129_v16 = vld [vmem:[%s12465_s3 + $0x1a8] sm:$0xff]  ;;  %v1112_v25 = vld [vmem:[%s12465_s3 + $0x120] sm:$0xff]  ;;  %v1130_v37 = vld [vmem:[%s12465_s3 + $0x1b0] sm:$0xff] }
 0x284   :  { %6936 = vmatpush3.bf16.msra.mxu1 %v6935_v51  ;;  %2647 = vmatprep.mubr.f32.mxu1 %v1051_v18  ;;  %v1101_v51 = vld [vmem:[%s12465_s3 + $0xc8] sm:$0xff]  ;;  %v6969_v35 = vpack.c.bf16 %v1129_v16, %v1128_v22  ;;  %v6973_v56 = vpack.c.bf16 %v1131_v30, %v1130_v37  ;;  %v1114_v54 = vld [vmem:[%s12465_s3 + $0x130] sm:$0xff]  ;;  %v1132_v22 = vld [vmem:[%s12465_s3 + $0x1c0] sm:$0xff] }
 0x285   :  { %5814 = vmatmul.mubr.msk.f32.vlgmr.msra.gmra.mrb[40].mxu0 %vm2045_vm0, %v1843_v2  ;;  %6938 = vmatprep.subr.bf16.mxu1 %v6937_v58  ;;  %v1113_v32 = vld [vmem:[%s12465_s3 + $0x128] sm:$0xff]  ;;  %v6943_v58 = vpack.c.bf16 %v1083_v17, %v1082_v33  ;;  %v6945_v18 = vpack.c.bf16 %v1101_v51, %v1100_v62  ;;  %v1102_v2 = vld [vmem:[%s12465_s3 + $0xd0] sm:$0xff]  ;;  %v1087_v17 = vld [vmem:[%s12465_s3 + $0x58] sm:$0xff] }
 0x286   :  { %6964 = vmatpush3.bf16.msra.mxu0 %v6963_v13  ;;  %2722 = vmatprep.mubr.f32.mxu0 %v1053_v50  ;;  %v1084_v13 = vld [vmem:[%s12465_s3 + $0x40] sm:$0xff]  ;;  %v1085_v36 = vld [vmem:[%s12465_s3 + $0x48] sm:$0xff]  ;;  %v6971_v12 = vpack.c.bf16 %v1113_v32, %v1112_v25  ;;  %v1115_v50 = vld [vmem:[%s12465_s3 + $0x138] sm:$0xff] }
 0x287   :  { %6966 = vmatprep.subr.bf16.mxu0 %v6965_v48  ;;  %v1103_v48 = vld [vmem:[%s12465_s3 + $0xd8] sm:$0xff]  ;;  %v1133_v16 = vld [vmem:[%s12465_s3 + $0x1c8] sm:$0xff]  ;;  %v1086_v33 = vld [vmem:[%s12465_s3 + $0x50] sm:$0xff] }
 0x288   :  { %6940 = vmatpush3.bf16.msra.mxu1 %v6939_v44  ;;  %v6947_v44 = vpack.c.bf16 %v1085_v36, %v1084_v13  ;;  %v1104_v62 = vld [vmem:[%s12465_s3 + $0xe0] sm:$0xff]  ;;  %v1105_v51 = vld [vmem:[%s12465_s3 + $0xe8] sm:$0xff]  ;;  %v1134_v37 = vld [vmem:[%s12465_s3 + $0x1d0] sm:$0xff] }
 0x289   :  { %6942 = vmatprep.subr.bf16.mxu1 %v6941_v38  ;;  %v6949_v38 = vpack.c.bf16 %v1103_v48, %v1102_v2  ;;  %v1116_v25 = vld [vmem:[%s12465_s3 + $0x140] sm:$0xff]  ;;  %v1117_v32 = vld [vmem:[%s12465_s3 + $0x148] sm:$0xff]  ;;  %v1135_v30 = vld [vmem:[%s12465_s3 + $0x1d8] sm:$0xff] }
 0x28a   :  { %6968 = vmatpush3.bf16.msra.mxu0 %v6967_v57  ;;  %v6975_v57 = vpack.c.bf16 %v1115_v50, %v1114_v54  ;;  %v1088_v13 = vld [vmem:[%s12465_s3 + $0x60] sm:$0xff]  ;;  %v1089_v36 = vld [vmem:[%s12465_s3 + $0x68] sm:$0xff]  ;;  %v1106_v2 = vld [vmem:[%s12465_s3 + $0xf0] sm:$0xff] }
 0x28b   :  { %6970 = vmatprep.subr.bf16.mxu0 %v6969_v35  ;;  %v6977_v35 = vpack.c.bf16 %v1133_v16, %v1132_v22  ;;  %v1107_v48 = vld [vmem:[%s12465_s3 + $0xf8] sm:$0xff]  ;;  %v1118_v54 = vld [vmem:[%s12465_s3 + $0x150] sm:$0xff]  ;;  %v1136_v22 = vld [vmem:[%s12465_s3 + $0x1e0] sm:$0xff] }
 0x28c   :  { %6944 = vmatpush3.bf16.msra.mxu1 %v6943_v58  ;;  %v6951_v58 = vpack.c.bf16 %v1087_v17, %v1086_v33  ;;  %v1119_v50 = vld [vmem:[%s12465_s3 + $0x158] sm:$0xff]  ;;  %v1137_v16 = vld [vmem:[%s12465_s3 + $0x1e8] sm:$0xff]  ;;  %v1090_v33 = vld [vmem:[%s12465_s3 + $0x70] sm:$0xff] }
 0x28d   :  { %6946 = vmatprep.subr.bf16.mxu1 %v6945_v18  ;;  %v6953_v18 = vpack.c.bf16 %v1105_v51, %v1104_v62  ;;  %v1091_v17 = vld [vmem:[%s12465_s3 + $0x78] sm:$0xff]  ;;  %v1156_v62 = vld [vmem:[%s12465_s3 + $0x280] sm:$0xff]  ;;  %v1157_v51 = vld [vmem:[%s12465_s3 + $0x288] sm:$0xff] }
 0x28e   :  { %6972 = vmatpush3.bf16.msra.mxu0 %v6971_v12  ;;  %v6979_v12 = vpack.c.bf16 %v1117_v32, %v1116_v25  ;;  %v1120_v25 = vld [vmem:[%s12465_s3 + $0x160] sm:$0xff]  ;;  %v1121_v32 = vld [vmem:[%s12465_s3 + $0x168] sm:$0xff] }
 0x28f   :  { %6974 = vmatprep.subr.bf16.mxu0 %v6973_v56  ;;  %v6981_v56 = vpack.c.bf16 %v1135_v30, %v1134_v37  ;;  %v1138_v37 = vld [vmem:[%s12465_s3 + $0x1f0] sm:$0xff]  ;;  %v1139_v30 = vld [vmem:[%s12465_s3 + $0x1f8] sm:$0xff] }
 0x290   :  { %6948 = vmatpush3.bf16.msra.mxu1 %v6947_v44  ;;  %v6955_v44 = vpack.c.bf16 %v1089_v36, %v1088_v13  ;;  %v6993_v13 = vpack.c.bf16 %v1157_v51, %v1156_v62  ;;  %v1140_v36 = vld [vmem:[%s12465_s3 + $0x200] sm:$0xff]  ;;  %v1143_v62 = vld [vmem:[%s12465_s3 + $0x218] sm:$0xff] }
 0x291   :  { %6950 = vmatprep.subr.bf16.mxu1 %v6949_v38  ;;  %v6957_v38 = vpack.c.bf16 %v1107_v48, %v1106_v2  ;;  %v588_v2 = vadd.f32 %v9947_v61, %v10346_v43  ;;  %v6987_v48 = vpack.c.bf16 %v1121_v32, %v1120_v25  ;;  %v1123_v61 = vld [vmem:[%s12465_s3 + $0x178] sm:$0xff]  ;;  %v1161_v32 = vld [vmem:[%s12465_s3 + $0x2a8] sm:$0xff] }
 0x292   :  { %6976 = vmatpush3.bf16.msra.mxu0 %v6975_v57  ;;  %v6983_v57 = vpack.c.bf16 %v1119_v50, %v1118_v54  ;;  %v6989_v54 = vpack.c.bf16 %v1139_v30, %v1138_v37  ;;  %v1122_v50 = vld [vmem:[%s12465_s3 + $0x170] sm:$0xff]  ;;  %v1173_v30 = vld [vmem:[%s12465_s3 + $0x308] sm:$0xff] }
 0x293   :  { %6978 = vmatprep.subr.bf16.mxu0 %v6977_v35  ;;  %v6985_v35 = vpack.c.bf16 %v1137_v16, %v1136_v22  ;;  %v1188_v22 = vld [vmem:[%s12465_s3 + $0x380] sm:$0xff]  ;;  %v1189_v16 = vld [vmem:[%s12465_s3 + $0x388] sm:$0xff]  ;;  %v1064_v51 = vmul.f32 %v588_v2, %v588_v2  ;;  %v6991_v25 = vpack.c.bf16 %v1123_v61, %v1122_v50  ;;  %v1163_v50 = vld [vmem:[%s12465_s3 + $0x2b8] sm:$0xff] }
 0x294   :  { %6952 = vmatpush3.bf16.msra.mxu1 %v6951_v58  ;;  %v6959_v58 = vpack.c.bf16 %v1091_v17, %v1090_v33  ;;  %v586_v33 = vadd.f32 %v9944_v40, %v10341_v31  ;;  %v1160_v40 = vld [vmem:[%s12465_s3 + $0x2a0] sm:$0xff]  ;;  %v7025_v37 = vpack.c.bf16 %v1189_v16, %v1188_v22  ;;  %v1174_v16 = vld [vmem:[%s12465_s3 + $0x310] sm:$0xff] }
 0x295   :  { %6954 = vmatprep.subr.bf16.mxu1 %v6953_v18  ;;  %v580_v18 = vadd.f32 %v9912_v52, %v10341_v31  ;;  %v1159_v52 = vld [vmem:[%s12465_s3 + $0x298] sm:$0xff]  ;;  %v7001_v2 = vpack.c.bf16 %v1161_v32, %v1160_v40  ;;  %v1164_v40 = vld [vmem:[%s12465_s3 + $0x2c0] sm:$0xff]  ;;  %v1165_v32 = vld [vmem:[%s12465_s3 + $0x2c8] sm:$0xff] }
 0x296   :  { %6980 = vmatpush3.bf16.msra.mxu0 %v6979_v12  ;;  %v1141_v12 = vld [vmem:[%s12465_s3 + $0x208] sm:$0xff] }
 0x297   :  { %6982 = vmatprep.subr.bf16.mxu0 %v6981_v56  ;;  %v1158_v56 = vld [vmem:[%s12465_s3 + $0x290] sm:$0xff] }
 0x298   :  { %6956 = vmatpush3.bf16.msra.mxu1 %v6955_v44  ;;  %v6995_v44 = vpack.c.bf16 %v1141_v12, %v1140_v36  ;;  %v6997_v17 = vpack.c.bf16 %v1159_v52, %v1158_v56  ;;  %v1191_v36 = vld [vmem:[%s12465_s3 + $0x398] sm:$0xff]  ;;  %v1063_v12 = vmul.f32 %v586_v33, %v586_v33 }
 0x299   :  { %6958 = vmatprep.subr.bf16.mxu1 %v6957_v38  ;;  %v1050_v38 = vmul.f32 %v580_v18, %v580_v18  ;;  %v665_v18 = vadd.f32 %v9952_v15, %v10458_v42  ;;  %v1145_v15 = vld [vmem:[%s12465_s3 + $0x228] sm:$0xff] }
 0x29a   :  { %6984 = vmatpush3.bf16.msra.mxu0 %v6983_v57  ;;  %v1142_v57 = vld [vmem:[%s12465_s3 + $0x210] sm:$0xff] }
 0x29b   :  { %6986 = vmatprep.subr.bf16.mxu0 %v6985_v35  ;;  %v736_v35 = vadd.f32 %v10003_v29, %v10568_v1  ;;  %v1172_v29 = vld [vmem:[%s12465_s3 + $0x300] sm:$0xff]  ;;  %v1066_v33 = vmul.f32 %v665_v18, %v665_v18 }
 0x29c   :  { %6960 = vmatpush3.bf16.msra.mxu1 %v6959_v58  ;;  %v657_v58 = vadd.f32 %v9917_v20, %v10447_v24  ;;  %v1190_v20 = vld [vmem:[%s12465_s3 + $0x390] sm:$0xff]  ;;  %v7027_v52 = vpack.c.bf16 %v1173_v30, %v1172_v29  ;;  %v1176_v29 = vld [vmem:[%s12465_s3 + $0x320] sm:$0xff]  ;;  %v1177_v30 = vld [vmem:[%s12465_s3 + $0x328] sm:$0xff] }
 0x29d   :  { %6994 = vmatprep.subr.bf16.mxu1 %v6993_v13  ;;  %v6999_v13 = vpack.c.bf16 %v1143_v62, %v1142_v57  ;;  %v1055_v56 = vmul.f32 %v736_v35, %v736_v35  ;;  %v7029_v22 = vpack.c.bf16 %v1191_v36, %v1190_v20  ;;  %v1193_v62 = vld [vmem:[%s12465_s3 + $0x3a8] sm:$0xff]  ;;  %v1146_v35 = vld [vmem:[%s12465_s3 + $0x230] sm:$0xff]  ;;  %v1195_v36 = vld [vmem:[%s12465_s3 + $0x3b8] sm:$0xff] }
 0x29e   :  { %6988 = vmatpush3.bf16.msra.mxu0 %v6987_v48  ;;  %v1144_v48 = vld [vmem:[%s12465_s3 + $0x220] sm:$0xff]  ;;  %v1052_v61 = vmul.f32 %v657_v58, %v657_v58  ;;  %v1194_v20 = vld [vmem:[%s12465_s3 + $0x3b0] sm:$0xff] }
 0x29f   :  { %2648 = vmatmul.mubr.f32.vlgmr.msra.gmra.mrb[40].mxu1 %v1050_v38  ;;  %6990 = vmatprep.subr.bf16.mxu0 %v6989_v54  ;;  %v1162_v54 = vld [vmem:[%s12465_s3 + $0x2b0] sm:$0xff]  ;;  %v1175_v38 = vld [vmem:[%s12465_s3 + $0x318] sm:$0xff]  ;;  %v7003_v57 = vpack.c.bf16 %v1145_v15, %v1144_v48  ;;  %v1149_v48 = vld [vmem:[%s12465_s3 + $0x248] sm:$0xff]  ;;  %v7035_v15 = vpack.c.bf16 %v1177_v30, %v1176_v29 }
 0x2a0   :  { %2652 = vmatprep.mubr.f32.mxu1 %v1064_v51  ;;  %6996 = vmatpush3.bf16.msra.mxu1 %v6995_v44  ;;  %v663_v44 = vadd.f32 %v9949_v34, %v10447_v24  ;;  %v1192_v34 = vld [vmem:[%s12465_s3 + $0x3a0] sm:$0xff]  ;;  %v7005_v51 = vpack.c.bf16 %v1163_v50, %v1162_v54  ;;  %v7037_v54 = vpack.c.bf16 %v1195_v36, %v1194_v20  ;;  %v1178_v50 = vld [vmem:[%s12465_s3 + $0x330] sm:$0xff]  ;;  %v1153_v29 = vld [vmem:[%s12465_s3 + $0x268] sm:$0xff] }
 0x2a1   :  { %6998 = vmatprep.subr.bf16.mxu1 %v6997_v17  ;;  %v813_v17 = vadd.f32 %v10008_v28, %v10676_v0  ;;  %v1147_v28 = vld [vmem:[%s12465_s3 + $0x238] sm:$0xff] }
 0x2a2   :  { %6992 = vmatpush3.bf16.msra.mxu0 %v6991_v25  ;;  %v7031_v25 = vpack.c.bf16 %v1175_v38, %v1174_v16  ;;  %v1065_v58 = vmul.f32 %v663_v44, %v663_v44  ;;  %v1197_v16 = vld [vmem:[%s12465_s3 + $0x3c8] sm:$0xff] }
 0x2a3   :  { %2653 = vmatmul.mubr.f32.gmra.mrb[42].mxu1 %v1063_v12  ;;  %7026 = vmatprep.subr.bf16.mxu0 %v7025_v37  ;;  %v7033_v37 = vpack.c.bf16 %v1193_v62, %v1192_v34  ;;  %v1057_v18 = vmul.f32 %v813_v17, %v813_v17  ;;  %v7009_v12 = vpack.c.bf16 %v1165_v32, %v1164_v40  ;;  %v1151_v17 = vld [vmem:[%s12465_s3 + $0x258] sm:$0xff]  ;;  %v1168_v34 = vld [vmem:[%s12465_s3 + $0x2e0] sm:$0xff]  ;;  %v1169_v62 = vld [vmem:[%s12465_s3 + $0x2e8] sm:$0xff] }
 0x2a4   :  { %7000 = vmatpush3.bf16.msra.mxu1 %v6999_v13  ;;  %2797 = vmatprep.mubr.f32.mxu1 %v1055_v56  ;;  %v7007_v13 = vpack.c.bf16 %v1147_v28, %v1146_v35  ;;  %v1166_v56 = vld [vmem:[%s12465_s3 + $0x2d0] sm:$0xff]  ;;  %v1180_v35 = vld [vmem:[%s12465_s3 + $0x340] sm:$0xff]  ;;  %v1181_v28 = vld [vmem:[%s12465_s3 + $0x348] sm:$0xff] }
 0x2a5   :  { %2723 = vmatmul.mubr.f32.vlgmr.msra.gmra.mrb[42].mxu0 %v1052_v61  ;;  %7002 = vmatprep.subr.bf16.mxu1 %v7001_v2  ;;  %v1148_v2 = vld [vmem:[%s12465_s3 + $0x240] sm:$0xff]  ;;  %v1179_v61 = vld [vmem:[%s12465_s3 + $0x338] sm:$0xff]  ;;  %v1198_v40 = vld [vmem:[%s12465_s3 + $0x3d0] sm:$0xff]  ;;  %v7043_v30 = vpack.c.bf16 %v1181_v28, %v1180_v35 }
 0x2a6   :  { %2727 = vmatprep.mubr.f32.mxu0 %v1066_v33  ;;  %7028 = vmatpush3.bf16.msra.mxu0 %v7027_v52  ;;  %v1167_v52 = vld [vmem:[%s12465_s3 + $0x2d8] sm:$0xff]  ;;  %v7011_v44 = vpack.c.bf16 %v1149_v48, %v1148_v2  ;;  %v1150_v33 = vld [vmem:[%s12465_s3 + $0x250] sm:$0xff] }
 0x2a7   :  { %7030 = vmatprep.subr.bf16.mxu0 %v7029_v22  ;;  %v1196_v22 = vld [vmem:[%s12465_s3 + $0x3c0] sm:$0xff]  ;;  %v7013_v38 = vpack.c.bf16 %v1167_v52, %v1166_v56  ;;  %v1199_v32 = vld [vmem:[%s12465_s3 + $0x3d8] sm:$0xff]  ;;  %v1201_v52 = vld [vmem:[%s12465_s3 + $0x3e8] sm:$0xff] }
 0x2a8   :  { %7004 = vmatpush3.bf16.msra.mxu1 %v7003_v57  ;;  %v7039_v57 = vpack.c.bf16 %v1179_v61, %v1178_v50  ;;  %v7045_v36 = vpack.c.bf16 %v1199_v32, %v1198_v40  ;;  %v1183_v2 = vld [vmem:[%s12465_s3 + $0x358] sm:$0xff]  ;;  %v1200_v56 = vld [vmem:[%s12465_s3 + $0x3e0] sm:$0xff]  ;;  %v1154_v61 = vld [vmem:[%s12465_s3 + $0x270] sm:$0xff] }
 0x2a9   :  { %2728 = vmatmul.mubr.f32.gmra.mrb[44].mxu0 %v1065_v58  ;;  %7006 = vmatprep.subr.bf16.mxu1 %v7005_v51  ;;  %v7041_v51 = vpack.c.bf16 %v1197_v16, %v1196_v22  ;;  %v7017_v58 = vpack.c.bf16 %v1169_v62, %v1168_v34  ;;  %v1220_v16 = vld [vmem:[%s12465_s3 + $0x480] sm:$0xff]  ;;  %v1203_v35 = vld [vmem:[%s12465_s3 + $0x3f8] sm:$0xff] }
 0x2aa   :  { %7032 = vmatpush3.bf16.msra.mxu0 %v7031_v25  ;;  %2872 = vmatprep.mubr.f32.mxu0 %v1057_v18  ;;  %v7015_v25 = vpack.c.bf16 %v1151_v17, %v1150_v33  ;;  %v1170_v18 = vld [vmem:[%s12465_s3 + $0x2f0] sm:$0xff]  ;;  %v7049_v33 = vpack.c.bf16 %v1201_v52, %v1200_v56  ;;  %v1184_v17 = vld [vmem:[%s12465_s3 + $0x360] sm:$0xff] }
 0x2ab   :  { %7034 = vmatprep.subr.bf16.mxu0 %v7033_v37  ;;  %v1152_v37 = vld [vmem:[%s12465_s3 + $0x260] sm:$0xff]  ;;  %v1206_v52 = vld [vmem:[%s12465_s3 + $0x410] sm:$0xff] }
 0x2ac   :  { %7008 = vmatpush3.bf16.msra.mxu1 %v7007_v13  ;;  %v1171_v13 = vld [vmem:[%s12465_s3 + $0x2f8] sm:$0xff]  ;;  %v7019_v48 = vpack.c.bf16 %v1153_v29, %v1152_v37  ;;  %v1204_v32 = vld [vmem:[%s12465_s3 + $0x400] sm:$0xff]  ;;  %v742_v29 = vadd.f32 %v10015_v5, %v10568_v1 }
 0x2ad   :  { %7010 = vmatprep.subr.bf16.mxu1 %v7009_v12  ;;  %v1182_v12 = vld [vmem:[%s12465_s3 + $0x350] sm:$0xff]  ;;  %v7021_v50 = vpack.c.bf16 %v1171_v13, %v1170_v18  ;;  %v1223_v18 = vld [vmem:[%s12465_s3 + $0x498] sm:$0xff] }
 0x2ae   :  { %7036 = vmatpush3.bf16.msra.mxu0 %v7035_v15  ;;  %v7047_v22 = vpack.c.bf16 %v1183_v2, %v1182_v12  ;;  %v1187_v5 = vld [vmem:[%s12465_s3 + $0x378] sm:$0xff]  ;;  %v1252_v12 = vld [vmem:[%s12465_s3 + $0x580] sm:$0xff]  ;;  %v1253_v2 = vld [vmem:[%s12465_s3 + $0x588] sm:$0xff] }
 0x2af   :  { %7038 = vmatprep.subr.bf16.mxu0 %v7037_v54 }
 0x2b0   :  { %7012 = vmatpush3.bf16.msra.mxu1 %v7011_v44  ;;  %v1155_v44 = vld [vmem:[%s12465_s3 + $0x278] sm:$0xff] }
 0x2b1   :  { %7014 = vmatprep.subr.bf16.mxu1 %v7013_v38  ;;  %v1221_v38 = vld [vmem:[%s12465_s3 + $0x488] sm:$0xff]  ;;  %v7023_v62 = vpack.c.bf16 %v1155_v44, %v1154_v61  ;;  %v1068_v61 = vmul.f32 %v742_v29, %v742_v29  ;;  %v890_v44 = vadd.f32 %v10091_v49, %v10794_v9  ;;  %v1236_v49 = vld [vmem:[%s12465_s3 + $0x500] sm:$0xff] }
 0x2b2   :  { %7040 = vmatpush3.bf16.msra.mxu0 %v7039_v57  ;;  %v1185_v57 = vld [vmem:[%s12465_s3 + $0x368] sm:$0xff]  ;;  %v7057_v40 = vpack.c.bf16 %v1221_v38, %v1220_v16  ;;  %v811_v38 = vadd.f32 %v10005_v63, %v10667_v4  ;;  %v1254_v63 = vld [vmem:[%s12465_s3 + $0x590] sm:$0xff] }
 0x2b3   :  { %7042 = vmatprep.subr.bf16.mxu0 %v7041_v51  ;;  %v5059_v20 = vpop.f32.mrb[28].mxu0  ;;  %v1202_v51 = vld [vmem:[%s12465_s3 + $0x3f0] sm:$0xff]  ;;  %v1225_v16 = vld [vmem:[%s12465_s3 + $0x4a8] sm:$0xff] }
 0x2b4   :  { %7016 = vmatpush3.bf16.msra.mxu1 %v7015_v25  ;;  %v5060_v15 = vpop.f32.mrb[29].mxu0  ;;  %v734_v25 = vadd.f32 %v10000_v11, %v10565_v53  ;;  %v1222_v11 = vld [vmem:[%s12465_s3 + $0x490] sm:$0xff]  ;;  %v7053_v13 = vpack.c.bf16 %v1203_v35, %v1202_v51  ;;  %v1056_v29 = vmul.f32 %v811_v38, %v811_v38 }
 0x2b5   :  { %7018 = vmatprep.subr.bf16.mxu1 %v7017_v58  ;;  %v11216_v54 = vadd.f32 %v5060_v15, %v5059_v20  ;;  %v1205_v58 = vld [vmem:[%s12465_s3 + $0x408] sm:$0xff]  ;;  %v1186_v20 = vld [vmem:[%s12465_s3 + $0x370] sm:$0xff]  ;;  %v740_v15 = vadd.f32 %v10013_v39, %v10565_v53  ;;  %v7061_v56 = vpack.c.bf16 %v1223_v18, %v1222_v11  ;;  %v1224_v39 = vld [vmem:[%s12465_s3 + $0x4a0] sm:$0xff] }
 0x2b6   :  { %7044 = vmatpush3.bf16.msra.mxu0 %v7043_v30  ;;  %v7051_v30 = vpack.c.bf16 %v1185_v57, %v1184_v17  ;;  %v1237_v17 = vld [vmem:[%s12465_s3 + $0x508] sm:$0xff]  ;;  %v819_v57 = vadd.f32 %v10020_v23, %v10676_v0  ;;  %v7065_v35 = vpack.c.bf16 %v1225_v16, %v1224_v39  ;;  %v1238_v18 = vld [vmem:[%s12465_s3 + $0x510] sm:$0xff] }
 0x2b7   :  { %7046 = vmatprep.subr.bf16.mxu0 %v7045_v36  ;;  %v5062_v34 = vpop.f32.mrb[30].mxu0  ;;  %v7059_v36 = vpack.c.bf16 %v1205_v58, %v1204_v32  ;;  %v1067_v51 = vmul.f32 %v740_v15, %v740_v15  ;;  %v1209_v23 = vld [vmem:[%s12465_s3 + $0x428] sm:$0xff]  ;;  %v1226_v32 = vld [vmem:[%s12465_s3 + $0x4b0] sm:$0xff]  ;;  %v1227_v58 = vld [vmem:[%s12465_s3 + $0x4b8] sm:$0xff] }
 0x2b8   :  { %7020 = vmatpush3.bf16.msra.mxu1 %v7019_v48  ;;  %v5063_v28 = vpop.f32.mrb[31].mxu0  ;;  %v1054_v48 = vmul.f32 %v734_v25, %v734_v25  ;;  %v1059_v25 = vmul.f32 %v890_v44, %v890_v44  ;;  %v1240_v44 = vld [vmem:[%s12465_s3 + $0x520] sm:$0xff]  ;;  %v1258_v38 = vld [vmem:[%s12465_s3 + $0x5b0] sm:$0xff] }
 0x2b9   :  { %7022 = vmatprep.subr.bf16.mxu1 %v7021_v50  ;;  %v11250_v37 = vadd.f32 %v5063_v28, %v5062_v34  ;;  %v1207_v50 = vld [vmem:[%s12465_s3 + $0x418] sm:$0xff]  ;;  %v1208_v28 = vld [vmem:[%s12465_s3 + $0x420] sm:$0xff] }
 0x2ba   :  { %7048 = vmatpush3.bf16.msra.mxu0 %v7047_v22  ;;  %v7055_v22 = vpack.c.bf16 %v1187_v5, %v1186_v20  ;;  %v7063_v34 = vpack.c.bf16 %v1207_v50, %v1206_v52  ;;  %v1070_v20 = vmul.f32 %v819_v57, %v819_v57  ;;  %v967_v5 = vadd.f32 %v10096_v59, %v10833_v46  ;;  %v1211_v59 = vld [vmem:[%s12465_s3 + $0x438] sm:$0xff]  ;;  %v1229_v52 = vld [vmem:[%s12465_s3 + $0x4c8] sm:$0xff] }
 0x2bb   :  { %7050 = vmatprep.subr.bf16.mxu0 %v7049_v33  ;;  %v7089_v33 = vpack.c.bf16 %v1253_v2, %v1252_v12  ;;  %v1257_v12 = vld [vmem:[%s12465_s3 + $0x5a8] sm:$0xff]  ;;  %v7069_v2 = vpack.c.bf16 %v1227_v58, %v1226_v32  ;;  %v1214_v58 = vld [vmem:[%s12465_s3 + $0x450] sm:$0xff] }
 0x2bc   :  { %7024 = vmatpush3.bf16.msra.mxu1 %v7023_v62  ;;  %v1255_v62 = vld [vmem:[%s12465_s3 + $0x598] sm:$0xff]  ;;  %v1061_v39 = vmul.f32 %v967_v5, %v967_v5  ;;  %v1213_v57 = vld [vmem:[%s12465_s3 + $0x448] sm:$0xff] }
 0x2bd   :  { %7058 = vmatprep.subr.bf16.mxu1 %v7057_v40  ;;  %v7091_v40 = vpack.c.bf16 %v1237_v17, %v1236_v49  ;;  %v7093_v11 = vpack.c.bf16 %v1255_v62, %v1254_v63  ;;  %v1212_v17 = vld [vmem:[%s12465_s3 + $0x440] sm:$0xff]  ;;  %v1230_v63 = vld [vmem:[%s12465_s3 + $0x4d0] sm:$0xff]  ;;  %v1231_v62 = vld [vmem:[%s12465_s3 + $0x4d8] sm:$0xff] }
 0x2be   :  { %7052 = vmatpush3.bf16.msra.mxu0 %v7051_v30  ;;  %v817_v30 = vadd.f32 %v10017_v10, %v10667_v4  ;;  %v1256_v10 = vld [vmem:[%s12465_s3 + $0x5a0] sm:$0xff]  ;;  %v7077_v32 = vpack.c.bf16 %v1231_v62, %v1230_v63  ;;  %v1245_v5 = vld [vmem:[%s12465_s3 + $0x548] sm:$0xff] }
 0x2bf   :  { %2798 = vmatmul.mubr.f32.vlgmr.msra.gmra.mrb[44].mxu1 %v1054_v48  ;;  %7054 = vmatprep.subr.bf16.mxu0 %v7053_v13  ;;  %v1239_v13 = vld [vmem:[%s12465_s3 + $0x518] sm:$0xff]  ;;  %v1210_v48 = vld [vmem:[%s12465_s3 + $0x430] sm:$0xff] }
 0x2c0   :  { %2802 = vmatprep.mubr.f32.mxu1 %v1068_v61  ;;  %7060 = vmatpush3.bf16.msra.mxu1 %v7059_v36  ;;  %v7067_v36 = vpack.c.bf16 %v1209_v23, %v1208_v28  ;;  %v7095_v15 = vpack.c.bf16 %v1239_v13, %v1238_v18  ;;  %v1069_v50 = vmul.f32 %v817_v30, %v817_v30  ;;  %v1243_v28 = vld [vmem:[%s12465_s3 + $0x538] sm:$0xff]  ;;  %v1233_v18 = vld [vmem:[%s12465_s3 + $0x4e8] sm:$0xff] }
 0x2c1   :  { %7062 = vmatprep.subr.bf16.mxu1 %v7061_v56  ;;  %v1228_v56 = vld [vmem:[%s12465_s3 + $0x4c0] sm:$0xff]  ;;  %v7097_v61 = vpack.c.bf16 %v1257_v12, %v1256_v10  ;;  %v7071_v16 = vpack.c.bf16 %v1211_v59, %v1210_v48  ;;  %v7075_v23 = vpack.c.bf16 %v1213_v57, %v1212_v17  ;;  %v1262_v10 = vld [vmem:[%s12465_s3 + $0x5d0] sm:$0xff]  ;;  %v1263_v12 = vld [vmem:[%s12465_s3 + $0x5d8] sm:$0xff] }
 0x2c2   :  { %7056 = vmatpush3.bf16.msra.mxu0 %v7055_v22  ;;  %v1241_v22 = vld [vmem:[%s12465_s3 + $0x528] sm:$0xff]  ;;  %v7073_v49 = vpack.c.bf16 %v1229_v52, %v1228_v56  ;;  %v1216_v48 = vld [vmem:[%s12465_s3 + $0x460] sm:$0xff]  ;;  %v1234_v52 = vld [vmem:[%s12465_s3 + $0x4f0] sm:$0xff] }
 0x2c3   :  { %2803 = vmatmul.mubr.f32.gmra.mrb[46].mxu1 %v1067_v51  ;;  %7090 = vmatprep.subr.bf16.mxu0 %v7089_v33  ;;  %v1259_v33 = vld [vmem:[%s12465_s3 + $0x5b8] sm:$0xff]  ;;  %v1217_v59 = vld [vmem:[%s12465_s3 + $0x468] sm:$0xff]  ;;  %v1218_v57 = vld [vmem:[%s12465_s3 + $0x470] sm:$0xff] }
 0x2c4   :  { %7064 = vmatpush3.bf16.msra.mxu1 %v7063_v34  ;;  %2947 = vmatprep.mubr.f32.mxu1 %v1059_v25  ;;  %v7099_v34 = vpack.c.bf16 %v1241_v22, %v1240_v44  ;;  %v7101_v51 = vpack.c.bf16 %v1259_v33, %v1258_v38  ;;  %v1260_v25 = vld [vmem:[%s12465_s3 + $0x5c0] sm:$0xff]  ;;  %v7109_v44 = vpack.c.bf16 %v1263_v12, %v1262_v10  ;;  %v1246_v22 = vld [vmem:[%s12465_s3 + $0x550] sm:$0xff] }
 0x2c5   :  { %2873 = vmatmul.mubr.f32.vlgmr.msra.gmra.mrb[46].mxu0 %v1056_v29  ;;  %7066 = vmatprep.subr.bf16.mxu1 %v7065_v35  ;;  %v1242_v35 = vld [vmem:[%s12465_s3 + $0x530] sm:$0xff]  ;;  %v1215_v29 = vld [vmem:[%s12465_s3 + $0x458] sm:$0xff]  ;;  %v7083_v38 = vpack.c.bf16 %v1217_v59, %v1216_v48  ;;  %v1264_v33 = vld [vmem:[%s12465_s3 + $0x5e0] sm:$0xff]  ;;  %v965_v48 = vadd.f32 %v10093_v8, %v10828_v45 }
 0x2c6   :  { %2877 = vmatprep.mubr.f32.mxu0 %v1070_v20  ;;  %7092 = vmatpush3.bf16.msra.mxu0 %v7091_v40  ;;  %v1261_v40 = vld [vmem:[%s12465_s3 + $0x5c8] sm:$0xff]  ;;  %v7103_v30 = vpack.c.bf16 %v1243_v28, %v1242_v35  ;;  %v1244_v20 = vld [vmem:[%s12465_s3 + $0x540] sm:$0xff]  ;;  %v13171_v10 = vld [vmem:[#allocation5_spill] sm:$0xff] }
 0x2c7   :  { %7094 = vmatprep.subr.bf16.mxu0 %v7093_v11  ;;  %v1232_v11 = vld [vmem:[%s12465_s3 + $0x4e0] sm:$0xff]  ;;  %v7105_v13 = vpack.c.bf16 %v1261_v40, %v1260_v25  ;;  %v7107_v56 = vpack.c.bf16 %v1245_v5, %v1244_v20  ;;  %v1250_v20 = vld [vmem:[%s12465_s3 + $0x570] sm:$0xff]  ;;  %v1251_v5 = vld [vmem:[%s12465_s3 + $0x578] sm:$0xff] }
 0x2c8   :  { %7068 = vmatpush3.bf16.msra.mxu1 %v7067_v36  ;;  %v7079_v36 = vpack.c.bf16 %v1215_v29, %v1214_v58  ;;  %v1248_v28 = vld [vmem:[%s12465_s3 + $0x560] sm:$0xff]  ;;  %v888_v29 = vadd.f32 %v10088_v3, %v10789_v19  ;;  %v11486_v8 = vld [vmem:[%s12462_s0 + $0x48] sm:$0xff] }
 0x2c9   :  { %2878 = vmatmul.mubr.f32.gmra.mrb[48].mxu0 %v1069_v50  ;;  %7070 = vmatprep.subr.bf16.mxu1 %v7069_v2  ;;  %v7081_v2 = vpack.c.bf16 %v1233_v18, %v1232_v11  ;;  %v1235_v50 = vld [vmem:[%s12465_s3 + $0x4f8] sm:$0xff]  ;;  %v1268_v3 = vld [vmem:[%s12465_s3 + $0x600] sm:$0xff] }
 0x2ca   :  { %7096 = vmatpush3.bf16.msra.mxu0 %v7095_v15  ;;  %3022 = vmatprep.mubr.f32.mxu0 %v1061_v39  ;;  %v1247_v39 = vld [vmem:[%s12465_s3 + $0x558] sm:$0xff]  ;;  %v7085_v17 = vpack.c.bf16 %v1235_v50, %v1234_v52 }
 0x2cb   :  { %7098 = vmatprep.subr.bf16.mxu0 %v7097_v61  ;;  %v7111_v62 = vpack.c.bf16 %v1247_v39, %v1246_v22  ;;  %v1271_v52 = vld [vmem:[%s12465_s3 + $0x618] sm:$0xff]  ;;  %v1042_v39 = vadd.f32 %v10295_v60, %v10852_v41 }
 0x2cc   :  { %7072 = vmatpush3.bf16.msra.mxu1 %v7071_v16 }
 0x2cd   :  { %7074 = vmatprep.subr.bf16.mxu1 %v7073_v49  ;;  %v1265_v49 = vld [vmem:[%s12465_s3 + $0x5e8] sm:$0xff] }
 0x2ce   :  { %7100 = vmatpush3.bf16.msra.mxu0 %v7099_v34  ;;  %v1219_v34 = vld [vmem:[%s12465_s3 + $0x478] sm:$0xff]  ;;  %v7113_v35 = vpack.c.bf16 %v1265_v49, %v1264_v33  ;;  %v1273_v33 = vld [vmem:[%s12465_s3 + $0x628] sm:$0xff] }
 0x2cf   :  { %7102 = vmatprep.subr.bf16.mxu0 %v7101_v51  ;;  %v7087_v40 = vpack.c.bf16 %v1219_v34, %v1218_v57  ;;  %v1274_v57 = vld [vmem:[%s12465_s3 + $0x630] sm:$0xff]  ;;  %v1275_v34 = vld [vmem:[%s12465_s3 + $0x638] sm:$0xff] }
 0x2d0   :  { %7076 = vmatpush3.bf16.msra.mxu1 %v7075_v23  ;;  %v1249_v23 = vld [vmem:[%s12465_s3 + $0x568] sm:$0xff] }
 0x2d1   :  { %7078 = vmatprep.subr.bf16.mxu1 %v7077_v32  ;;  %v1267_v32 = vld [vmem:[%s12465_s3 + $0x5f8] sm:$0xff]  ;;  %v7115_v11 = vpack.c.bf16 %v1249_v23, %v1248_v28  ;;  %v13178_v28 = vld [vmem:[#allocation19_spill] sm:$0xff]  ;;  %v1047_v23 = vadd.f32 %v10321_v47, %v10852_v41 }
 0x2d2   :  { %7104 = vmatpush3.bf16.msra.mxu0 %v7103_v30  ;;  %v5097_v15 = vpop.f32.mrb[28].mxu1  ;;  %v896_v30 = vadd.f32 %v10109_v27, %v10794_v9  ;;  %v1269_v27 = vld [vmem:[%s12465_s3 + $0x608] sm:$0xff] }
 0x2d3   :  { %v5098_v61 = vpop.f32.mrb[29].mxu1  ;;  %7106 = vmatprep.subr.bf16.mxu0 %v7105_v13  ;;  %v7121_v59 = vpack.c.bf16 %v1269_v27, %v1268_v3  ;;  %v13184_v3 = vld [vmem:[#allocation28_spill] sm:$0xff]  ;;  %v13185_v27 = vld [vmem:[#allocation30_spill] sm:$0xff] }
 0x2d4   :  { %v5099_v16 = vadd.f32 %v5098_v61, %v5097_v15  ;;  %7080 = vmatpush3.bf16.msra.mxu1 %v7079_v36  ;;  %v894_v36 = vadd.f32 %v10101_v55, %v10789_v19  ;;  %v1072_v12 = vmul.f32 %v896_v30, %v896_v30  ;;  %v973_v15 = vadd.f32 %v10132_v26, %v10833_v46  ;;  %v1270_v55 = vld [vmem:[%s12465_s3 + $0x610] sm:$0xff]  ;;  %v13173_v61 = vld [vmem:[#allocation8_spill] sm:$0xff]  ;;  %v13181_v30 = vld [vmem:[#allocation26_spill] sm:$0xff] }
 0x2d5   :  { %7082 = vmatprep.subr.bf16.mxu1 %v7081_v2  ;;  %v7119_v2 = vpack.c.bf16 %v1251_v5, %v1250_v20  ;;  %v1060_v26 = vmul.f32 %v965_v48, %v965_v48  ;;  %v7125_v22 = vpack.c.bf16 %v1271_v52, %v1270_v55  ;;  %v13183_v20 = vld [vmem:[#allocation9_spill] sm:$0xff]  ;;  %v13192_v48 = vld [vmem:[#allocation36_spill] sm:$0xff]  ;;  %v13198_v52 = vld [vmem:[#allocation22_spill] sm:$0xff] }
 0x2d6   :  { %v11435_v63 = vadd.f32 %v5099_v16, %v11216_v54  ;;  %7108 = vmatpush3.bf16.msra.mxu0 %v7107_v56  ;;  %v5100_v51 = vpop.f32.mrb[30].mxu1  ;;  %v1266_v54 = vld [vmem:[%s12465_s3 + $0x5f0] sm:$0xff]  ;;  %v13172_v56 = vld [vmem:[#allocation6_spill] sm:$0xff]  ;;  %v1071_v50 = vmul.f32 %v894_v36, %v894_v36  ;;  %v1074_v16 = vmul.f32 %v973_v15, %v973_v15  ;;  %v13187_v36 = vld [vmem:[#allocation12_spill] sm:$0xff] }
 0x2d7   :  { %7110 = vmatprep.subr.bf16.mxu0 %v7109_v44  ;;  %v5101_v25 = vpop.f32.mrb[31].mxu1  ;;  %v7117_v13 = vpack.c.bf16 %v1267_v32, %v1266_v54  ;;  %v971_v44 = vadd.f32 %v10120_v6, %v10828_v45  ;;  %v13174_v6 = vld [vmem:[#allocation11_spill] sm:$0xff]  ;;  %v1075_v54 = vmul.f32 %v1047_v23, %v1047_v23  ;;  %v13194_v15 = vld [vmem:[#allocation18_spill] sm:$0xff]  ;;  %v13196_v55 = vld [vmem:[#allocation40_spill] sm:$0xff] }
 0x2d8   :  { %7084 = vmatpush3.bf16.msra.mxu1 %v7083_v38  ;;  %v5102_v58 = vadd.f32 %v5101_v25, %v5100_v51  ;;  %v1272_v38 = vld [vmem:[%s12465_s3 + $0x620] sm:$0xff]  ;;  %v7133_v51 = vpack.c.bf16 %v1275_v34, %v1274_v57  ;;  %v13179_v25 = vld [vmem:[#allocation21_spill] sm:$0xff] }
 0x2d9   :  { %7086 = vmatprep.subr.bf16.mxu1 %v7085_v17  ;;  %v1073_v49 = vmul.f32 %v971_v44, %v971_v44  ;;  %v7129_v60 = vpack.c.bf16 %v1273_v33, %v1272_v38  ;;  %v1062_v17 = vmul.f32 %v1042_v39, %v1042_v39  ;;  %v13202_v44 = vld [vmem:[#allocation25_spill] sm:$0xff]  ;;  %v13204_v39 = vld [vmem:[#allocation48_spill] sm:$0xff]  ;;  %v13207_v33 = vld [vmem:[#allocation31_spill] sm:$0xff] }
 0x2da   :  { %7112 = vmatpush3.bf16.msra.mxu0 %v7111_v62  ;;  %v11454_v18 = vadd.f32 %v5102_v58, %v11250_v37  ;;  %v1058_v37 = vmul.f32 %v888_v29, %v888_v29  ;;  %v13176_v62 = vld [vmem:[#allocation15_spill] sm:$0xff]  ;;  %v13206_v38 = vld [vmem:[#allocation29_spill] sm:$0xff] }
 0x2db   :  { %7114 = vmatprep.subr.bf16.mxu0 %v7113_v35  ;;  %v13177_v35 = vld [vmem:[#allocation17_spill] sm:$0xff]  ;;  %v13211_v57 = vld [vmem:[#allocation35_spill] sm:$0xff] }
 0x2dc   :  { %7088 = vmatpush3.bf16.msra.mxu1 %v7087_v40  ;;  %v13180_v40 = vld [vmem:[#allocation23_spill] sm:$0xff] }
 0x2dd   :  { %7138 = vmatprep.subr.bf16.mxu1 %v13171_v10  ;;  %v13188_v10 = vld [vmem:[#allocation32_spill] sm:$0xff] }
 0x2de   :  { %7116 = vmatpush3.bf16.msra.mxu0 %v7115_v11  ;;  %v13182_v11 = vld [vmem:[#allocation7_spill] sm:$0xff] }
 0x2df   :  { %2948 = vmatmul.mubr.f32.vlgmr.msra.gmra.mrb[48].mxu1 %v1058_v37  ;;  %7118 = vmatprep.subr.bf16.mxu0 %v7117_v13 }
 0x2e0   :  { %2952 = vmatprep.mubr.f32.mxu1 %v1072_v12  ;;  %7140 = vmatpush1.bf16.msra.mxu1 %v13172_v56  ;;  %v13189_v12 = vld [vmem:[#allocation34_spill] sm:$0xff]  ;;  %v13195_v56 = vld [vmem:[#allocation20_spill] sm:$0xff] }
 0x2e1   :  { %7142 = vmatprep.subr.bf16.mxu1 %v13173_v61  ;;  %v13200_v61 = vld [vmem:[#allocation44_spill] sm:$0xff] }
 0x2e2   :  { %7120 = vmatpush3.bf16.msra.mxu0 %v7119_v2  ;;  %v13191_v2 = vld [vmem:[#allocation16_spill] sm:$0xff] }
 0x2e3   :  { %2953 = vmatmul.mubr.f32.gmra.mrb[50].mxu1 %v1071_v50  ;;  %7122 = vmatprep.subr.bf16.mxu0 %v7121_v59  ;;  %v13199_v50 = vld [vmem:[#allocation24_spill] sm:$0xff] }
 0x2e4   :  { %7144 = vmatpush1.bf16.msra.mxu1 %v7947_v21  ;;  %3177 = vmatprep.mubr.f32.mxu1 %v11486_v8  ;;  %v13175_v21 = vld [vmem:[#allocation13_spill] sm:$0xff] }
 0x2e5   :  { %3023 = vmatmul.mubr.f32.vlgmr.msra.gmra.mrb[50].mxu0 %v1060_v26  ;;  %7146 = vmatprep.subr.bf16.mxu1 %v13174_v6  ;;  %v13201_v26 = vld [vmem:[#allocation46_spill] sm:$0xff]  ;;  %v13208_v6 = vld [vmem:[#allocation52_spill] sm:$0xff] }
 0x2e6   :  { %3027 = vmatprep.mubr.f32.mxu0 %v1074_v16  ;;  %7124 = vmatpush3.bf16.msra.mxu0 %v7121_v59  ;;  %v13193_v59 = vld [vmem:[#allocation38_spill] sm:$0xff] }
 0x2e7   :  { %7126 = vmatprep.subr.bf16.mxu0 %v7125_v22  ;;  %v13205_v16 = vld [vmem:[#allocation50_spill] sm:$0xff] }
 0x2e8   :  { %7148 = vmatpush1.bf16.msra.mxu1 %v13175_v21 }
 0x2e9   :  { %3028 = vmatmul.mubr.f32.gmra.mrb[52].mxu0 %v1073_v49  ;;  %7150 = vmatprep.subr.bf16.mxu1 %v13176_v62  ;;  %v13209_v49 = vld [vmem:[#allocation54_spill] sm:$0xff]  ;;  %v13212_v62 = vld [vmem:[#allocation56_spill] sm:$0xff] }
 0x2ea   :  { %7128 = vmatpush3.bf16.msra.mxu0 %v7125_v22  ;;  %5832 = vmatprep.mubr.msk.f32.mxu0 %vm2045_vm0, %v1062_v17  ;;  %v13203_v22 = vld [vmem:[#allocation27_spill] sm:$0xff] }
 0x2eb   :  { %7130 = vmatprep.subr.bf16.mxu0 %v7129_v60 }
 0x2ec   :  { %7152 = vmatpush1.bf16.msra.mxu1 %v13177_v35 }
 0x2ed   :  { %7154 = vmatprep.subr.bf16.mxu1 %v13178_v28  ;;  %v13214_v28 = vld [vmem:[#allocation37_spill] sm:$0xff] }
 0x2ee   :  { %7132 = vmatpush3.bf16.msra.mxu0 %v7129_v60  ;;  %v13210_v60 = vld [vmem:[#allocation33_spill] sm:$0xff] }
 0x2ef   :  { %7134 = vmatprep.subr.bf16.mxu0 %v7133_v51 }
 0x2f0   :  { %7156 = vmatpush1.bf16.msra.mxu1 %v13179_v25 }
 0x2f1   :  { %7158 = vmatprep.subr.bf16.mxu1 %v13180_v40  ;;  %v13215_v40 = vld [vmem:[#allocation39_spill] sm:$0xff] }
 0x2f2   :  { %7136 = vmatpush3.bf16.msra.mxu0 %v7133_v51  ;;  %v13213_v51 = vld [vmem:[#allocation58_spill] sm:$0xff] }
 0x2f3   :  { %v5135_v32 = vpop.f32.mrb[32].mxu0  ;;  %7202 = vmatprep.subr.bf16.mxu0 %v7906_v7 }
 0x2f4   :  { %v5136_v58 = vpop.f32.mrb[33].mxu0  ;;  %7160 = vmatpush1.bf16.msra.mxu1 %v8105_v14  ;;  %v13186_v14 = vld [vmem:[#allocation10_spill] sm:$0xff] }
 0x2f5   :  { %v5137_v29 = vadd.f32 %v5136_v58, %v5135_v32  ;;  %5833 = vmatmul.mubr.msk.f32.vlgmr.msra.gmra.mrb[40].mxu0 %vm2045_vm0, %v1075_v54  ;;  %7162 = vmatprep.subr.bf16.mxu1 %v13181_v30  ;;  %v13216_v32 = vld [vmem:[#allocation60_spill] sm:$0xff]  ;;  %v13217_v58 = vld [vmem:[#allocation62_spill] sm:$0xff]  ;;  %v13218_v30 = vld [vmem:[#allocation41_spill] sm:$0xff] }
 0x2f6   :  { %7204 = vmatpush1.bf16.msra.mxu0 %v13182_v11  ;;  %3254 = vmatprep.mubr.f32.mxu0 %v11486_v8  ;;  %v13219_v11 = vld [vmem:[#allocation43_spill] sm:$0xff] }
 0x2f7   :  { %v2269_v47 = vadd.f32 %v5137_v29, %v11435_v63  ;;  %v5138_v13 = vpop.f32.mrb[34].mxu0  ;;  %7206 = vmatprep.subr.bf16.mxu0 %v13183_v20  ;;  %v13190_v63 = vld [vmem:[#allocation14_spill] sm:$0xff] }
 0x2f8   :  { %v5139_v5 = vpop.f32.mrb[35].mxu0  ;;  %7164 = vmatpush1.bf16.msra.mxu1 %v13184_v3  ;;  %v13221_v20 = vld [vmem:[#allocation66_spill] sm:$0xff]  ;;  %v13222_v3 = vld [vmem:[#allocation45_spill] sm:$0xff] }
 0x2f9   :  { %v5140_v7 = vadd.f32 %v5139_v5, %v5138_v13  ;;  %7166 = vmatprep.subr.bf16.mxu1 %v13185_v27  ;;  %v13220_v13 = vld [vmem:[#allocation64_spill] sm:$0xff]  ;;  %v11571_v5 = vld [vmem:[%s12462_s0 + $0x58] sm:$0xff] }
 0x2fa   :  { %7208 = vmatpush1.bf16.msra.mxu0 %v13186_v14  ;;  %v13224_v27 = vld [vmem:[#allocation68_spill] sm:$0xff]  ;;  %v11581_v14 = vld [vmem:[%s12462_s0 + $0x50] sm:$0xff] }
 0x2fb   :  { %v2274_v37 = vadd.f32 %v5140_v7, %v11454_v18  ;;  %7210 = vmatprep.subr.bf16.mxu0 %v13187_v36  ;;  %v13197_v18 = vld [vmem:[#allocation42_spill] sm:$0xff]  ;;  %v13223_v7 = vld [vmem:[#allocation47_spill] sm:$0xff]  ;;  %v13226_v36 = vld [vmem:[#allocation49_spill] sm:$0xff] }
 0x2fc   :  { %7168 = vmatpush1.bf16.msra.mxu1 %v13188_v10  ;;  %v13227_v10 = vld [vmem:[#allocation51_spill] sm:$0xff] }
 0x2fd   :  { %7170 = vmatprep.subr.bf16.mxu1 %v13189_v12  ;;  %v13228_v12 = vld [vmem:[#allocation72_spill] sm:$0xff] }
 0x2fe   :  { %7212 = vmatpush1.bf16.msra.mxu0 %v13190_v63  ;;  %v13229_v63 = vld [vmem:[#allocation74_spill] sm:$0xff] }
 0x2ff   :  { %7214 = vmatprep.subr.bf16.mxu0 %v13191_v2  ;;  %v13230_v2 = vld [vmem:[#allocation53_spill] sm:$0xff] }
 0x300   :  { %7172 = vmatpush1.bf16.msra.mxu1 %v13192_v48  ;;  %v13231_v48 = vld [vmem:[#allocation55_spill] sm:$0xff] }
 0x301   :  { %7174 = vmatprep.subr.bf16.mxu1 %v13193_v59  ;;  %v13232_v59 = vld [vmem:[#allocation76_spill] sm:$0xff] }
 0x302   :  { %7216 = vmatpush1.bf16.msra.mxu0 %v13194_v15  ;;  %v13233_v15 = vld [vmem:[#allocation78_spill] sm:$0xff] }
 0x303   :  { %7218 = vmatprep.subr.bf16.mxu0 %v13195_v56  ;;  %v13234_v56 = vld [vmem:[#allocation57_spill] sm:$0xff] }
 0x304   :  { %7176 = vmatpush1.bf16.msra.mxu1 %v13196_v55  ;;  %v13235_v55 = vld [vmem:[#allocation59_spill] sm:$0xff] }
 0x305   :  { %7178 = vmatprep.subr.bf16.mxu1 %v13197_v18  ;;  %v13236_v18 = vld [vmem:[#allocation80_spill] sm:$0xff] }
 0x306   :  { %7220 = vmatpush1.bf16.msra.mxu0 %v13198_v52  ;;  %v13237_v52 = vld [vmem:[#allocation82_spill] sm:$0xff] }
 0x307   :  { %7222 = vmatprep.subr.bf16.mxu0 %v13199_v50  ;;  %v13238_v50 = vld [vmem:[#allocation61_spill] sm:$0xff] }
 0x308   :  { %7180 = vmatpush1.bf16.msra.mxu1 %v13200_v61  ;;  %v13239_v61 = vld [vmem:[#allocation63_spill] sm:$0xff] }
 0x309   :  { %7182 = vmatprep.subr.bf16.mxu1 %v13201_v26  ;;  %v13240_v26 = vld [vmem:[#allocation84_spill] sm:$0xff] }
 0x30a   :  { %7224 = vmatpush1.bf16.msra.mxu0 %v13202_v44  ;;  %v13241_v44 = vld [vmem:[#allocation86_spill] sm:$0xff] }
 0x30b   :  { %7226 = vmatprep.subr.bf16.mxu0 %v13203_v22  ;;  %v13242_v22 = vld [vmem:[#allocation65_spill] sm:$0xff] }
 0x30c   :  { %7184 = vmatpush1.bf16.msra.mxu1 %v13204_v39 }
 0x30d   :  { %7186 = vmatprep.subr.bf16.mxu1 %v13205_v16  ;;  %v13243_v16 = vld [vmem:[#allocation67_spill] sm:$0xff] }
 0x30e   :  { %7228 = vmatpush1.bf16.msra.mxu0 %v13206_v38 }
 0x30f   :  { %7230 = vmatprep.subr.bf16.mxu0 %v13207_v33  ;;  %v13244_v33 = vld [vmem:[#allocation88_spill] sm:$0xff] }
 0x310   :  { %7188 = vmatpush1.bf16.msra.mxu1 %v13208_v6 }
 0x311   :  { %7190 = vmatprep.subr.bf16.mxu1 %v13209_v49  ;;  %v13245_v49 = vld [vmem:[#allocation90_spill] sm:$0xff] }
 0x312   :  { %7232 = vmatpush1.bf16.msra.mxu0 %v13210_v60  ;;  %v5173_v17 = vpop.f32.mrb[32].mxu1  ;;  %v13246_v60 = vld [vmem:[#allocation69_spill] sm:$0xff] }
 0x313   :  { %v5174_v21 = vpop.f32.mrb[33].mxu1  ;;  %7234 = vmatprep.subr.bf16.mxu0 %v13211_v57  ;;  %v13247_v57 = vld [vmem:[#allocation71_spill] sm:$0xff] }
 0x314   :  { %v5175_v34 = vadd.f32 %v5174_v21, %v5173_v17  ;;  %7192 = vmatpush1.bf16.msra.mxu1 %v13212_v62  ;;  %v13248_v62 = vld [vmem:[#allocation92_spill] sm:$0xff] }
 0x315   :  { %7194 = vmatprep.subr.bf16.mxu1 %v13213_v51 }
 0x316   :  { %v2344_v35 = vadd.f32 %v5175_v34, %v2269_v47  ;;  %7236 = vmatpush1.bf16.msra.mxu0 %v13214_v28  ;;  %v5176_v23 = vpop.f32.mrb[34].mxu1  ;;  %v11565_v47 = vld [vmem:[%s12462_s0 + $0x40] sm:$0xff]  ;;  %v13249_v28 = vld [vmem:[#allocation94_spill] sm:$0xff]  ;;  %s4525_s0 = sshll.u32 %s7848_s7, 4  ;;  %s4526_s0 = int_to_ptr.vmem [resolvable:$true] %s4525_s0 }
 0x317   :  { %v5177_v25 = vpop.f32.mrb[35].mxu1  ;;  %7238 = vmatprep.subr.bf16.mxu0 %v13215_v40  ;;  %v13251_v40 = vld [vmem:[#allocation75_spill] sm:$0xff]  ;;  %s7824_s2 = scalar_lea.vmem %s4526_s0, 256  ;;  %p7829_p1 = scmp.lt.s32.totalorder %s4526_s0, %s4526_s0 }
 0x318   :  { %v5178_v54 = vadd.f32 %v5177_v25, %v5176_v23  ;;  %7196 = vmatpush1.bf16.msra.mxu1 %v13216_v32  ;;  %v13250_v23 = vld [vmem:[#allocation73_spill] sm:$0xff]  ;;  %p7825_p0 = scmp.ne.s32.totalorder %s4526_s0, %s7824_s2  ;;  %p7830_p2 = scmp.lt.s32.totalorder %s7824_s2, %s7824_s2 }
 0x319   :  { %7198 = vmatprep.subr.bf16.mxu1 %v13217_v58  ;;  %v13254_v32 = vld [vmem:[#allocation77_spill] sm:$0xff]  ;;  %v13255_v58 = vld [vmem:[#allocation79_spill] sm:$0xff] }
 0x31a   :  { %v2349_v29 = vadd.f32 %v5178_v54, %v2274_v37  ;;  %7240 = vmatpush1.bf16.msra.mxu0 %v13218_v30  ;;  %v13225_v37 = vld [vmem:[#allocation70_spill] sm:$0xff]  ;;  %v13252_v54 = vld [vmem:[#allocation96_spill] sm:$0xff]  ;;  %p7831_p3 = por %p7830_p2, %p7829_p1 }
 0x31b   :  { %7242 = vmatprep.subr.bf16.mxu0 %v13219_v11  ;;  %v13256_v30 = vld [vmem:[#allocation100_spill] sm:$0xff]  ;;  %v13257_v11 = vld [vmem:[#allocation102_spill] sm:$0xff] }
 0x31c   :  { %7200 = vmatpush1.bf16.msra.mxu1 %v13220_v13  ;;  %v13258_v13 = vld [vmem:[#allocation81_spill] sm:$0xff]  ;;  %p7832_p4 = pnand %p7831_p3, %p7825_p0 }
 0x31d   :  { %7266 = vmatprep.subr.bf16.mxu1 %v13221_v20  ;;  %v13259_v20 = vld [vmem:[#allocation83_spill] sm:$0xff] }
 0x31e   :  { %7244 = vmatpush1.bf16.msra.mxu0 %v13222_v3  ;;  %v13260_v3 = vld [vmem:[#allocation104_spill] sm:$0xff] }
 0x31f   :  { %3178 = vmatmul.mubr.f32.vlgmr.msra.gmra.mrb[52].mxu1 %v11565_v47  ;;  %7246 = vmatprep.subr.bf16.mxu0 %v13223_v7  ;;  %v13262_v7 = vld [vmem:[#allocation85_spill] sm:$0xff] }
 0x320   :  { %7268 = vmatpush1.bf16.msra.mxu1 %v13224_v27  ;;  %3183 = vmatprep.mubr.f32.mxu1 %v11571_v5  ;;  %v13263_v27 = vld [vmem:[#allocation87_spill] sm:$0xff] }
 0x321   :  { %7270 = vmatprep.subr.bf16.mxu1 %v13225_v37  ;;  %v13264_v37 = vld [vmem:[#allocation108_spill] sm:$0xff] }
 0x322   :  { %7248 = vmatpush1.bf16.msra.mxu0 %v13226_v36  ;;  %v13265_v36 = vld [vmem:[#allocation110_spill] sm:$0xff] }
 0x323   :  { %7250 = vmatprep.subr.bf16.mxu0 %v13227_v10  ;;  %3184 = vmatmul.mubr.f32.gmra.mrb[54].mxu1 %v11581_v14  ;;  %v13266_v10 = vld [vmem:[#allocation89_spill] sm:$0xff] }
 0x324   :  { %7272 = vmatpush1.bf16.msra.mxu1 %v13228_v12  ;;  %3331 = vmatprep.mubr.f32.mxu1 %v11486_v8  ;;  %v13267_v12 = vld [vmem:[#allocation91_spill] sm:$0xff] }
 0x325   :  { %7274 = vmatprep.subr.bf16.mxu1 %v13229_v63  ;;  %v13268_v63 = vld [vmem:[#allocation112_spill] sm:$0xff] }
 0x326   :  { %7252 = vmatpush1.bf16.msra.mxu0 %v13230_v2  ;;  %v13269_v2 = vld [vmem:[#allocation114_spill] sm:$0xff] }
 0x327   :  { %7254 = vmatprep.subr.bf16.mxu0 %v13231_v48  ;;  %v13270_v48 = vld [vmem:[#allocation93_spill] sm:$0xff] }
 0x328   :  { %7276 = vmatpush1.bf16.msra.mxu1 %v13232_v59  ;;  %v13271_v59 = vld [vmem:[#allocation95_spill] sm:$0xff] }
 0x329   :  { %7278 = vmatprep.subr.bf16.mxu1 %v13233_v15  ;;  %v13272_v15 = vld [vmem:[#allocation116_spill] sm:$0xff] }
 0x32a   :  { %7256 = vmatpush1.bf16.msra.mxu0 %v13234_v56  ;;  %v13273_v56 = vld [vmem:[#allocation118_spill] sm:$0xff] }
 0x32b   :  { %7258 = vmatprep.subr.bf16.mxu0 %v13235_v55  ;;  %v13274_v55 = vld [vmem:[#allocation97_spill] sm:$0xff] }
 0x32c   :  { %7280 = vmatpush1.bf16.msra.mxu1 %v13236_v18 }
 0x32d   :  { %7282 = vmatprep.subr.bf16.mxu1 %v13237_v52 }
 0x32e   :  { %7260 = vmatpush1.bf16.msra.mxu0 %v13238_v50  ;;  %v13275_v50 = vld [vmem:[#allocation99_spill] sm:$0xff] }
 0x32f   :  { %7262 = vmatprep.subr.bf16.mxu0 %v13239_v61 }
 0x330   :  { %7284 = vmatpush1.bf16.msra.mxu1 %v13240_v26  ;;  %v13276_v26 = vld [vmem:[#allocation120_spill] sm:$0xff] }
 0x331   :  { %7286 = vmatprep.subr.bf16.mxu1 %v13241_v44  ;;  %v13277_v44 = vld [vmem:[#allocation122_spill] sm:$0xff] }
 0x332   :  { %7264 = vmatpush1.bf16.msra.mxu0 %v13242_v22 }
 0x333   :  { %v5211_v39 = vpop.f32.mrb[36].mxu0  ;;  %7330 = vmatprep.subr.bf16.mxu0 %v13243_v16 }
 0x334   :  { %v5212_v38 = vpop.f32.mrb[37].mxu0  ;;  %7288 = vmatpush1.bf16.msra.mxu1 %v13244_v33  ;;  %v13279_v33 = vld [vmem:[#allocation103_spill] sm:$0xff] }
 0x335   :  { %v5213_v6 = vadd.f32 %v5212_v38, %v5211_v39  ;;  %3255 = vmatmul.mubr.f32.vlgmr.msra.gmra.mrb[54].mxu0 %v11565_v47  ;;  %7290 = vmatprep.subr.bf16.mxu1 %v13245_v49  ;;  %v13278_v39 = vld [vmem:[#allocation101_spill] sm:$0xff]  ;;  %v13280_v49 = vld [vmem:[#allocation124_spill] sm:$0xff] }
 0x336   :  { %7332 = vmatpush1.bf16.msra.mxu0 %v13246_v60  ;;  %3260 = vmatprep.mubr.f32.mxu0 %v11571_v5  ;;  %v13281_v60 = vld [vmem:[#allocation126_spill] sm:$0xff] }
 0x337   :  { %v2419_v17 = vadd.f32 %v5213_v6, %v2344_v35  ;;  %v5214_v21 = vpop.f32.mrb[38].mxu0  ;;  %7334 = vmatprep.subr.bf16.mxu0 %v13247_v57  ;;  %v13253_v35 = vld [vmem:[#allocation98_spill] sm:$0xff]  ;;  %v13282_v57 = vld [vmem:[#allocation105_spill] sm:$0xff] }
 0x338   :  { %v5215_v34 = vpop.f32.mrb[39].mxu0  ;;  %7292 = vmatpush1.bf16.msra.mxu1 %v13248_v62  ;;  %v13284_v62 = vld [vmem:[#allocation128_spill] sm:$0xff] }
 0x339   :  { %v5216_v51 = vadd.f32 %v5215_v34, %v5214_v21  ;;  %7294 = vmatprep.subr.bf16.mxu1 %v13249_v28  ;;  %3261 = vmatmul.mubr.f32.gmra.mrb[56].mxu0 %v11581_v14  ;;  %v13283_v34 = vld [vmem:[#allocation107_spill] sm:$0xff] }
 0x33a   :  { %7336 = vmatpush1.bf16.msra.mxu0 %v13250_v23  ;;  %3408 = vmatprep.mubr.f32.mxu0 %v11486_v8  ;;  %v13287_v28 = vld [vmem:[#allocation111_spill] sm:$0xff]  ;;  %v13288_v23 = vld [vmem:[#allocation132_spill] sm:$0xff] }
 0x33b   :  { %v2424_v25 = vadd.f32 %v5216_v51, %v2349_v29  ;;  %7338 = vmatprep.subr.bf16.mxu0 %v13251_v40  ;;  %v13261_v29 = vld [vmem:[#allocation106_spill] sm:$0xff] }
 0x33c   :  { %7296 = vmatpush1.bf16.msra.mxu1 %v13252_v54  ;;  %v13285_v51 = vld [vmem:[#allocation130_spill] sm:$0xff]  ;;  %v13291_v54 = vld [vmem:[#allocation115_spill] sm:$0xff] }
 0x33d   :  { %7298 = vmatprep.subr.bf16.mxu1 %v13253_v35  ;;  %v13289_v40 = vld [vmem:[#allocation134_spill] sm:$0xff]  ;;  %v13292_v35 = vld [vmem:[#allocation136_spill] sm:$0xff] }
 0x33e   :  { %7340 = vmatpush1.bf16.msra.mxu0 %v13254_v32  ;;  %v13293_v32 = vld [vmem:[#allocation138_spill] sm:$0xff] }
 0x33f   :  { %7342 = vmatprep.subr.bf16.mxu0 %v13255_v58  ;;  %v13294_v58 = vld [vmem:[#allocation117_spill] sm:$0xff] }
 0x340   :  { %7300 = vmatpush1.bf16.msra.mxu1 %v13256_v30  ;;  %v13295_v30 = vld [vmem:[#allocation119_spill] sm:$0xff] }
 0x341   :  { %7302 = vmatprep.subr.bf16.mxu1 %v13257_v11  ;;  %v13296_v11 = vld [vmem:[#allocation140_spill] sm:$0xff] }
 0x342   :  { %7344 = vmatpush1.bf16.msra.mxu0 %v13258_v13  ;;  %v13297_v13 = vld [vmem:[#allocation142_spill] sm:$0xff] }
 0x343   :  { %7346 = vmatprep.subr.bf16.mxu0 %v13259_v20  ;;  %v13298_v20 = vld [vmem:[#allocation121_spill] sm:$0xff] }
 0x344   :  { %7304 = vmatpush1.bf16.msra.mxu1 %v13260_v3  ;;  %v13299_v3 = vld [vmem:[#allocation123_spill] sm:$0xff] }
 0x345   :  { %7306 = vmatprep.subr.bf16.mxu1 %v13261_v29  ;;  %v13300_v29 = vld [vmem:[#allocation144_spill] sm:$0xff] }
 0x346   :  { %7348 = vmatpush1.bf16.msra.mxu0 %v13262_v7  ;;  %v13301_v7 = vld [vmem:[#allocation146_spill] sm:$0xff] }
 0x347   :  { %7350 = vmatprep.subr.bf16.mxu0 %v13263_v27  ;;  %v13302_v27 = vld [vmem:[#allocation125_spill] sm:$0xff] }
 0x348   :  { %7308 = vmatpush1.bf16.msra.mxu1 %v13264_v37  ;;  %v13303_v37 = vld [vmem:[#allocation127_spill] sm:$0xff] }
 0x349   :  { %7310 = vmatprep.subr.bf16.mxu1 %v13265_v36  ;;  %v13304_v36 = vld [vmem:[#allocation148_spill] sm:$0xff] }
 0x34a   :  { %7352 = vmatpush1.bf16.msra.mxu0 %v13266_v10  ;;  %v13305_v10 = vld [vmem:[#allocation150_spill] sm:$0xff] }
 0x34b   :  { %7354 = vmatprep.subr.bf16.mxu0 %v13267_v12  ;;  %v13306_v12 = vld [vmem:[#allocation129_spill] sm:$0xff] }
 0x34c   :  { %7312 = vmatpush1.bf16.msra.mxu1 %v13268_v63 }
 0x34d   :  { %7314 = vmatprep.subr.bf16.mxu1 %v13269_v2 }
 0x34e   :  { %7356 = vmatpush1.bf16.msra.mxu0 %v13270_v48  ;;  %v13307_v48 = vld [vmem:[#allocation131_spill] sm:$0xff] }
 0x34f   :  { %7358 = vmatprep.subr.bf16.mxu0 %v13271_v59 }
 0x350   :  { %7316 = vmatpush1.bf16.msra.mxu1 %v13272_v15  ;;  %v13308_v15 = vld [vmem:[#allocation152_spill] sm:$0xff] }
 0x351   :  { %7318 = vmatprep.subr.bf16.mxu1 %v13273_v56  ;;  %v13309_v56 = vld [vmem:[#allocation154_spill] sm:$0xff] }
 0x352   :  { %7360 = vmatpush1.bf16.msra.mxu0 %v13274_v55  ;;  %v5249_v18 = vpop.f32.mrb[36].mxu1 }
 0x353   :  { %v5250_v52 = vpop.f32.mrb[37].mxu1  ;;  %7362 = vmatprep.subr.bf16.mxu0 %v13275_v50 }
 0x354   :  { %v5251_v61 = vadd.f32 %v5250_v52, %v5249_v18  ;;  %7320 = vmatpush1.bf16.msra.mxu1 %v13276_v26  ;;  %v13310_v18 = vld [vmem:[#allocation133_spill] sm:$0xff] }
 0x355   :  { %7322 = vmatprep.subr.bf16.mxu1 %v13277_v44 }
 0x356   :  { %v2494_v22 = vadd.f32 %v5251_v61, %v2419_v17  ;;  %7364 = vmatpush1.bf16.msra.mxu0 %v13278_v39  ;;  %v5252_v16 = vpop.f32.mrb[38].mxu1  ;;  %v13286_v17 = vld [vmem:[#allocation109_spill] sm:$0xff]  ;;  %v13311_v61 = vld [vmem:[#allocation135_spill] sm:$0xff]  ;;  %v13312_v39 = vld [vmem:[#allocation156_spill] sm:$0xff] }
 0x357   :  { %v5253_v38 = vpop.f32.mrb[39].mxu1  ;;  %7366 = vmatprep.subr.bf16.mxu0 %v13279_v33 }
 0x358   :  { %v5254_v6 = vadd.f32 %v5253_v38, %v5252_v16  ;;  %7324 = vmatpush1.bf16.msra.mxu1 %v13280_v49  ;;  %v13313_v38 = vld [vmem:[#allocation158_spill] sm:$0xff]  ;;  %v13315_v49 = vld [vmem:[#allocation139_spill] sm:$0xff] }
 0x359   :  { %7326 = vmatprep.subr.bf16.mxu1 %v13281_v60 }
 0x35a   :  { %v2499_v21 = vadd.f32 %v5254_v6, %v2424_v25  ;;  %7368 = vmatpush1.bf16.msra.mxu0 %v13282_v57  ;;  %v13290_v25 = vld [vmem:[#allocation113_spill] sm:$0xff] }
 0x35b   :  { %7370 = vmatprep.subr.bf16.mxu0 %v13283_v34  ;;  %v13316_v34 = vld [vmem:[#allocation160_spill] sm:$0xff] }
 0x35c   :  { %7328 = vmatpush1.bf16.msra.mxu1 %v13284_v62 }
 0x35d   :  { %7394 = vmatprep.subr.bf16.mxu1 %v13285_v51  ;;  %v13317_v51 = vld [vmem:[#allocation162_spill] sm:$0xff] }
 0x35e   :  { %7372 = vmatpush1.bf16.msra.mxu0 %v13286_v17 }
 0x35f   :  { %3332 = vmatmul.mubr.f32.vlgmr.msra.gmra.mrb[56].mxu1 %v11565_v47  ;;  %7374 = vmatprep.subr.bf16.mxu0 %v13287_v28  ;;  %v13318_v28 = vld [vmem:[#allocation141_spill] sm:$0xff] }
 0x360   :  { %7396 = vmatpush1.bf16.msra.mxu1 %v13288_v23  ;;  %3337 = vmatprep.mubr.f32.mxu1 %v11571_v5  ;;  %v13319_v23 = vld [vmem:[#allocation143_spill] sm:$0xff] }
 0x361   :  { %7398 = vmatprep.subr.bf16.mxu1 %v13289_v40  ;;  %v13320_v40 = vld [vmem:[#allocation164_spill] sm:$0xff] }
 0x362   :  { %7376 = vmatpush1.bf16.msra.mxu0 %v13290_v25  ;;  %v13321_v25 = vld [vmem:[#allocation166_spill] sm:$0xff] }
 0x363   :  { %3338 = vmatmul.mubr.f32.gmra.mrb[58].mxu1 %v11581_v14  ;;  %7378 = vmatprep.subr.bf16.mxu0 %v13291_v54  ;;  %v13322_v54 = vld [vmem:[#allocation145_spill] sm:$0xff] }
 0x364   :  { %7400 = vmatpush1.bf16.msra.mxu1 %v13292_v35  ;;  %3485 = vmatprep.mubr.f32.mxu1 %v11486_v8  ;;  %v13323_v35 = vld [vmem:[#allocation147_spill] sm:$0xff] }
 0x365   :  { %7402 = vmatprep.subr.bf16.mxu1 %v13293_v32  ;;  %v13324_v32 = vld [vmem:[#allocation168_spill] sm:$0xff] }
 0x366   :  { %7380 = vmatpush1.bf16.msra.mxu0 %v13294_v58  ;;  %v13325_v58 = vld [vmem:[#allocation170_spill] sm:$0xff] }
 0x367   :  { %7382 = vmatprep.subr.bf16.mxu0 %v13295_v30  ;;  %v13326_v30 = vld [vmem:[#allocation149_spill] sm:$0xff] }
 0x368   :  { %7404 = vmatpush1.bf16.msra.mxu1 %v13296_v11  ;;  %v13327_v11 = vld [vmem:[#allocation151_spill] sm:$0xff] }
 0x369   :  { %7406 = vmatprep.subr.bf16.mxu1 %v13297_v13  ;;  %v13328_v13 = vld [vmem:[#allocation172_spill] sm:$0xff] }
 0x36a   :  { %7384 = vmatpush1.bf16.msra.mxu0 %v13298_v20  ;;  %v13329_v20 = vld [vmem:[#allocation174_spill] sm:$0xff] }
 0x36b   :  { %7386 = vmatprep.subr.bf16.mxu0 %v13299_v3  ;;  %v13330_v3 = vld [vmem:[#allocation153_spill] sm:$0xff] }
 0x36c   :  { %7408 = vmatpush1.bf16.msra.mxu1 %v13300_v29  ;;  %v13331_v29 = vld [vmem:[#allocation155_spill] sm:$0xff] }
 0x36d   :  { %7410 = vmatprep.subr.bf16.mxu1 %v13301_v7  ;;  %v13332_v7 = vld [vmem:[#allocation176_spill] sm:$0xff] }
 0x36e   :  { %7388 = vmatpush1.bf16.msra.mxu0 %v13302_v27  ;;  %v13333_v27 = vld [vmem:[#allocation178_spill] sm:$0xff] }
 0x36f   :  { %7390 = vmatprep.subr.bf16.mxu0 %v13303_v37  ;;  %v13334_v37 = vld [vmem:[#allocation157_spill] sm:$0xff] }
 0x370   :  { %7412 = vmatpush1.bf16.msra.mxu1 %v13304_v36  ;;  %v13335_v36 = vld [vmem:[#allocation159_spill] sm:$0xff] }
 0x371   :  { %7414 = vmatprep.subr.bf16.mxu1 %v13305_v10  ;;  %v13336_v10 = vld [vmem:[#allocation180_spill] sm:$0xff] }
 0x372   :  { %7392 = vmatpush1.bf16.msra.mxu0 %v13306_v12  ;;  %v5297_v63 = vpop.f32.mrb[40].mxu1  ;;  %v13337_v12 = vld [vmem:[#allocation182_spill] sm:$0xff] }
 0x373   :  { %v5298_v2 = vpop.f32.mrb[41].mxu1  ;;  %7458 = vmatprep.subr.bf16.mxu0 %v13307_v48 }
 0x374   :  { %v5299_v59 = vadd.f32 %v5298_v2, %v5297_v63  ;;  %7416 = vmatpush1.bf16.msra.mxu1 %v13308_v15  ;;  %v13338_v63 = vld [vmem:[#allocation161_spill] sm:$0xff] }
 0x375   :  { %3409 = vmatmul.mubr.f32.vlgmr.msra.gmra.mrb[58].mxu0 %v11565_v47  ;;  %7418 = vmatprep.subr.bf16.mxu1 %v13309_v56  ;;  %v13340_v56 = vld [vmem:[#allocation184_spill] sm:$0xff] }
 0x376   :  { %v7801_v55 = vadd.f32 %v5299_v59, %v2494_v22  ;;  %7460 = vmatpush1.bf16.msra.mxu0 %v13310_v18  ;;  %v5300_v52 = vpop.f32.mrb[42].mxu1  ;;  %3414 = vmatprep.mubr.f32.mxu0 %v11571_v5  ;;  %v13314_v22 = vld [vmem:[#allocation137_spill] sm:$0xff]  ;;  %v13339_v59 = vld [vmem:[#allocation163_spill] sm:$0xff] }
 0x377   :  { %v5301_v50 = vpop.f32.mrb[43].mxu1  ;;  %7462 = vmatprep.subr.bf16.mxu0 %v13311_v61 }
 0x378   :  { %v5302_v26 = vadd.f32 %v5301_v50, %v5300_v52  ;;  %v5335_v44 = vpop.f32.mrb[42].mxu0  ;;  %7420 = vmatpush1.bf16.msra.mxu1 %v13312_v39  ;;  %v13342_v52 = vld [vmem:[#allocation165_spill] sm:$0xff] }
 0x379   :  { %v5336_v16 = vpop.f32.mrb[43].mxu0  ;;  %3415 = vmatmul.mubr.f32.gmra.mrb[60].mxu0 %v11581_v14  ;;  %7422 = vmatprep.subr.bf16.mxu1 %v13313_v38 }
 0x37a   :  { %v7793_v33 = vadd.f32 %v5302_v26, %v2499_v21  ;;  %v5337_v6 = vadd.f32 %v5336_v16, %v5335_v44  ;;  %7464 = vmatpush1.bf16.msra.mxu0 %v13314_v22  ;;  %3562 = vmatprep.mubr.f32.mxu0 %v11486_v8  ;;  %v13343_v26 = vld [vmem:[#allocation167_spill] sm:$0xff]  ;;  %v13344_v16 = vld [vmem:[#allocation188_spill] sm:$0xff] }
 0x37b   :  { %7466 = vmatprep.subr.bf16.mxu0 %v13315_v49  ;;  %v13346_v49 = vld [vmem:[#allocation169_spill] sm:$0xff] }
 0x37c   :  { %v7802_v60 = vadd.f32 %v7801_v55, %v5337_v6  ;;  %v5338_v57 = vpop.f32.mrb[44].mxu0  ;;  %7424 = vmatpush1.bf16.msra.mxu1 %v13316_v34  ;;  %v13341_v55 = vld [vmem:[#allocation186_spill] sm:$0xff] }
 0x37d   :  { %v5339_v62 = vpop.f32.mrb[45].mxu0  ;;  %7426 = vmatprep.subr.bf16.mxu1 %v13317_v51 }
 0x37e   :  { %v5340_v17 = vadd.f32 %v5339_v62, %v5338_v57  ;;  %7468 = vmatpush1.bf16.msra.mxu0 %v13318_v28  ;;  %v13347_v57 = vld [vmem:[#allocation171_spill] sm:$0xff]  ;;  %v13348_v62 = vld [vmem:[#allocation192_spill] sm:$0xff] }
 0x37f   :  { %7470 = vmatprep.subr.bf16.mxu0 %v13319_v23  ;;  %v13350_v23 = vld [vmem:[#allocation173_spill] sm:$0xff] }
 0x380   :  { %v7794_v21 = vadd.f32 %v7793_v33, %v5340_v17  ;;  %7428 = vmatpush1.bf16.msra.mxu1 %v13320_v40  ;;  %v13345_v33 = vld [vmem:[#allocation190_spill] sm:$0xff]  ;;  %v13351_v40 = vld [vmem:[#allocation175_spill] sm:$0xff] }
 0x381   :  { %7430 = vmatprep.subr.bf16.mxu1 %v13321_v25  ;;  %v13349_v17 = vld [vmem:[#allocation194_spill] sm:$0xff]  ;;  %v13352_v25 = vld [vmem:[#allocation195_spill] sm:$0xff] }
 0x382   :  { %7472 = vmatpush1.bf16.msra.mxu0 %v13322_v54  ;;  %v13353_v54 = vld [vmem:[#allocation196_spill] sm:$0xff] }
 0x383   :  { %7474 = vmatprep.subr.bf16.mxu0 %v13323_v35  ;;  %v13354_v35 = vld [vmem:[#allocation177_spill] sm:$0xff] }
 0x384   :  { %7432 = vmatpush1.bf16.msra.mxu1 %v13324_v32  ;;  %v13355_v32 = vld [vmem:[#allocation179_spill] sm:$0xff] }
 0x385   :  { %7434 = vmatprep.subr.bf16.mxu1 %v13325_v58  ;;  %v13356_v58 = vld [vmem:[#allocation197_spill] sm:$0xff] }
 0x386   :  { %7476 = vmatpush1.bf16.msra.mxu0 %v13326_v30  ;;  %v13357_v30 = vld [vmem:[#allocation198_spill] sm:$0xff] }
 0x387   :  { %7478 = vmatprep.subr.bf16.mxu0 %v13327_v11  ;;  %v13358_v11 = vld [vmem:[#allocation181_spill] sm:$0xff] }
 0x388   :  { %7436 = vmatpush1.bf16.msra.mxu1 %v13328_v13  ;;  %v13359_v13 = vld [vmem:[#allocation183_spill] sm:$0xff] }
 0x389   :  { %7438 = vmatprep.subr.bf16.mxu1 %v13329_v20  ;;  %v13360_v20 = vld [vmem:[#allocation199_spill] sm:$0xff] }
 0x38a   :  { %7480 = vmatpush1.bf16.msra.mxu0 %v13330_v3  ;;  %v13361_v3 = vld [vmem:[#allocation200_spill] sm:$0xff] }
 0x38b   :  { %7482 = vmatprep.subr.bf16.mxu0 %v13331_v29  ;;  %v13362_v29 = vld [vmem:[#allocation185_spill] sm:$0xff] }
 0x38c   :  { %7440 = vmatpush1.bf16.msra.mxu1 %v13332_v7  ;;  %v13363_v7 = vld [vmem:[#allocation187_spill] sm:$0xff] }
 0x38d   :  { %7442 = vmatprep.subr.bf16.mxu1 %v13333_v27  ;;  %v13364_v27 = vld [vmem:[#allocation201_spill] sm:$0xff] }
 0x38e   :  { %7484 = vmatpush1.bf16.msra.mxu0 %v13334_v37  ;;  %v4765_v37 = vld [vmem:[%s12465_s3 + $0xd08] sm:$0xff] }
 0x38f   :  { %7486 = vmatprep.subr.bf16.mxu0 %v13335_v36  ;;  %v13365_v36 = vld [vmem:[#allocation202_spill] sm:$0xff] }
 0x390   :  { %7444 = vmatpush1.bf16.msra.mxu1 %v13336_v10  ;;  %v13366_v10 = vld [vmem:[#allocation189_spill] sm:$0xff] }
 0x391   :  { %7446 = vmatprep.subr.bf16.mxu1 %v13337_v12  ;;  %v13367_v12 = vld [vmem:[#allocation191_spill] sm:$0xff] }
 0x392   :  { %7488 = vmatpush1.bf16.msra.mxu0 %v13338_v63  ;;  %v5373_v2 = vpop.f32.mrb[44].mxu1 }
 0x393   :  { %v5374_v48 = vpop.f32.mrb[45].mxu1  ;;  %7490 = vmatprep.subr.bf16.mxu0 %v13339_v59  ;;  %v13368_v59 = vld [vmem:[#allocation203_spill] sm:$0xff] }
 0x394   :  { %v5375_v15 = vadd.f32 %v5374_v48, %v5373_v2  ;;  %7448 = vmatpush1.bf16.msra.mxu1 %v13340_v56  ;;  %v4748_v2 = vld [vmem:[%s12465_s3 + $0xc80] sm:$0xff]  ;;  %v4749_v48 = vld [vmem:[%s12465_s3 + $0xc88] sm:$0xff]  ;;  %v4767_v56 = vld [vmem:[%s12465_s3 + $0xd18] sm:$0xff] }
 0x395   :  { %7450 = vmatprep.subr.bf16.mxu1 %v13341_v55  ;;  %v13369_v55 = vld [vmem:[#allocation204_spill] sm:$0xff] }
 0x396   :  { %v7803_v18 = vadd.f32 %v7802_v60, %v5375_v15  ;;  %7492 = vmatpush1.bf16.msra.mxu0 %v13342_v52  ;;  %v5376_v50 = vpop.f32.mrb[46].mxu1  ;;  %v4766_v15 = vld [vmem:[%s12465_s3 + $0xd10] sm:$0xff] }
 0x397   :  { %v5377_v61 = vpop.f32.mrb[47].mxu1  ;;  %7494 = vmatprep.subr.bf16.mxu0 %v13343_v26  ;;  %v7557_v26 = vpack.c.bf16 %v4767_v56, %v4766_v15 }
 0x398   :  { %v5378_v44 = vadd.f32 %v5377_v61, %v5376_v50  ;;  %v5411_v39 = vpop.f32.mrb[46].mxu0  ;;  %7452 = vmatpush1.bf16.msra.mxu1 %v13344_v16  ;;  %v7555_v50 = vpack.c.bf16 %v4749_v48, %v4748_v2  ;;  %v4772_v2 = vld [vmem:[%s12465_s3 + $0xd40] sm:$0xff]  ;;  %v4773_v48 = vld [vmem:[%s12465_s3 + $0xd48] sm:$0xff] }
 0x399   :  { %v5412_v38 = vpop.f32.mrb[47].mxu0  ;;  %7454 = vmatprep.subr.bf16.mxu1 %v13345_v33  ;;  %v4768_v33 = vld [vmem:[%s12465_s3 + $0xd20] sm:$0xff] }
 0x39a   :  { %v7795_v6 = vadd.f32 %v7794_v21, %v5378_v44  ;;  %v5413_v22 = vadd.f32 %v5412_v38, %v5411_v39  ;;  %7496 = vmatpush1.bf16.msra.mxu0 %v13346_v49  ;;  %v4750_v44 = vld [vmem:[%s12465_s3 + $0xc90] sm:$0xff]  ;;  %v4751_v39 = vld [vmem:[%s12465_s3 + $0xc98] sm:$0xff] }
 0x39b   :  { %7498 = vmatprep.subr.bf16.mxu0 %v13347_v57  ;;  %v13371_v38 = vld [vmem:[#allocation205_spill] sm:$0xff] }
 0x39c   :  { %v7804_v60 = vadd.f32 %v7803_v18, %v5413_v22  ;;  %v5414_v34 = vpop.f32.mrb[48].mxu0  ;;  %7456 = vmatpush1.bf16.msra.mxu1 %v13348_v62  ;;  %v13370_v18 = vld [vmem:[#allocation193_spill] sm:$0xff]  ;;  %v13372_v22 = vld [vmem:[#allocation206_spill] sm:$0xff]  ;;  %v4796_v62 = vld [vmem:[%s12465_s3 + $0xe00] sm:$0xff] }
 0x39d   :  { %v5415_v51 = vpop.f32.mrb[49].mxu0  ;;  %7522 = vmatprep.subr.bf16.mxu1 %v13349_v17 }
 0x39e   :  { %v5416_v28 = vadd.f32 %v5415_v51, %v5414_v34  ;;  %7500 = vmatpush1.bf16.msra.mxu0 %v13350_v23  ;;  %v7559_v34 = vpack.c.bf16 %v4751_v39, %v4750_v44  ;;  %v4797_v51 = vld [vmem:[%s12465_s3 + $0xe08] sm:$0xff]  ;;  %v7569_v44 = vpack.c.bf16 %v4773_v48, %v4772_v2  ;;  %v4756_v39 = vld [vmem:[%s12465_s3 + $0xcc0] sm:$0xff]  ;;  %v4763_v2 = vld [vmem:[%s12465_s3 + $0xcf8] sm:$0xff] }
 0x39f   :  { %3486 = vmatmul.mubr.f32.vlgmr.msra.gmra.mrb[60].mxu1 %v11565_v47  ;;  %7502 = vmatprep.subr.bf16.mxu0 %v13351_v40  ;;  %v4753_v23 = vld [vmem:[%s12465_s3 + $0xca8] sm:$0xff] }
 0x3a0   :  { %v11725_v21 = vadd.f32 %v7795_v6, %v5416_v28  ;;  %7524 = vmatpush3.bf16.msra.mxu1 %v13352_v25  ;;  %3491 = vmatprep.mubr.f32.mxu1 %v11571_v5  ;;  %v4769_v6 = vld [vmem:[%s12465_s3 + $0xd28] sm:$0xff] }
 0x3a1   :  { %7526 = vmatprep.subr.bf16.mxu1 %v13353_v54  ;;  %v7561_v28 = vpack.c.bf16 %v4769_v6, %v4768_v33  ;;  %v13373_v54 = vld [vmem:[#allocation207_spill] sm:$0xff]  ;;  %v4774_v33 = vld [vmem:[%s12465_s3 + $0xd50] sm:$0xff] }
 0x3a2   :  { %7504 = vmatpush1.bf16.msra.mxu0 %v13354_v35  ;;  %v4770_v35 = vld [vmem:[%s12465_s3 + $0xd30] sm:$0xff] }
 0x3a3   :  { %3492 = vmatmul.mubr.f32.gmra.mrb[62].mxu1 %v11581_v14  ;;  %7506 = vmatprep.subr.bf16.mxu0 %v13355_v32  ;;  %v4771_v32 = vld [vmem:[%s12465_s3 + $0xd38] sm:$0xff] }
 0x3a4   :  { %7528 = vmatpush3.bf16.msra.mxu1 %v13356_v58  ;;  %3639 = vmatprep.mubr.f32.mxu1 %v11486_v8  ;;  %v4764_v8 = vld [vmem:[%s12465_s3 + $0xd00] sm:$0xff] }
 0x3a5   :  { %7530 = vmatprep.subr.bf16.mxu1 %v13357_v30  ;;  %v7553_v63 = vpack.c.bf16 %v4765_v37, %v4764_v8  ;;  %v13374_v30 = vld [vmem:[#allocation208_spill] sm:$0xff]  ;;  %v4799_v8 = vld [vmem:[%s12465_s3 + $0xe18] sm:$0xff]  ;;  %v7565_v37 = vpack.c.bf16 %v4771_v32, %v4770_v35  ;;  %v4804_v32 = vld [vmem:[%s12465_s3 + $0xe40] sm:$0xff] }
 0x3a6   :  { %7508 = vmatpush1.bf16.msra.mxu0 %v13358_v11  ;;  %v7585_v11 = vpack.c.bf16 %v4797_v51, %v4796_v62  ;;  %v4803_v62 = vld [vmem:[%s12465_s3 + $0xe38] sm:$0xff] }
 0x3a7   :  { %7510 = vmatprep.subr.bf16.mxu0 %v13359_v13  ;;  %v4780_v13 = vld [vmem:[%s12465_s3 + $0xd80] sm:$0xff] }
 0x3a8   :  { %7532 = vmatpush3.bf16.msra.mxu1 %v13360_v20  ;;  %v4781_v20 = vld [vmem:[%s12465_s3 + $0xd88] sm:$0xff] }
 0x3a9   :  { %7534 = vmatprep.subr.bf16.mxu1 %v13361_v3 }
 0x3aa   :  { %7512 = vmatpush1.bf16.msra.mxu0 %v13362_v29 }
 0x3ab   :  { %7514 = vmatprep.subr.bf16.mxu0 %v13363_v7 }
 0x3ac   :  { %7536 = vmatpush3.bf16.msra.mxu1 %v13364_v27  ;;  %v4798_v27 = vld [vmem:[%s12465_s3 + $0xe10] sm:$0xff] }
 0x3ad   :  { %7538 = vmatprep.subr.bf16.mxu1 %v13365_v36  ;;  %v4754_v36 = vld [vmem:[%s12465_s3 + $0xcb0] sm:$0xff]  ;;  %v7589_v56 = vpack.c.bf16 %v4799_v8, %v4798_v27  ;;  %v4788_v27 = vld [vmem:[%s12465_s3 + $0xdc0] sm:$0xff]  ;;  %v4789_v8 = vld [vmem:[%s12465_s3 + $0xdc8] sm:$0xff] }
 0x3ae   :  { %7516 = vmatpush1.bf16.msra.mxu0 %v13366_v10  ;;  %v7603_v48 = vpack.c.bf16 %v4789_v8, %v4788_v27  ;;  %v4832_v27 = vld [vmem:[%s12465_s3 + $0xf20] sm:$0xff]  ;;  %v4833_v8 = vld [vmem:[%s12465_s3 + $0xf28] sm:$0xff] }
 0x3af   :  { %7518 = vmatprep.subr.bf16.mxu0 %v13367_v12 }
 0x3b0   :  { %7540 = vmatpush3.bf16.msra.mxu1 %v13368_v59  ;;  %v7587_v59 = vpack.c.bf16 %v4781_v20, %v4780_v13  ;;  %v4761_v13 = vld [vmem:[%s12465_s3 + $0xce8] sm:$0xff]  ;;  %v4778_v20 = vld [vmem:[%s12465_s3 + $0xd70] sm:$0xff] }
 0x3b1   :  { %7542 = vmatprep.subr.bf16.mxu1 %v13369_v55  ;;  %v4782_v55 = vld [vmem:[%s12465_s3 + $0xd90] sm:$0xff] }
 0x3b2   :  { %7520 = vmatpush1.bf16.msra.mxu0 %v13370_v18  ;;  %v5449_v52 = vpop.f32.mrb[48].mxu1  ;;  %v4783_v18 = vld [vmem:[%s12465_s3 + $0xd98] sm:$0xff] }
 0x3b3   :  { %v5450_v61 = vpop.f32.mrb[49].mxu1  ;;  %7554 = vmatprep.subr.bf16.mxu0 %v7553_v63  ;;  %v13375_v63 = vld [vmem:[#allocation209_spill] sm:$0xff]  ;;  %v7591_v6 = vpack.c.bf16 %v4783_v18, %v4782_v55  ;;  %v4791_v18 = vld [vmem:[%s12465_s3 + $0xdd8] sm:$0xff] }
 0x3b4   :  { %v5451_v16 = vadd.f32 %v5450_v61, %v5449_v52  ;;  %7544 = vmatpush3.bf16.msra.mxu1 %v13371_v38  ;;  %v4800_v61 = vld [vmem:[%s12465_s3 + $0xe20] sm:$0xff]  ;;  %v4790_v55 = vld [vmem:[%s12465_s3 + $0xdd0] sm:$0xff] }
 0x3b5   :  { %3563 = vmatmul.mubr.f32.vlgmr.msra.gmra.mrb[62].mxu0 %v11565_v47  ;;  %7546 = vmatprep.subr.bf16.mxu1 %v13372_v22 }
 0x3b6   :  { %v7805_v49 = vadd.f32 %v7804_v60, %v5451_v16  ;;  %v5452_v57 = vpop.f32.mrb[50].mxu1  ;;  %3568 = vmatprep.mubr.f32.mxu0 %v11571_v5  ;;  %7556 = vmatpush3.bf16.msra.mxu0 %v7555_v50  ;;  %v4752_v60 = vld [vmem:[%s12465_s3 + $0xca0] sm:$0xff]  ;;  %v4757_v16 = vld [vmem:[%s12465_s3 + $0xcc8] sm:$0xff] }
 0x3b7   :  { %v5453_v17 = vpop.f32.mrb[51].mxu1  ;;  %7558 = vmatprep.subr.bf16.mxu0 %v7557_v26  ;;  %v7563_v7 = vpack.c.bf16 %v4753_v23, %v4752_v60  ;;  %v4801_v26 = vld [vmem:[%s12465_s3 + $0xe28] sm:$0xff]  ;;  %v4776_v60 = vld [vmem:[%s12465_s3 + $0xd60] sm:$0xff] }
 0x3b8   :  { %v5454_v40 = vadd.f32 %v5453_v17, %v5452_v57  ;;  %v5487_v25 = vpop.f32.mrb[50].mxu0  ;;  %7548 = vmatpush3.bf16.msra.mxu1 %v13373_v54  ;;  %v7593_v22 = vpack.c.bf16 %v4801_v26, %v4800_v61  ;;  %v7571_v57 = vpack.c.bf16 %v4757_v16, %v4756_v39  ;;  %v4758_v17 = vld [vmem:[%s12465_s3 + $0xcd0] sm:$0xff]  ;;  %v4777_v23 = vld [vmem:[%s12465_s3 + $0xd68] sm:$0xff]  ;;  %v4787_v54 = vld [vmem:[%s12465_s3 + $0xdb8] sm:$0xff] }
 0x3b9   :  { %v5488_v58 = vpop.f32.mrb[51].mxu0  ;;  %3569 = vmatmul.mubr.f32.gmra.mrb[64].mxu0 %v11581_v14  ;;  %7550 = vmatprep.subr.bf16.mxu1 %v13374_v30  ;;  %v7577_v30 = vpack.c.bf16 %v4777_v23, %v4776_v60  ;;  %v4809_v61 = vld [vmem:[%s12465_s3 + $0xe68] sm:$0xff]  ;;  %v4792_v16 = vld [vmem:[%s12465_s3 + $0xde0] sm:$0xff] }
 0x3ba   :  { %v7797_v3 = vadd.f32 %v11725_v21, %v5454_v40  ;;  %v5489_v29 = vadd.f32 %v5488_v58, %v5487_v25  ;;  %7560 = vmatpush3.bf16.msra.mxu0 %v7559_v34  ;;  %v4755_v21 = vld [vmem:[%s12465_s3 + $0xcb8] sm:$0xff]  ;;  %v4802_v34 = vld [vmem:[%s12465_s3 + $0xe30] sm:$0xff]  ;;  %v4805_v58 = vld [vmem:[%s12465_s3 + $0xe48] sm:$0xff] }
 0x3bb   :  { %7562 = vmatprep.subr.bf16.mxu0 %v7561_v28  ;;  %v7567_v50 = vpack.c.bf16 %v4755_v21, %v4754_v36  ;;  %v4759_v28 = vld [vmem:[%s12465_s3 + $0xcd8] sm:$0xff]  ;;  %v7597_v40 = vpack.c.bf16 %v4803_v62, %v4802_v34  ;;  %v4786_v25 = vld [vmem:[%s12465_s3 + $0xdb0] sm:$0xff]  ;;  %v4860_v34 = vld [vmem:[%s12465_s3 + $0x1000] sm:$0xff] }
 0x3bc   :  { %v11823_v10 = vadd.f32 %v7805_v49, %v5489_v29  ;;  %v5490_v12 = vpop.f32.mrb[52].mxu0  ;;  %7552 = vmatpush3.bf16.msra.mxu1 %v13375_v63  ;;  %v4784_v49 = vld [vmem:[%s12465_s3 + $0xda0] sm:$0xff]  ;;  %v7575_v35 = vpack.c.bf16 %v4759_v28, %v4758_v17  ;;  %v7599_v29 = vpack.c.bf16 %v4787_v54, %v4786_v25  ;;  %v4806_v36 = vld [vmem:[%s12465_s3 + $0xe50] sm:$0xff]  ;;  %v4807_v21 = vld [vmem:[%s12465_s3 + $0xe58] sm:$0xff] }
 0x3bd   :  { %v5491_v15 = vpop.f32.mrb[53].mxu0  ;;  %7586 = vmatprep.subr.bf16.mxu1 %v7585_v11  ;;  %v4760_v11 = vld [vmem:[%s12465_s3 + $0xce0] sm:$0xff]  ;;  %v4762_v63 = vld [vmem:[%s12465_s3 + $0xcf0] sm:$0xff]  ;;  %v4861_v62 = vld [vmem:[%s12465_s3 + $0x1008] sm:$0xff] }
 0x3be   :  { %v5492_v52 = vadd.f32 %v5491_v15, %v5490_v12  ;;  %7564 = vmatpush3.bf16.msra.mxu0 %v7563_v7  ;;  %v7601_v7 = vpack.c.bf16 %v4805_v58, %v4804_v32  ;;  %v4829_v15 = vld [vmem:[%s12465_s3 + $0xf08] sm:$0xff]  ;;  %v7649_v17 = vpack.c.bf16 %v4861_v62, %v4860_v34  ;;  %v4830_v54 = vld [vmem:[%s12465_s3 + $0xf10] sm:$0xff] }
 0x3bf   :  { %3640 = vmatmul.mubr.f32.vlgmr.msra.gmra.mrb[64].mxu1 %v11565_v47  ;;  %7566 = vmatprep.subr.bf16.mxu0 %v7565_v37  ;;  %v4775_v47 = vld [vmem:[%s12465_s3 + $0xd58] sm:$0xff]  ;;  %v7579_v37 = vpack.c.bf16 %v4761_v13, %v4760_v11 }
 0x3c0   :  { %v11851_v38 = vadd.f32 %v7797_v3, %v5492_v52  ;;  %3644 = vmatprep.mubr.f32.mxu1 %v11571_v5  ;;  %7588 = vmatpush3.bf16.msra.mxu1 %v7587_v59  ;;  %v4785_v5 = vld [vmem:[%s12465_s3 + $0xda8] sm:$0xff]  ;;  %v7573_v51 = vpack.c.bf16 %v4775_v47, %v4774_v33  ;;  %v4779_v3 = vld [vmem:[%s12465_s3 + $0xd78] sm:$0xff]  ;;  %v4828_v59 = vld [vmem:[%s12465_s3 + $0xf00] sm:$0xff]  ;;  %v7583_v52 = vpack.c.bf16 %v4763_v2, %v4762_v63 }
 0x3c1   :  { %7590 = vmatprep.subr.bf16.mxu1 %v7589_v56  ;;  %v7581_v12 = vpack.c.bf16 %v4779_v3, %v4778_v20  ;;  %v7605_v56 = vpack.c.bf16 %v4807_v21, %v4806_v36  ;;  %v7617_v26 = vpack.c.bf16 %v4829_v15, %v4828_v59  ;;  %v4793_v33 = vld [vmem:[%s12465_s3 + $0xde8] sm:$0xff]  ;;  %v4810_v47 = vld [vmem:[%s12465_s3 + $0xe70] sm:$0xff]  ;;  %v4815_v3 = vld [vmem:[%s12465_s3 + $0xe98] sm:$0xff]  ;;  %v7625_v63 = vpack.c.bf16 %v4833_v8, %v4832_v27 }
 0x3c2   :  { %7568 = vmatpush3.bf16.msra.mxu0 %v7567_v50  ;;  %v4808_v50 = vld [vmem:[%s12465_s3 + $0xe60] sm:$0xff]  ;;  %v4814_v20 = vld [vmem:[%s12465_s3 + $0xe90] sm:$0xff]  ;;  %v4817_v2 = vld [vmem:[%s12465_s3 + $0xea8] sm:$0xff] }
 0x3c3   :  { %3645 = vmatmul.mubr.f32.gmra.mrb[66].mxu1 %v11581_v14  ;;  %7570 = vmatprep.subr.bf16.mxu0 %v7569_v44  ;;  %v7595_v14 = vpack.c.bf16 %v4785_v5, %v4784_v49  ;;  %v7607_v44 = vpack.c.bf16 %v4791_v18, %v4790_v55  ;;  %v7609_v39 = vpack.c.bf16 %v4809_v61, %v4808_v50  ;;  %v4794_v5 = vld [vmem:[%s12465_s3 + $0xdf0] sm:$0xff]  ;;  %v4819_v55 = vld [vmem:[%s12465_s3 + $0xeb8] sm:$0xff]  ;;  %v4836_v18 = vld [vmem:[%s12465_s3 + $0xf40] sm:$0xff] }
 0x3c4   :  { %7592 = vmatpush3.bf16.msra.mxu1 %v7591_v6  ;;  %v4811_v6 = vld [vmem:[%s12465_s3 + $0xe78] sm:$0xff]  ;;  %v7623_v21 = vpack.c.bf16 %v4815_v3, %v4814_v20 }
 0x3c5   :  { %7594 = vmatprep.subr.bf16.mxu1 %v7593_v22  ;;  %v7611_v22 = vpack.c.bf16 %v4793_v33, %v4792_v16  ;;  %v7613_v49 = vpack.c.bf16 %v4811_v6, %v4810_v47  ;;  %v4839_v16 = vld [vmem:[%s12465_s3 + $0xf58] sm:$0xff]  ;;  %v4822_v6 = vld [vmem:[%s12465_s3 + $0xed0] sm:$0xff] }
 0x3c6   :  { %7572 = vmatpush3.bf16.msra.mxu0 %v7571_v57  ;;  %v4795_v57 = vld [vmem:[%s12465_s3 + $0xdf8] sm:$0xff] }
 0x3c7   :  { %7574 = vmatprep.subr.bf16.mxu0 %v7573_v51  ;;  %v7615_v51 = vpack.c.bf16 %v4795_v57, %v4794_v5  ;;  %v4840_v5 = vld [vmem:[%s12465_s3 + $0xf60] sm:$0xff]  ;;  %v4841_v57 = vld [vmem:[%s12465_s3 + $0xf68] sm:$0xff]  ;;  %v4847_v27 = vld [vmem:[%s12465_s3 + $0xf98] sm:$0xff] }
 0x3c8   :  { %7596 = vmatpush3.bf16.msra.mxu1 %v7595_v14  ;;  %v4812_v14 = vld [vmem:[%s12465_s3 + $0xe80] sm:$0xff] }
 0x3c9   :  { %7598 = vmatprep.subr.bf16.mxu1 %v7597_v40  ;;  %v4813_v40 = vld [vmem:[%s12465_s3 + $0xe88] sm:$0xff] }
 0x3ca   :  { %7576 = vmatpush3.bf16.msra.mxu0 %v7575_v35  ;;  %v4831_v35 = vld [vmem:[%s12465_s3 + $0xf18] sm:$0xff] }
 0x3cb   :  { %7578 = vmatprep.subr.bf16.mxu0 %v7577_v30  ;;  %v7619_v30 = vpack.c.bf16 %v4813_v40, %v4812_v14  ;;  %v7621_v13 = vpack.c.bf16 %v4831_v35, %v4830_v54  ;;  %v4863_v14 = vld [vmem:[%s12465_s3 + $0x1018] sm:$0xff]  ;;  %v4824_v54 = vld [vmem:[%s12465_s3 + $0xee0] sm:$0xff]  ;;  %v4825_v35 = vld [vmem:[%s12465_s3 + $0xee8] sm:$0xff] }
 0x3cc   :  { %7600 = vmatpush3.bf16.msra.mxu1 %v7599_v29 }
 0x3cd   :  { %7602 = vmatprep.subr.bf16.mxu1 %v7601_v7 }
 0x3ce   :  { %7580 = vmatpush3.bf16.msra.mxu0 %v7579_v37 }
 0x3cf   :  { %7582 = vmatprep.subr.bf16.mxu0 %v7581_v12 }
 0x3d0   :  { %7604 = vmatpush3.bf16.msra.mxu1 %v7603_v48  ;;  %v4834_v48 = vld [vmem:[%s12465_s3 + $0xf30] sm:$0xff] }
 0x3d1   :  { %7606 = vmatprep.subr.bf16.mxu1 %v7605_v56  ;;  %v4818_v56 = vld [vmem:[%s12465_s3 + $0xeb0] sm:$0xff] }
 0x3d2   :  { %7584 = vmatpush3.bf16.msra.mxu0 %v7583_v52  ;;  %v4837_v52 = vld [vmem:[%s12465_s3 + $0xf48] sm:$0xff]  ;;  %v7631_v50 = vpack.c.bf16 %v4819_v55, %v4818_v56 }
 0x3d3   :  { %7618 = vmatprep.subr.bf16.mxu0 %v7617_v26  ;;  %v7633_v61 = vpack.c.bf16 %v4837_v52, %v4836_v18  ;;  %v4820_v26 = vld [vmem:[%s12465_s3 + $0xec0] sm:$0xff]  ;;  %v4849_v56 = vld [vmem:[%s12465_s3 + $0xfa8] sm:$0xff]  ;;  %v4866_v18 = vld [vmem:[%s12465_s3 + $0x1030] sm:$0xff] }
 0x3d4   :  { %7608 = vmatpush3.bf16.msra.mxu1 %v7607_v44  ;;  %v4821_v44 = vld [vmem:[%s12465_s3 + $0xec8] sm:$0xff]  ;;  %v4867_v52 = vld [vmem:[%s12465_s3 + $0x1038] sm:$0xff] }
 0x3d5   :  { %7610 = vmatprep.subr.bf16.mxu1 %v7609_v39  ;;  %v4838_v39 = vld [vmem:[%s12465_s3 + $0xf50] sm:$0xff]  ;;  %v7635_v33 = vpack.c.bf16 %v4821_v44, %v4820_v26  ;;  %v7661_v26 = vpack.c.bf16 %v4867_v52, %v4866_v18  ;;  %v4896_v18 = vld [vmem:[%s12465_s3 + $0x1120] sm:$0xff] }
 0x3d6   :  { %v7637_v47 = vpack.c.bf16 %v4839_v16, %v4838_v39  ;;  %v4850_v44 = vld [vmem:[%s12465_s3 + $0xfb0] sm:$0xff]  ;;  %v4851_v39 = vld [vmem:[%s12465_s3 + $0xfb8] sm:$0xff]  ;;  %v4868_v16 = vld [vmem:[%s12465_s3 + $0x1040] sm:$0xff] }
 0x3d8   :  { %7612 = vmatpush3.bf16.msra.mxu1 %v7611_v22  ;;  %v4823_v22 = vld [vmem:[%s12465_s3 + $0xed8] sm:$0xff] }
 0x3d9   :  { %7614 = vmatprep.subr.bf16.mxu1 %v7613_v49 }
 0x3dc   :  { %7616 = vmatpush3.bf16.msra.mxu1 %v7615_v51  ;;  %v4844_v51 = vld [vmem:[%s12465_s3 + $0xf80] sm:$0xff] }
 0x3dd   :  { %7650 = vmatprep.subr.bf16.mxu1 %v7649_v17  ;;  %v4845_v17 = vld [vmem:[%s12465_s3 + $0xf88] sm:$0xff] }
 0x3f2   :  { %v3179_v28 = vpop.f32.mrb[52].mxu1 }
 0x3f3   :  { %v3180_v60 = vadd.f32 %v3179_v28, %v10341_v31  ;;  %v3181_v23 = vpop.f32.mrb[53].mxu1 }
 0x3f4   :  { %v3182_v25 = vadd.f32 %v3181_v23, %v10346_v43  ;;  %v4862_v23 = vld [vmem:[%s12465_s3 + $0x1010] sm:$0xff] }
 0x3f5   :  { %v3650_v32 = vmul.f32 %v3180_v60, %v3180_v60  ;;  %v7639_v60 = vpack.c.bf16 %v4823_v22, %v4822_v6  ;;  %v4852_v22 = vld [vmem:[%s12465_s3 + $0xfc0] sm:$0xff] }
 0x3f6   :  { %v3651_v58 = vmul.f32 %v3182_v25, %v3182_v25  ;;  %v3185_v11 = vpop.f32.mrb[54].mxu1  ;;  %v7641_v25 = vpack.c.bf16 %v4841_v57, %v4840_v5  ;;  %v4870_v5 = vld [vmem:[%s12465_s3 + $0x1050] sm:$0xff]  ;;  %v4871_v57 = vld [vmem:[%s12465_s3 + $0x1058] sm:$0xff] }
 0x3f7   :  { %v3186_v29 = vadd.f32 %v3185_v11, %v10341_v31  ;;  %v3187_v7 = vpop.f32.mrb[55].mxu1  ;;  %v4816_v31 = vld [vmem:[%s12465_s3 + $0xea0] sm:$0xff]  ;;  %v4842_v11 = vld [vmem:[%s12465_s3 + $0xf70] sm:$0xff] }
 0x3f8   :  { %3947 = vmatprep.mubr.f32.mxu0 %v3651_v58  ;;  %v3188_v37 = vadd.f32 %v3187_v7, %v10346_v43  ;;  %v4835_v43 = vld [vmem:[%s12465_s3 + $0xf38] sm:$0xff]  ;;  %v7627_v59 = vpack.c.bf16 %v4817_v2, %v4816_v31  ;;  %v4846_v7 = vld [vmem:[%s12465_s3 + $0xf90] sm:$0xff] }
 0x3f9   :  { %3948 = vmatmul.mubr.f32.vlgmr.msra.gmra.mrb[66].mxu0 %v3650_v32  ;;  %v3663_v36 = vmul.f32 %v3186_v29, %v3186_v29  ;;  %v7629_v15 = vpack.c.bf16 %v4835_v43, %v4834_v48  ;;  %v7653_v29 = vpack.c.bf16 %v4863_v14, %v4862_v23  ;;  %v7655_v2 = vpack.c.bf16 %v4847_v27, %v4846_v7  ;;  %v4892_v48 = vld [vmem:[%s12465_s3 + $0x1100] sm:$0xff]  ;;  %v4893_v43 = vld [vmem:[%s12465_s3 + $0x1108] sm:$0xff] }
 0x3fa   :  { %7620 = vmatpush3.bf16.msra.mxu0 %v7619_v30  ;;  %v3664_v12 = vmul.f32 %v3188_v37, %v3188_v37  ;;  %v7651_v30 = vpack.c.bf16 %v4845_v17, %v4844_v51  ;;  %v7643_v37 = vpack.c.bf16 %v4825_v35, %v4824_v54  ;;  %v4854_v51 = vld [vmem:[%s12465_s3 + $0xfd0] sm:$0xff]  ;;  %v4855_v17 = vld [vmem:[%s12465_s3 + $0xfd8] sm:$0xff] }
 0x3fb   :  { %7622 = vmatprep.subr.bf16.mxu0 %v7621_v13  ;;  %v4843_v13 = vld [vmem:[%s12465_s3 + $0xf78] sm:$0xff]  ;;  %v7671_v23 = vpack.c.bf16 %v4855_v17, %v4854_v51  ;;  %v4874_v54 = vld [vmem:[%s12465_s3 + $0x1070] sm:$0xff]  ;;  %v4885_v51 = vld [vmem:[%s12465_s3 + $0x10c8] sm:$0xff] }
 0x3fc   :  { %3952 = vmatprep.mubr.f32.mxu0 %v3664_v12  ;;  %v7645_v12 = vpack.c.bf16 %v4843_v13, %v4842_v11  ;;  %v4875_v35 = vld [vmem:[%s12465_s3 + $0x1078] sm:$0xff]  ;;  %v4924_v13 = vld [vmem:[%s12465_s3 + $0x1200] sm:$0xff]  ;;  %v4902_v17 = vld [vmem:[%s12465_s3 + $0x1150] sm:$0xff] }
 0x3fd   :  { %3953 = vmatmul.mubr.f32.gmra.mrb[68].mxu0 %v3663_v36  ;;  %v4864_v36 = vld [vmem:[%s12465_s3 + $0x1020] sm:$0xff]  ;;  %v4859_v11 = vld [vmem:[%s12465_s3 + $0xff8] sm:$0xff] }
 0x3fe   :  { %7624 = vmatpush3.bf16.msra.mxu0 %v7623_v21 }
 0x3ff   :  { %7626 = vmatprep.subr.bf16.mxu0 %v7625_v63  ;;  %v4826_v63 = vld [vmem:[%s12465_s3 + $0xef0] sm:$0xff] }
 0x402   :  { %7628 = vmatpush3.bf16.msra.mxu0 %v7627_v59 }
 0x403   :  { %7630 = vmatprep.subr.bf16.mxu0 %v7629_v15  ;;  %v4848_v15 = vld [vmem:[%s12465_s3 + $0xfa0] sm:$0xff] }
 0x406   :  { %7632 = vmatpush3.bf16.msra.mxu0 %v7631_v50  ;;  %v7681_v50 = vpack.c.bf16 %v4893_v43, %v4892_v48 }
 0x407   :  { %7634 = vmatprep.subr.bf16.mxu0 %v7633_v61  ;;  %v7659_v61 = vpack.c.bf16 %v4849_v56, %v4848_v15  ;;  %v4878_v15 = vld [vmem:[%s12465_s3 + $0x1090] sm:$0xff]  ;;  %v4879_v56 = vld [vmem:[%s12465_s3 + $0x1098] sm:$0xff] }
 0x408   :  { %v3256_v49 = vpop.f32.mrb[54].mxu0 }
 0x409   :  { %v3257_v34 = vadd.f32 %v3256_v49, %v10447_v24  ;;  %v3258_v62 = vpop.f32.mrb[55].mxu0  ;;  %v4853_v49 = vld [vmem:[%s12465_s3 + $0xfc8] sm:$0xff] }
 0x40a   :  { %v3259_v28 = vadd.f32 %v3258_v62, %v10458_v42  ;;  %7636 = vmatpush3.bf16.msra.mxu0 %v7635_v33  ;;  %v4869_v33 = vld [vmem:[%s12465_s3 + $0x1048] sm:$0xff]  ;;  %v7669_v62 = vpack.c.bf16 %v4871_v57, %v4870_v5 }
 0x40b   :  { %v3652_v40 = vmul.f32 %v3257_v34, %v3257_v34  ;;  %7638 = vmatprep.subr.bf16.mxu0 %v7637_v47  ;;  %v7663_v47 = vpack.c.bf16 %v4851_v39, %v4850_v44  ;;  %v7665_v6 = vpack.c.bf16 %v4869_v33, %v4868_v16  ;;  %v7667_v34 = vpack.c.bf16 %v4853_v49, %v4852_v22  ;;  %v4881_v44 = vld [vmem:[%s12465_s3 + $0x10a8] sm:$0xff]  ;;  %v4898_v39 = vld [vmem:[%s12465_s3 + $0x1130] sm:$0xff]  ;;  %v4899_v16 = vld [vmem:[%s12465_s3 + $0x1138] sm:$0xff] }
 0x40c   :  { %v3653_v32 = vmul.f32 %v3259_v28, %v3259_v28  ;;  %v3262_v58 = vpop.f32.mrb[56].mxu0  ;;  %v4872_v28 = vld [vmem:[%s12465_s3 + $0x1060] sm:$0xff]  ;;  %v4883_v22 = vld [vmem:[%s12465_s3 + $0x10b8] sm:$0xff]  ;;  %v4901_v5 = vld [vmem:[%s12465_s3 + $0x1148] sm:$0xff] }
 0x40d   :  { %v3263_v20 = vadd.f32 %v3262_v58, %v10447_v24  ;;  %v3264_v3 = vpop.f32.mrb[57].mxu0  ;;  %v4865_v24 = vld [vmem:[%s12465_s3 + $0x1028] sm:$0xff]  ;;  %v7677_v58 = vpack.c.bf16 %v4875_v35, %v4874_v54  ;;  %v4900_v49 = vld [vmem:[%s12465_s3 + $0x1140] sm:$0xff] }
 0x40e   :  { %4022 = vmatprep.mubr.f32.mxu1 %v3653_v32  ;;  %v3265_v8 = vadd.f32 %v3264_v3, %v10458_v42  ;;  %7640 = vmatpush3.bf16.msra.mxu0 %v7639_v60  ;;  %v4827_v42 = vld [vmem:[%s12465_s3 + $0xef8] sm:$0xff]  ;;  %v7657_v59 = vpack.c.bf16 %v4865_v24, %v4864_v36  ;;  %v4873_v60 = vld [vmem:[%s12465_s3 + $0x1068] sm:$0xff]  ;;  %v4904_v54 = vld [vmem:[%s12465_s3 + $0x1160] sm:$0xff] }
 0x40f   :  { %4023 = vmatmul.mubr.f32.vlgmr.msra.gmra.mrb[68].mxu1 %v3652_v40  ;;  %v3665_v21 = vmul.f32 %v3263_v20, %v3263_v20  ;;  %7642 = vmatprep.subr.bf16.mxu0 %v7641_v25  ;;  %v7647_v55 = vpack.c.bf16 %v4827_v42, %v4826_v63  ;;  %v7673_v14 = vpack.c.bf16 %v4873_v60, %v4872_v28  ;;  %v4856_v40 = vld [vmem:[%s12465_s3 + $0xfe0] sm:$0xff]  ;;  %v4857_v25 = vld [vmem:[%s12465_s3 + $0xfe8] sm:$0xff]  ;;  %v4903_v28 = vld [vmem:[%s12465_s3 + $0x1158] sm:$0xff] }
 0x410   :  { %v3666_v31 = vmul.f32 %v3265_v8, %v3265_v8  ;;  %7652 = vmatpush3.bf16.msra.mxu1 %v7651_v30  ;;  %v7675_v32 = vpack.c.bf16 %v4857_v25, %v4856_v40  ;;  %v4858_v30 = vld [vmem:[%s12465_s3 + $0xff0] sm:$0xff]  ;;  %v4925_v20 = vld [vmem:[%s12465_s3 + $0x1208] sm:$0xff]  ;;  %v4887_v40 = vld [vmem:[%s12465_s3 + $0x10d8] sm:$0xff] }
 0x411   :  { %7654 = vmatprep.subr.bf16.mxu1 %v7653_v29  ;;  %v7679_v3 = vpack.c.bf16 %v4859_v11, %v4858_v30  ;;  %v7713_v29 = vpack.c.bf16 %v4925_v20, %v4924_v13  ;;  %v4877_v36 = vld [vmem:[%s12465_s3 + $0x1088] sm:$0xff]  ;;  %v4908_v30 = vld [vmem:[%s12465_s3 + $0x1180] sm:$0xff] }
 0x412   :  { %4027 = vmatprep.mubr.f32.mxu1 %v3666_v31  ;;  %7644 = vmatpush3.bf16.msra.mxu0 %v7643_v37  ;;  %v4876_v37 = vld [vmem:[%s12465_s3 + $0x1080] sm:$0xff]  ;;  %v4905_v35 = vld [vmem:[%s12465_s3 + $0x1168] sm:$0xff] }
 0x413   :  { %4028 = vmatmul.mubr.f32.gmra.mrb[70].mxu1 %v3665_v21  ;;  %7646 = vmatprep.subr.bf16.mxu0 %v7645_v12  ;;  %v4894_v21 = vld [vmem:[%s12465_s3 + $0x1110] sm:$0xff]  ;;  %v4895_v12 = vld [vmem:[%s12465_s3 + $0x1118] sm:$0xff]  ;;  %v4909_v11 = vld [vmem:[%s12465_s3 + $0x1188] sm:$0xff] }
 0x414   :  { %7656 = vmatpush3.bf16.msra.mxu1 %v7655_v2  ;;  %v7683_v2 = vpack.c.bf16 %v4877_v36, %v4876_v37  ;;  %v4889_v37 = vld [vmem:[%s12465_s3 + $0x10e8] sm:$0xff] }
 0x415   :  { %7658 = vmatprep.subr.bf16.mxu1 %v7657_v59  ;;  %v7685_v59 = vpack.c.bf16 %v4895_v12, %v4894_v21  ;;  %v7715_v21 = vpack.c.bf16 %v4909_v11, %v4908_v30  ;;  %v4906_v12 = vld [vmem:[%s12465_s3 + $0x1170] sm:$0xff] }
 0x416   :  { %7648 = vmatpush3.bf16.msra.mxu0 %v7647_v55 }
 0x417   :  { %7682 = vmatprep.subr.bf16.mxu0 %v7681_v50 }
 0x418   :  { %7660 = vmatpush3.bf16.msra.mxu1 %v7659_v61  ;;  %v7687_v61 = vpack.c.bf16 %v4879_v56, %v4878_v15  ;;  %v4928_v56 = vld [vmem:[%s12465_s3 + $0x1220] sm:$0xff] }
 0x419   :  { %7662 = vmatprep.subr.bf16.mxu1 %v7661_v26 }
 0x41c   :  { %7664 = vmatpush3.bf16.msra.mxu1 %v7663_v47  ;;  %v7693_v47 = vpack.c.bf16 %v4899_v16, %v4898_v39  ;;  %v4913_v39 = vld [vmem:[%s12465_s3 + $0x11a8] sm:$0xff] }
 0x41d   :  { %7666 = vmatprep.subr.bf16.mxu1 %v7665_v6  ;;  %v4882_v6 = vld [vmem:[%s12465_s3 + $0x10b0] sm:$0xff] }
 0x41e   :  { %v7695_v57 = vpack.c.bf16 %v4883_v22, %v4882_v6 }
 0x420   :  { %7668 = vmatpush3.bf16.msra.mxu1 %v7667_v34  ;;  %v7697_v34 = vpack.c.bf16 %v4901_v5, %v4900_v49  ;;  %v4914_v5 = vld [vmem:[%s12465_s3 + $0x11b0] sm:$0xff] }
 0x421   :  { %7670 = vmatprep.subr.bf16.mxu1 %v7669_v62  ;;  %v4884_v62 = vld [vmem:[%s12465_s3 + $0x10c0] sm:$0xff] }
 0x422   :  { %v7699_v60 = vpack.c.bf16 %v4885_v51, %v4884_v62  ;;  %v4933_v62 = vld [vmem:[%s12465_s3 + $0x1248] sm:$0xff] }
 0x424   :  { %7672 = vmatpush3.bf16.msra.mxu1 %v7671_v23  ;;  %v7701_v23 = vpack.c.bf16 %v4903_v28, %v4902_v17  ;;  %v4916_v28 = vld [vmem:[%s12465_s3 + $0x11c0] sm:$0xff] }
 0x425   :  { %7674 = vmatprep.subr.bf16.mxu1 %v7673_v14  ;;  %v4886_v14 = vld [vmem:[%s12465_s3 + $0x10d0] sm:$0xff] }
 0x426   :  { %v7703_v20 = vpack.c.bf16 %v4887_v40, %v4886_v14  ;;  %v4935_v14 = vld [vmem:[%s12465_s3 + $0x1258] sm:$0xff] }
 0x428   :  { %7676 = vmatpush3.bf16.msra.mxu1 %v7675_v32 }
 0x429   :  { %7678 = vmatprep.subr.bf16.mxu1 %v7677_v58 }
 0x42c   :  { %7680 = vmatpush3.bf16.msra.mxu1 %v7679_v3  ;;  %v4926_v3 = vld [vmem:[%s12465_s3 + $0x1210] sm:$0xff] }
 0x42d   :  { %7714 = vmatprep.subr.bf16.mxu1 %v7713_v29  ;;  %v4927_v29 = vld [vmem:[%s12465_s3 + $0x1218] sm:$0xff] }
 0x432   :  { %v3333_v7 = vpop.f32.mrb[56].mxu1 }
 0x433   :  { %v3334_v27 = vadd.f32 %v3333_v7, %v10565_v53  ;;  %v3335_v8 = vpop.f32.mrb[57].mxu1 }
 0x434   :  { %v3336_v24 = vadd.f32 %v3335_v8, %v10568_v1  ;;  %v4888_v8 = vld [vmem:[%s12465_s3 + $0x10e0] sm:$0xff] }
 0x435   :  { %v3654_v63 = vmul.f32 %v3334_v27, %v3334_v27  ;;  %v7705_v27 = vpack.c.bf16 %v4905_v35, %v4904_v54  ;;  %v7707_v15 = vpack.c.bf16 %v4889_v37, %v4888_v8  ;;  %v4918_v54 = vld [vmem:[%s12465_s3 + $0x11d0] sm:$0xff]  ;;  %v4919_v35 = vld [vmem:[%s12465_s3 + $0x11d8] sm:$0xff] }
 0x436   :  { %v3655_v42 = vmul.f32 %v3336_v24, %v3336_v24  ;;  %v3339_v31 = vpop.f32.mrb[58].mxu1  ;;  %v7735_v30 = vpack.c.bf16 %v4919_v35, %v4918_v54  ;;  %v4922_v8 = vld [vmem:[%s12465_s3 + $0x11f0] sm:$0xff]  ;;  %v4923_v37 = vld [vmem:[%s12465_s3 + $0x11f8] sm:$0xff] }
 0x437   :  { %v3340_v48 = vadd.f32 %v3339_v31, %v10565_v53  ;;  %v3341_v43 = vpop.f32.mrb[59].mxu1  ;;  %v4897_v53 = vld [vmem:[%s12465_s3 + $0x1128] sm:$0xff] }
 0x438   :  { %v3342_v55 = vadd.f32 %v3341_v43, %v10568_v1  ;;  %4097 = vmatprep.mubr.f32.mxu0 %v3655_v42  ;;  %v7689_v26 = vpack.c.bf16 %v4897_v53, %v4896_v18  ;;  %v4880_v1 = vld [vmem:[%s12465_s3 + $0x10a0] sm:$0xff]  ;;  %v4911_v43 = vld [vmem:[%s12465_s3 + $0x1198] sm:$0xff]  ;;  %v4890_v53 = vld [vmem:[%s12465_s3 + $0x10f0] sm:$0xff] }
 0x439   :  { %v3667_v52 = vmul.f32 %v3340_v48, %v3340_v48  ;;  %4098 = vmatmul.mubr.f32.vlgmr.msra.gmra.mrb[70].mxu0 %v3654_v63  ;;  %v7691_v33 = vpack.c.bf16 %v4881_v44, %v4880_v1  ;;  %v4907_v63 = vld [vmem:[%s12465_s3 + $0x1178] sm:$0xff]  ;;  %v4910_v48 = vld [vmem:[%s12465_s3 + $0x1190] sm:$0xff]  ;;  %v4912_v44 = vld [vmem:[%s12465_s3 + $0x11a0] sm:$0xff] }
 0x43a   :  { %v3668_v50 = vmul.f32 %v3342_v55, %v3342_v55  ;;  %7684 = vmatpush3.bf16.msra.mxu0 %v7683_v2  ;;  %v7717_v2 = vpack.c.bf16 %v4927_v29, %v4926_v3  ;;  %v7709_v18 = vpack.c.bf16 %v4907_v63, %v4906_v12  ;;  %v7723_v22 = vpack.c.bf16 %v4913_v39, %v4912_v44  ;;  %v4938_v3 = vld [vmem:[%s12465_s3 + $0x1270] sm:$0xff]  ;;  %v4939_v29 = vld [vmem:[%s12465_s3 + $0x1278] sm:$0xff] }
 0x43b   :  { %7686 = vmatprep.subr.bf16.mxu0 %v7685_v59 }
 0x43c   :  { %4102 = vmatprep.mubr.f32.mxu0 %v3668_v50  ;;  %v7719_v50 = vpack.c.bf16 %v4911_v43, %v4910_v48 }
 0x43d   :  { %4103 = vmatmul.mubr.f32.gmra.mrb[72].mxu0 %v3667_v52 }
 0x43e   :  { %7688 = vmatpush3.bf16.msra.mxu0 %v7687_v61  ;;  %v4940_v61 = vld [vmem:[%s12465_s3 + $0x1280] sm:$0xff] }
 0x43f   :  { %7690 = vmatprep.subr.bf16.mxu0 %v7689_v26  ;;  %v4941_v26 = vld [vmem:[%s12465_s3 + $0x1288] sm:$0xff] }
 0x440   :  { %v12309_v6 = vpack.c.bf16 %v4941_v26, %v4940_v61 }
 0x442   :  { %7692 = vmatpush3.bf16.msra.mxu0 %v7691_v33  ;;  %v4930_v33 = vld [vmem:[%s12465_s3 + $0x1230] sm:$0xff] }
 0x443   :  { %7694 = vmatprep.subr.bf16.mxu0 %v7693_v47  ;;  %v4931_v47 = vld [vmem:[%s12465_s3 + $0x1238] sm:$0xff] }
 0x444   :  { %v7725_v49 = vpack.c.bf16 %v4931_v47, %v4930_v33 }
 0x446   :  { %7696 = vmatpush3.bf16.msra.mxu0 %v7695_v57  ;;  %v4915_v57 = vld [vmem:[%s12465_s3 + $0x11b8] sm:$0xff] }
 0x447   :  { %7698 = vmatprep.subr.bf16.mxu0 %v7697_v34  ;;  %v4932_v34 = vld [vmem:[%s12465_s3 + $0x1240] sm:$0xff]  ;;  %v7727_v51 = vpack.c.bf16 %v4915_v57, %v4914_v5 }
 0x448   :  { %v3410_v25 = vpop.f32.mrb[58].mxu0  ;;  %v7729_v17 = vpack.c.bf16 %v4933_v62, %v4932_v34 }
 0x449   :  { %v3411_v32 = vadd.f32 %v3410_v25, %v10667_v4  ;;  %v3412_v58 = vpop.f32.mrb[59].mxu0 }
 0x44a   :  { %v3413_v13 = vadd.f32 %v3412_v58, %v10676_v0  ;;  %7700 = vmatpush3.bf16.msra.mxu0 %v7699_v60  ;;  %v4917_v60 = vld [vmem:[%s12465_s3 + $0x11c8] sm:$0xff] }
 0x44b   :  { %v3656_v7 = vmul.f32 %v3411_v32, %v3411_v32  ;;  %7702 = vmatprep.subr.bf16.mxu0 %v7701_v23  ;;  %v4934_v23 = vld [vmem:[%s12465_s3 + $0x1250] sm:$0xff]  ;;  %v7731_v40 = vpack.c.bf16 %v4917_v60, %v4916_v28  ;;  %v4936_v32 = vld [vmem:[%s12465_s3 + $0x1260] sm:$0xff]  ;;  %v4937_v58 = vld [vmem:[%s12465_s3 + $0x1268] sm:$0xff] }
 0x44c   :  { %v3657_v36 = vmul.f32 %v3413_v13, %v3413_v13  ;;  %v3416_v24 = vpop.f32.mrb[60].mxu0  ;;  %v7733_v25 = vpack.c.bf16 %v4935_v14, %v4934_v23  ;;  %v7737_v11 = vpack.c.bf16 %v4937_v58, %v4936_v32  ;;  %v4920_v13 = vld [vmem:[%s12465_s3 + $0x11e0] sm:$0xff] }
 0x44d   :  { %v3417_v42 = vadd.f32 %v3416_v24, %v10667_v4  ;;  %v3418_v31 = vpop.f32.mrb[61].mxu0  ;;  %v4929_v4 = vld [vmem:[%s12465_s3 + $0x1228] sm:$0xff] }
 0x44e   :  { %v3419_v59 = vadd.f32 %v3418_v31, %v10676_v0  ;;  %4172 = vmatprep.mubr.f32.mxu1 %v3657_v36  ;;  %7704 = vmatpush3.bf16.msra.mxu0 %v7703_v20  ;;  %v4891_v0 = vld [vmem:[%s12465_s3 + $0x10f8] sm:$0xff]  ;;  %v7721_v1 = vpack.c.bf16 %v4929_v4, %v4928_v56  ;;  %v4921_v20 = vld [vmem:[%s12465_s3 + $0x11e8] sm:$0xff]  ;;  %v7743_v36 = vpack.c.bf16 %v4923_v37, %v4922_v8  ;;  %v4422_v37 = vld [vmem:[%s12466_s4 + $0x10] sm:$0xff] }
 0x44f   :  { %v3669_v55 = vmul.f32 %v3417_v42, %v3417_v42  ;;  %4173 = vmatmul.mubr.f32.vlgmr.msra.gmra.mrb[72].mxu1 %v3656_v7  ;;  %7706 = vmatprep.subr.bf16.mxu0 %v7705_v27  ;;  %v7711_v16 = vpack.c.bf16 %v4891_v0, %v4890_v53  ;;  %v7739_v7 = vpack.c.bf16 %v4921_v20, %v4920_v13  ;;  %v4942_v42 = vld [vmem:[%s12465_s3 + $0x1290] sm:$0xff]  ;;  %v4943_v31 = vld [vmem:[%s12465_s3 + $0x1298] sm:$0xff] }
 0x450   :  { %v3670_v52 = vmul.f32 %v3419_v59, %v3419_v59  ;;  %7716 = vmatpush3.bf16.msra.mxu1 %v7715_v21  ;;  %v7741_v27 = vpack.c.bf16 %v4939_v29, %v4938_v3  ;;  %v7749_v56 = vpack.c.bf16 %v4943_v31, %v4942_v42  ;;  %v4421_v29 = vld [vmem:[%s12466_s4 + $0x8] sm:$0xff]  ;;  %v4426_v42 = vld [vmem:[%s12466_s4 + $0x30] sm:$0xff]  ;;  %v4427_v31 = vld [vmem:[%s12466_s4 + $0x38] sm:$0xff] }
 0x451   :  { %7718 = vmatprep.subr.bf16.mxu1 %v7717_v2 }
 0x452   :  { %4177 = vmatprep.mubr.f32.mxu1 %v3670_v52  ;;  %7708 = vmatpush3.bf16.msra.mxu0 %v7707_v15  ;;  %v4947_v52 = vld [vmem:[%s12465_s3 + $0x12b8] sm:$0xff] }
 0x453   :  { %4178 = vmatmul.mubr.f32.gmra.mrb[74].mxu1 %v3669_v55  ;;  %7710 = vmatprep.subr.bf16.mxu0 %v7709_v18  ;;  %v4944_v55 = vld [vmem:[%s12465_s3 + $0x12a0] sm:$0xff]  ;;  %v4945_v18 = vld [vmem:[%s12465_s3 + $0x12a8] sm:$0xff] }
 0x454   :  { %7720 = vmatpush3.bf16.msra.mxu1 %v7719_v50 }
 0x455   :  { %7722 = vmatprep.subr.bf16.mxu1 %v7721_v1 }
 0x456   :  { %7712 = vmatpush3.bf16.msra.mxu0 %v7711_v16 }
 0x457   :  { %7746 = vmatprep.subr.bf16.mxu0 %v12309_v6 }
 0x458   :  { %7724 = vmatpush3.bf16.msra.mxu1 %v7723_v22 }
 0x459   :  { %7726 = vmatprep.subr.bf16.mxu1 %v7725_v49 }
 0x45c   :  { %7728 = vmatpush3.bf16.msra.mxu1 %v7727_v51 }
 0x45d   :  { %7730 = vmatprep.subr.bf16.mxu1 %v7729_v17 }
 0x460   :  { %7732 = vmatpush3.bf16.msra.mxu1 %v7731_v40 }
 0x461   :  { %7734 = vmatprep.subr.bf16.mxu1 %v7733_v25 }
 0x464   :  { %7736 = vmatpush3.bf16.msra.mxu1 %v7735_v30 }
 0x465   :  { %7738 = vmatprep.subr.bf16.mxu1 %v7737_v11 }
 0x468   :  { %7740 = vmatpush3.bf16.msra.mxu1 %v7739_v7 }
 0x469   :  { %7742 = vmatprep.subr.bf16.mxu1 %v7741_v27 }
 0x46c   :  { %7744 = vmatpush3.bf16.msra.mxu1 %v7743_v36  ;;  %v4423_v36 = vld [vmem:[%s12466_s4 + $0x18] sm:$0xff] }
 0x472   :  { %v3487_v24 = vpop.f32.mrb[60].mxu1 }
 0x473   :  { %v3488_v21 = vadd.f32 %v3487_v24, %v10789_v19  ;;  %v3489_v12 = vpop.f32.mrb[61].mxu1  ;;  %v7765_v24 = vpack.c.bf16 %v4423_v36, %v4422_v37 }
 0x474   :  { %v3490_v63 = vadd.f32 %v3489_v12, %v10794_v9  ;;  %v4425_v12 = vld [vmem:[%s12466_s4 + $0x28] sm:$0xff] }
 0x475   :  { %v3658_v2 = vmul.f32 %v3488_v21, %v3488_v21  ;;  %v4424_v21 = vld [vmem:[%s12466_s4 + $0x20] sm:$0xff] }
 0x476   :  { %v3659_v48 = vmul.f32 %v3490_v63, %v3490_v63  ;;  %v3493_v43 = vpop.f32.mrb[62].mxu1  ;;  %v7769_v63 = vpack.c.bf16 %v4425_v12, %v4424_v21 }
 0x477   :  { %v3494_v59 = vadd.f32 %v3493_v43, %v10789_v19  ;;  %v3495_v15 = vpop.f32.mrb[63].mxu1  ;;  %v7753_v19 = vpack.c.bf16 %v4945_v18, %v4944_v55  ;;  %v4429_v43 = vld [vmem:[%s12466_s4 + $0x48] sm:$0xff]  ;;  %v4432_v55 = vld [vmem:[%s12466_s4 + $0x60] sm:$0xff] }
 0x478   :  { %v3496_v4 = vadd.f32 %v3495_v15, %v10794_v9  ;;  %4247 = vmatprep.mubr.f32.mxu0 %v3659_v48  ;;  %v4946_v9 = vld [vmem:[%s12465_s3 + $0x12b0] sm:$0xff]  ;;  %v4428_v48 = vld [vmem:[%s12466_s4 + $0x40] sm:$0xff]  ;;  %v4433_v18 = vld [vmem:[%s12466_s4 + $0x68] sm:$0xff] }
 0x479   :  { %v3671_v53 = vmul.f32 %v3494_v59, %v3494_v59  ;;  %4248 = vmatmul.mubr.f32.vlgmr.msra.gmra.mrb[74].mxu0 %v3658_v2  ;;  %v7757_v50 = vpack.c.bf16 %v4947_v52, %v4946_v9  ;;  %v7773_v2 = vpack.c.bf16 %v4427_v31, %v4426_v42  ;;  %v7777_v59 = vpack.c.bf16 %v4429_v43, %v4428_v48  ;;  %v4430_v15 = vld [vmem:[%s12466_s4 + $0x50] sm:$0xff] }
 0x47a   :  { %v3672_v0 = vmul.f32 %v3496_v4, %v3496_v4  ;;  %7748 = vmatpush3.bf16.msra.mxu0 %v12309_v6 }
 0x47b   :  { %7750 = vmatprep.subr.bf16.mxu0 %v7749_v56 }
 0x47c   :  { %4252 = vmatprep.mubr.f32.mxu0 %v3672_v0  ;;  %v4434_v0 = vld [vmem:[%s12466_s4 + $0x70] sm:$0xff] }
 0x47d   :  { %4253 = vmatmul.mubr.f32.gmra.mrb[76].mxu0 %v3671_v53  ;;  %v7785_v53 = vpack.c.bf16 %v4433_v18, %v4432_v55 }
 0x47e   :  { %7752 = vmatpush3.bf16.msra.mxu0 %v7749_v56  ;;  %v4431_v56 = vld [vmem:[%s12466_s4 + $0x58] sm:$0xff] }
 0x47f   :  { %7754 = vmatprep.subr.bf16.mxu0 %v7753_v19  ;;  %v7781_v4 = vpack.c.bf16 %v4431_v56, %v4430_v15 }
 0x482   :  { %7756 = vmatpush3.bf16.msra.mxu0 %v7753_v19  ;;  %v4435_v19 = vld [vmem:[%s12466_s4 + $0x78] sm:$0xff] }
 0x483   :  { %7758 = vmatprep.subr.bf16.mxu0 %v7757_v50  ;;  %v7789_v9 = vpack.c.bf16 %v4435_v19, %v4434_v0 }
 0x486   :  { %7760 = vmatpush3.bf16.msra.mxu0 %v7757_v50 }
 0x488   :  { %v3564_v61 = vpop.f32.mrb[62].mxu0 }
 0x489   :  { %v3565_v26 = vadd.f32 %v3564_v61, %v10828_v45  ;;  %v3566_v1 = vpop.f32.mrb[63].mxu0 }
 0x48a   :  { %v3567_v44 = vadd.f32 %v3566_v1, %v10833_v46 }
 0x48b   :  { %v3660_v39 = vmul.f32 %v3565_v26, %v3565_v26 }
 0x48c   :  { %v3661_v16 = vmul.f32 %v3567_v44, %v3567_v44  ;;  %v3570_v33 = vpop.f32.mrb[64].mxu0 }
 0x48d   :  { %v3571_v47 = vadd.f32 %v3570_v33, %v10828_v45  ;;  %v3572_v6 = vpop.f32.mrb[65].mxu0 }
 0x48e   :  { %v3573_v22 = vadd.f32 %v3572_v6, %v10833_v46  ;;  %4322 = vmatprep.mubr.f32.mxu1 %v3661_v16 }
 0x48f   :  { %v3673_v49 = vmul.f32 %v3571_v47, %v3571_v47  ;;  %4323 = vmatmul.mubr.f32.vlgmr.msra.gmra.mrb[76].mxu1 %v3660_v39 }
 0x490   :  { %v3674_v5 = vmul.f32 %v3573_v22, %v3573_v22 }
 0x492   :  { %4327 = vmatprep.mubr.f32.mxu1 %v3674_v5  ;;  %v5535_v57 = vpop.f32.mrb[64].mxu1 }
 0x493   :  { %4328 = vmatmul.mubr.f32.gmra.mrb[78].mxu1 %v3673_v49  ;;  %v5536_v34 = vpop.f32.mrb[65].mxu1 }
 0x494   :  { %v5537_v62 = vadd.f32 %v5536_v34, %v5535_v57 }
 0x496   :  { %v3642_v51 = vadd.f32 %v5537_v62, %v10852_v41  ;;  %v5538_v17 = vpop.f32.mrb[66].mxu1 }
 0x497   :  { %v5539_v28 = vpop.f32.mrb[67].mxu1 }
 0x498   :  { %v3662_v60 = vmul.f32 %v3642_v51, %v3642_v51  ;;  %v5540_v23 = vadd.f32 %v5539_v28, %v5538_v17 }
 0x49a   :  { %v3647_v45 = vadd.f32 %v5540_v23, %v10852_v41  ;;  %5851 = vmatprep.mubr.msk.f32.mxu0 %vm2045_vm0, %v3662_v60  ;;  %v4420_v41 = vld [vmem:[%s12466_s4] sm:$0xff] }
 0x49b   :  { %v7761_v27 = vpack.c.bf16 %v4421_v29, %v4420_v41 }
 0x49c   :  { %v3675_v46 = vmul.f32 %v3647_v45, %v3647_v45 }
 0x49d   :  { %7762 = vmatprep.subr.bf16.mxu1 %v7761_v27 }
 0x49e   :  { %5852 = vmatmul.mubr.msk.f32.vlgmr.msra.gmra.mrb[40].mxu0 %vm2045_vm0, %v3675_v46  ;;  %7764 = vmatpush3.bf16.msra.mxu1 %v7761_v27 }
 0x49f   :  { %7766 = vmatprep.subr.bf16.mxu1 %v7765_v24 }
 0x4a2   :  { %7768 = vmatpush3.bf16.msra.mxu1 %v7765_v24 }
 0x4a3   :  { %7770 = vmatprep.subr.bf16.mxu1 %v7769_v63 }
 0x4a6   :  { %7772 = vmatpush3.bf16.msra.mxu1 %v7769_v63 }
 0x4a7   :  { %7774 = vmatprep.subr.bf16.mxu1 %v7773_v2 }
 0x4aa   :  { %7776 = vmatpush3.bf16.msra.mxu1 %v7773_v2 }
 0x4ab   :  { %7778 = vmatprep.subr.bf16.mxu1 %v7777_v59 }
 0x4ae   :  { %7780 = vmatpush3.bf16.msra.mxu1 %v7777_v59 }
 0x4af   :  { %7782 = vmatprep.subr.bf16.mxu1 %v7781_v4 }
 0x4b2   :  { %7784 = vmatpush3.bf16.msra.mxu1 %v7781_v4 }
 0x4b3   :  { %7786 = vmatprep.subr.bf16.mxu1 %v7785_v53 }
 0x4b6   :  { %7788 = vmatpush3.bf16.msra.mxu1 %v7785_v53 }
 0x4b7   :  { %7790 = vmatprep.subr.bf16.mxu1 %v7789_v9 }
 0x4ba   :  { %7792 = vmatpush3.bf16.msra.mxu1 %v7789_v9 }
 0x4cc   :  { %v5573_v14 = vpop.f32.mrb[66].mxu0 }
 0x4cd   :  { %v5574_v40 = vpop.f32.mrb[67].mxu0 }
 0x4ce   :  { %v5575_v25 = vadd.f32 %v5574_v40, %v5573_v14 }
 0x4d0   :  { %v5576_v54 = vpop.f32.mrb[68].mxu0 }
 0x4d1   :  { %v5577_v35 = vpop.f32.mrb[69].mxu0 }
 0x4d2   :  { %v5578_v32 = vadd.f32 %v5577_v35, %v5576_v54 }
 0x4e2   :  { %v5611_v58 = vpop.f32.mrb[68].mxu1 }
 0x4e3   :  { %v5612_v30 = vpop.f32.mrb[69].mxu1 }
 0x4e4   :  { %v5613_v11 = vadd.f32 %v5612_v30, %v5611_v58 }
 0x4e6   :  { %v4025_v13 = vadd.f32 %v5613_v11, %v5575_v25  ;;  %v5614_v20 = vpop.f32.mrb[70].mxu1 }
 0x4e7   :  { %v5615_v3 = vpop.f32.mrb[71].mxu1 }
 0x4e8   :  { %v5616_v7 = vadd.f32 %v5615_v3, %v5614_v20 }
 0x4ea   :  { %v4030_v8 = vadd.f32 %v5616_v7, %v5578_v32 }
 0x50c   :  { %v5649_v52 = vpop.f32.mrb[70].mxu0 }
 0x50d   :  { %v5650_v50 = vpop.f32.mrb[71].mxu0 }
 0x50e   :  { %v5651_v61 = vadd.f32 %v5650_v50, %v5649_v52 }
 0x510   :  { %v4100_v26 = vadd.f32 %v5651_v61, %v4025_v13  ;;  %v5652_v1 = vpop.f32.mrb[72].mxu0 }
 0x511   :  { %v5653_v44 = vpop.f32.mrb[73].mxu0 }
 0x512   :  { %v5654_v39 = vadd.f32 %v5653_v44, %v5652_v1 }
 0x514   :  { %v4105_v16 = vadd.f32 %v5654_v39, %v4030_v8 }
 0x522   :  { %v5687_v33 = vpop.f32.mrb[72].mxu1 }
 0x523   :  { %v5688_v47 = vpop.f32.mrb[73].mxu1 }
 0x524   :  { %v5689_v6 = vadd.f32 %v5688_v47, %v5687_v33 }
 0x526   :  { %v4175_v22 = vadd.f32 %v5689_v6, %v4100_v26  ;;  %v5690_v49 = vpop.f32.mrb[74].mxu1 }
 0x527   :  { %v5691_v5 = vpop.f32.mrb[75].mxu1 }
 0x528   :  { %v5692_v57 = vadd.f32 %v5691_v5, %v5690_v49 }
 0x52a   :  { %v4180_v34 = vadd.f32 %v5692_v57, %v4105_v16 }
 0x54c   :  { %v5725_v62 = vpop.f32.mrb[74].mxu0 }
 0x54d   :  { %v5726_v51 = vpop.f32.mrb[75].mxu0 }
 0x54e   :  { %v5727_v17 = vadd.f32 %v5726_v51, %v5725_v62 }
 0x550   :  { %v4250_v28 = vadd.f32 %v5727_v17, %v4175_v22  ;;  %v5728_v60 = vpop.f32.mrb[76].mxu0 }
 0x551   :  { %v5729_v23 = vpop.f32.mrb[77].mxu0 }
 0x552   :  { %v5730_v45 = vadd.f32 %v5729_v23, %v5728_v60 }
 0x554   :  { %v4255_v46 = vadd.f32 %v5730_v45, %v4180_v34 }
 0x562   :  { %v5763_v14 = vpop.f32.mrb[76].mxu1 }
 0x563   :  { %v5764_v40 = vpop.f32.mrb[77].mxu1 }
 0x564   :  { %v5765_v25 = vadd.f32 %v5764_v40, %v5763_v14 }
 0x566   :  { %v4325_v54 = vadd.f32 %v5765_v25, %v4250_v28  ;;  %v5766_v35 = vpop.f32.mrb[78].mxu1 }
 0x567   :  { %v5767_v32 = vpop.f32.mrb[79].mxu1 }
 0x568   :  { %v5768_v58 = vadd.f32 %v5767_v32, %v5766_v35  ;;  %v7807_v30 = vadd.f32 %v11823_v10, %v4325_v54  ;;  %v4950_v10 = vld [vmem:[%s12467_s5] ss:$0 sm:$0xff] }
 0x56a   :  { %v4330_v11 = vadd.f32 %v5768_v58, %v4255_v46 }
 0x56c   :  { %v7799_v13 = vadd.f32 %v11851_v38, %v4330_v11 }
 0x571   :  { %v5853_v20 = vpop.f32.mrb[40].mxu0 }
 0x572   :  { %v7800_v3 = vadd.f32 %v7799_v13, %v5853_v20  ;;  %v4399_v41 = vpop.f32.mrb[41].mxu0 }
 0x573   :  { %v7808_v29 = vadd.f32 %v7807_v30, %v4399_v41 }
 0x574   :  { %v4411_v7 = vmul.f32 0.013333334, %v7800_v3 }
 0x575   :  { %v4410_v27 = vmul.f32 0.013333334, %v7808_v29 }
 0x576   :  { %7816 = vlog2.f32 %v4411_v7 }
 0x577   :  { %7818 = vlog2.f32 %v4410_v27 }
 0x580   :  { %v7817_v8 = vpop.eup %7816 }
 0x581   :  { %v7819_v37 = vpop.eup %7818  ;;  %v4415_v36 = vmul.f32 0.6931472, %v7817_v8 }
 0x582   :  { %v4413_v24 = vmul.f32 0.6931472, %v7819_v37 }
 0x583   :  { %v4417_v21 = vmax.f32 %v4415_v36, 1e-07 }
 0x584   :  { %v4416_v12 = vmax.f32 %v4413_v24, 1e-07 }
 0x585   :  { %v4419_v42 = vmin.f32 %v4417_v21, 10000000.0 }
 0x586   :  { %v4418_v63 = vmin.f32 %v4416_v12, 10000000.0 }
 0x588   :  { %5886 = vmatprep.mubr.f32.mxu1 %v4418_v63 }
 0x589   :  { %5887 = vmatmul.mubr.f32.vlgmr.msra.gmra.mrb[80].mxu1 %v4419_v42 }
 0x65c   :  { %v5888_v38 = vpop.f32.mrb[80].mxu1 }
 0x65d   :  { %v4515_v31 = vadd.f32 %v5888_v38, %v4950_v10  ;;  %v4509_v2 = vpop.f32.mrb[81].mxu1 }
 0x65e   :  { %v4510_v48 = vadd.f32 %v4950_v10, %v4509_v2 }
 0x65f   :  { %4519 = vst [vmem:[#allocation2 + $0x8] sm:$0xff] %v4515_v31 }
 0x660   :  { %4518 = vst [vmem:[#allocation2] sm:$0xff] %v4510_v48 }
 0x661   :  { %7835 = shalt.err (!%p7832_p4)
}
 0x662   :  { %s7836_s5 = scalar_lea.hbm %s12468_s6, 256 }
 0x663   :  { %p7837_p5 = scmp.ne.s32.totalorder %s12468_s6, %s7836_s5  ;;  %p7840_p6 = scmp.lt.u32.totalorder %s7836_s5, %s12468_s6 }
 0x665   :  { %p7842_p7 = pnand %p7840_p6, %p7837_p5 }
 0x667   :  { %7845 = shalt.err (!%p7842_p7)
}
 0x668   :  { %s7849_s14 = smov 128   ;;  %s7850_s15 = smov 8  }
 0x669   :  { %4531 = dma.vmem_to_hbm [thread:$0]  %s4526_s0, 256, %s12468_s6, [#allocation3], %s7849_s14, %s7849_s14, %s7850_s15  }
 0x66a   :  { %7846 = dma.done.wait [#allocation3], 256  }
 0x66b   :  { %7847 = vsyncadd [#allocation3], 4294967040 }
 0x66c   :  { %4535 = vsyncpa [#allocation3], 1 }

</bundles_post_ra>
